<compile_context>
chip_gen: v5e
topology: v5e:2x2
jax: 0.10.0
libtpu: 0.0.40
codegen_flags: <defaults>
</compile_context>

<pallas_src>
import functools
import math

import jax
import jax.numpy as jnp
from jax.experimental import pallas as pl
from jax.experimental.pallas import tpu as pltpu


D_MODEL = 512
HEADS = 8


def _round_up(x, m):
    return ((x + m - 1) // m) * m


def _cdiv(a, b):
    return -(-a // b)


def _pick_row_tile(rows, max_tm):
    """Row tile (multiple of 8) that minimizes padding, never > max_tm."""
    if rows <= max_tm:
        return _round_up(rows, 8)
    n_tiles = _cdiv(rows, max_tm)
    return _round_up(_cdiv(rows, n_tiles), 8)


def _pick_col_tile(dim, max_t):
    """Largest 128-multiple divisor of dim that is <= max_t (or the full dim)."""
    if dim <= max_t:
        return dim
    t = (max_t // 128) * 128
    while t >= 128:
        if dim % t == 0:
            return t
        t -= 128
    return dim  # TODO(synk): pad dims that are not multiples of 128.


# ---------------------------------------------------------------------------
# Fused q/k/v projection: one kernel, three matmuls, activations read once.
#   xq/xk/xv: (rows, K) bf16,  wq/wk/wv: (K, N) bf16,  b_qkv: (3, N) bf16
# ---------------------------------------------------------------------------
def _qkv_proj_kernel(xq_ref, xk_ref, xv_ref, wq_ref, wk_ref, wv_ref, b_ref,
                     oq_ref, ok_ref, ov_ref):
    def proj(x_ref, w_ref, bias_row, o_ref):
        acc = jnp.dot(x_ref[...], w_ref[...], preferred_element_type=jnp.float32)
        o_ref[...] = (acc + bias_row.astype(jnp.float32)).astype(o_ref.dtype)

    proj(xq_ref, wq_ref, b_ref[0:1, :], oq_ref)
    proj(xk_ref, wk_ref, b_ref[1:2, :], ok_ref)
    proj(xv_ref, wv_ref, b_ref[2:3, :], ov_ref)


def qkv_projection(xq, xk, xv, wq, wk, wv, b_qkv, *, max_tm=512):
    rows, K = xq.shape
    Kw, N = wq.shape
    assert K == Kw and K % 128 == 0 and N % 128 == 0, (K, N)

    tm = _pick_row_tile(rows, max_tm)
    rows_p = _round_up(rows, tm)
    if rows_p != rows:
        pad = ((0, rows_p - rows), (0, 0))
        xq, xk, xv = (jnp.pad(a, pad) for a in (xq, xk, xv))

    x_spec = pl.BlockSpec((tm, K), lambda i: (i, 0))
    w_spec = pl.BlockSpec((K, N), lambda i: (0, 0))
    b_spec = pl.BlockSpec((3, N), lambda i: (0, 0))
    o_spec = pl.BlockSpec((tm, N), lambda i: (i, 0))

    outs = pl.pallas_call(
        _qkv_proj_kernel,
        out_shape=tuple(jax.ShapeDtypeStruct((rows_p, N), xq.dtype) for _ in range(3)),
        grid_spec=pltpu.PrefetchScalarGridSpec(
            num_scalar_prefetch=0,
            grid=(rows_p // tm,),
            in_specs=[x_spec, x_spec, x_spec, w_spec, w_spec, w_spec, b_spec],
            out_specs=[o_spec, o_spec, o_spec],
        ),
        compiler_params=pltpu.CompilerParams(dimension_semantics=("parallel",)),
    )(xq, xk, xv, wq, wk, wv, b_qkv)
    if rows_p != rows:
        outs = tuple(o[:rows] for o in outs)
    return outs


# ---------------------------------------------------------------------------
# Generic linear  y = x @ W + b  (used for the output projection).
# Skips the accumulator scratch when K fits in a single block.
# ---------------------------------------------------------------------------
def _linear_kernel(x_ref, w_ref, b_ref, o_ref):
    acc = jnp.dot(x_ref[...], w_ref[...], preferred_element_type=jnp.float32)
    o_ref[...] = (acc + b_ref[...].astype(jnp.float32)).astype(o_ref.dtype)


def _linear_kernel_acc(x_ref, w_ref, b_ref, o_ref, acc_ref):
    kk = pl.program_id(2)

    @pl.when(kk == 0)
    def _():
        acc_ref[...] = jnp.zeros_like(acc_ref)

    acc_ref[...] += jnp.dot(x_ref[...], w_ref[...], preferred_element_type=jnp.float32)

    @pl.when(kk == pl.num_programs(2) - 1)
    def _():
        o_ref[...] = (acc_ref[...] + b_ref[...].astype(jnp.float32)).astype(o_ref.dtype)


def linear(x2, w, b, *, out_dtype=None, max_tm=512, max_tn=512, max_tk=512):
    rows, K = x2.shape
    Kw, N = w.shape
    assert K == Kw, (K, Kw)
    out_dtype = x2.dtype if out_dtype is None else out_dtype

    tm = _pick_row_tile(rows, max_tm)
    rows_p = _round_up(rows, tm)
    if rows_p != rows:
        x2 = jnp.pad(x2, ((0, rows_p - rows), (0, 0)))

    tn = _pick_col_tile(N, max_tn)
    tk = _pick_col_tile(K, max_tk)
    n_k = K // tk

    in_specs = [
        pl.BlockSpec((tm, tk), lambda i, j, kk: (i, kk)),
        pl.BlockSpec((tk, tn), lambda i, j, kk: (kk, j)),
        pl.BlockSpec((1, tn), lambda i, j, kk: (0, j)),
    ]
    out_spec = pl.BlockSpec((tm, tn), lambda i, j, kk: (i, j))

    if n_k == 1:
        kernel, scratch = _linear_kernel, []
    else:
        kernel, scratch = _linear_kernel_acc, [pltpu.VMEM((tm, tn), jnp.float32)]

    out = pl.pallas_call(
        kernel,
        out_shape=jax.ShapeDtypeStruct((rows_p, N), out_dtype),
        grid_spec=pltpu.PrefetchScalarGridSpec(
            num_scalar_prefetch=0,
            grid=(rows_p // tm, N // tn, n_k),
            in_specs=in_specs,
            out_specs=out_spec,
            scratch_shapes=scratch,
        ),
        compiler_params=pltpu.CompilerParams(
            dimension_semantics=("parallel", "parallel", "arbitrary"),
        ),
    )(x2, w, b.reshape(1, N))
    return out[:rows] if rows_p != rows else out


# ---------------------------------------------------------------------------
# Attention on the (bs, seq, d_model) projection layout.
# One grid step handles all `heads_per_step` heads of one batch element:
# heads are static d_k-wide column slices; the output is written back in the
# same layout, which IS the "concat" layout expected by the output projection.
# ---------------------------------------------------------------------------
def _attention_kernel(q_ref, k_ref, v_ref, o_ref, *, heads, d_k, scale):
    q = q_ref[0]  # (Sq, heads*d_k) bf16
    k = k_ref[0]  # (Sk, heads*d_k)
    v = v_ref[0]  # (Sk, heads*d_k)

    for h in range(heads):  # static unroll over heads in this block
        sl = slice(h * d_k, (h + 1) * d_k)
        qh, kh, vh = q[:, sl], k[:, sl], v[:, sl]

        # qh @ kh^T without materializing a transpose; bf16 operands, f32 acc.
        s = jax.lax.dot_general(
            qh, kh, (((1,), (1,)), ((), ())), preferred_element_type=jnp.float32
        ) * jnp.float32(scale)                              # (Sq, Sk) f32

        m = jnp.max(s, axis=-1, keepdims=True)
        p = jnp.exp(s - m)
        denom = jnp.sum(p, axis=-1, keepdims=True)
        inv = pl.reciprocal(denom, approx=True)             # EUP vrcp

        o = jnp.dot(p.astype(vh.dtype), vh, preferred_element_type=jnp.float32) * inv
        o_ref[0, :, sl] = o.astype(o_ref.dtype)


def attention(qp, kp, vp, *, heads, d_k, heads_per_step=None):
    """qp/kp/vp: (bs, seq, d_model) -> (bs, seq, d_model) in concat layout."""
    bs, seq, d_model = qp.shape
    if heads_per_step is None:
        heads_per_step = heads
    assert heads % heads_per_step == 0
    blk = heads_per_step * d_k
    assert blk == d_model or blk % 128 == 0, blk  # lane-dense output blocks
    hg = heads // heads_per_step
    scale = 1.0 / math.sqrt(d_k)

    io_spec = pl.BlockSpec((1, seq, blk), lambda b, g: (b, 0, g))
    return pl.pallas_call(
        functools.partial(_attention_kernel, heads=heads_per_step, d_k=d_k, scale=scale),
        out_shape=jax.ShapeDtypeStruct((bs, seq, d_model), qp.dtype),
        grid_spec=pltpu.PrefetchScalarGridSpec(
            num_scalar_prefetch=0,
            grid=(bs, hg),
            in_specs=[io_spec, io_spec, io_spec],
            out_specs=io_spec,
        ),
        compiler_params=pltpu.CompilerParams(
            dimension_semantics=("parallel", "parallel"),
        ),
    )(qp, kp, vp)


# ---------------------------------------------------------------------------
# Full MultiHeadAttention forward (inference path, mask=None).
# ---------------------------------------------------------------------------
def multi_head_attention(q, k, v, params, *, heads=HEADS, compute_dtype=jnp.bfloat16):
    bs, seq, d_model = q.shape
    d_k = d_model // heads
    cd = compute_dtype

    q2 = q.reshape(bs * seq, d_model).astype(cd)
    k2 = k.reshape(bs * seq, d_model).astype(cd)
    v2 = v.reshape(bs * seq, d_model).astype(cd)

    wq, wk, wv = (params[n].astype(cd) for n in ("wq", "wk", "wv"))
    b_qkv = jnp.stack([params["bq"], params["bk"], params["bv"]]).astype(cd)  # (3, N)

    qp, kp, vp = qkv_projection(q2, k2, v2, wq, wk, wv, b_qkv)
    qp = qp.reshape(bs, seq, d_model)
    kp = kp.reshape(bs, seq, d_model)
    vp = vp.reshape(bs, seq, d_model)

    # Attention output comes back already in (bs, seq, d_model) concat layout:
    # no head-split / concat transposes between pallas_calls.
    oh = attention(qp, kp, vp, heads=heads, d_k=d_k)

    out = linear(
        oh.reshape(bs * seq, d_model),
        params["wo"].astype(cd),
        params["bo"].astype(cd),
        out_dtype=jnp.float32,
    )
    return out.reshape(bs, seq, d_model)


if __name__ == "__main__":
    key = jax.random.PRNGKey(0)
    bs, seq = 2, 8

    keys = jax.random.split(key, 11)
    q = jax.random.normal(keys[0], (bs, seq, D_MODEL), dtype=jnp.float32)
    k = jax.random.normal(keys[1], (bs, seq, D_MODEL), dtype=jnp.float32)
    v = jax.random.normal(keys[2], (bs, seq, D_MODEL), dtype=jnp.float32)

    wscale = 1.0 / math.sqrt(D_MODEL)

    def mk_w(kk):
        return jax.random.normal(kk, (D_MODEL, D_MODEL), dtype=jnp.float32) * wscale

    def mk_b(kk):
        return jax.random.normal(kk, (D_MODEL,), dtype=jnp.float32) * wscale

    params = {
        "wq": mk_w(keys[3]), "bq": mk_b(keys[4]),
        "wk": mk_w(keys[5]), "bk": mk_b(keys[6]),
        "wv": mk_w(keys[7]), "bv": mk_b(keys[8]),
        "wo": mk_w(keys[9]), "bo": mk_b(keys[10]),
    }

    out = multi_head_attention(q, k, v, params, heads=HEADS)
    out = jax.block_until_ready(out)

    # Pure-JAX f32 reference (inference mode: no dropout, mask=None).
    def reference(q, k, v, p):
        d_k = D_MODEL // HEADS

        def lin(x, w, b):
            return jnp.dot(x, w) + b

        def split(x):
            return x.reshape(bs, seq, HEADS, d_k).transpose(0, 2, 1, 3)

        qh = split(lin(q, p["wq"], p["bq"]))
        kh = split(lin(k, p["wk"], p["bk"]))
        vh = split(lin(v, p["wv"], p["bv"]))
        s = jnp.einsum("bhqd,bhkd->bhqk", qh, kh) / math.sqrt(d_k)
        a = jax.nn.softmax(s, axis=-1)
        o = jnp.einsum("bhqk,bhkd->bhqd", a, vh)
        concat = o.transpose(0, 2, 1, 3).reshape(bs, seq, D_MODEL)
        return lin(concat, p["wo"], p["bo"])

    ref = jax.block_until_ready(reference(q, k, v, params))

    # Tolerance accommodates bf16 MXU operands (+ approx reciprocal): expected
    # error is O(1e-2); semantic errors would be O(1).
    assert out.shape == ref.shape, (out.shape, ref.shape)
    max_err = float(jnp.max(jnp.abs(out - ref)))
    assert jnp.allclose(out, ref, atol=5e-2, rtol=5e-2), (
        "mismatch vs reference; max abs diff = %g" % max_err
    )

    print("KERNEL_OK")
</pallas_src>

<mosaic_0001>
module attributes {stable_mosaic.version = 11 : i64} {
  func.func @_qkv_proj_kernel(%arg0: i32, %arg1: memref<16x512xbf16, #tpu.memory_space<vmem>>, %arg2: memref<16x512xbf16, #tpu.memory_space<vmem>>, %arg3: memref<16x512xbf16, #tpu.memory_space<vmem>>, %arg4: memref<512x512xbf16, #tpu.memory_space<vmem>>, %arg5: memref<512x512xbf16, #tpu.memory_space<vmem>>, %arg6: memref<512x512xbf16, #tpu.memory_space<vmem>>, %arg7: memref<3x512xbf16, #tpu.memory_space<vmem>>, %arg8: memref<16x512xbf16, #tpu.memory_space<vmem>>, %arg9: memref<16x512xbf16, #tpu.memory_space<vmem>>, %arg10: memref<16x512xbf16, #tpu.memory_space<vmem>>) attributes {dimension_semantics = [#tpu.dimension_semantics<parallel>], iteration_bounds = array<i64: 1>, scalar_prefetch = 0 : i64, scratch_operands = 0 : i64, tpu.core_type = #tpu.core_type<tc>, window_params = [{transform_indices = @transform_0, window_bounds = array<i64: 16, 512>}, {transform_indices = @transform_1, window_bounds = array<i64: 16, 512>}, {transform_indices = @transform_2, window_bounds = array<i64: 16, 512>}, {pipeline_mode = #tpu.pipeline_mode<synchronous>, transform_indices = @transform_3, window_bounds = array<i64: 512, 512>}, {pipeline_mode = #tpu.pipeline_mode<synchronous>, transform_indices = @transform_4, window_bounds = array<i64: 512, 512>}, {pipeline_mode = #tpu.pipeline_mode<synchronous>, transform_indices = @transform_5, window_bounds = array<i64: 512, 512>}, {pipeline_mode = #tpu.pipeline_mode<synchronous>, transform_indices = @transform_6, window_bounds = array<i64: 3, 512>}, {transform_indices = @transform_7, window_bounds = array<i64: 16, 512>}, {transform_indices = @transform_8, window_bounds = array<i64: 16, 512>}, {transform_indices = @transform_9, window_bounds = array<i64: 16, 512>}]} {
    %c0 = arith.constant 0 : index
    %c0_0 = arith.constant 0 : index
    %0 = vector.load %arg7[%c0, %c0_0] : memref<3x512xbf16, #tpu.memory_space<vmem>>, vector<1x512xbf16>
    %c0_1 = arith.constant 0 : index
    %c0_2 = arith.constant 0 : index
    %1 = vector.load %arg1[%c0_1, %c0_2] : memref<16x512xbf16, #tpu.memory_space<vmem>>, vector<16x512xbf16>
    %c0_3 = arith.constant 0 : index
    %c0_4 = arith.constant 0 : index
    %2 = vector.load %arg4[%c0_3, %c0_4] : memref<512x512xbf16, #tpu.memory_space<vmem>>, vector<512x512xbf16>
    %cst = arith.constant dense<0.000000e+00> : vector<16x512xf32>
    %3 = tpu.matmul %1, %2, %cst {dimension_numbers = #tpu.dot_dimension_numbers<[1], [0], [0], [1], [0, 0, 1, 1], [], []>} : vector<16x512xbf16>, vector<512x512xbf16>, vector<16x512xf32> -> vector<16x512xf32>
    %4 = arith.extf %0 : vector<1x512xbf16> to vector<1x512xf32>
    %5 = vector.broadcast %4 : vector<1x512xf32> to vector<16x512xf32>
    %6 = arith.addf %3, %5 : vector<16x512xf32>
    %7 = arith.truncf %6 : vector<16x512xf32> to vector<16x512xbf16>
    %c0_5 = arith.constant 0 : index
    %c0_6 = arith.constant 0 : index
    %8 = vector.load %arg8[%c0_5, %c0_6] : memref<16x512xbf16, #tpu.memory_space<vmem>>, vector<16x512xbf16>
    tpu.vector_store %arg8[%c0_5, %c0_6], %7 {strides = array<i32>} : memref<16x512xbf16, #tpu.memory_space<vmem>>, vector<16x512xbf16>,
    %c1 = arith.constant 1 : index
    %c0_7 = arith.constant 0 : index
    %9 = vector.load %arg7[%c1, %c0_7] : memref<3x512xbf16, #tpu.memory_space<vmem>>, vector<1x512xbf16>
    %c0_8 = arith.constant 0 : index
    %c0_9 = arith.constant 0 : index
    %10 = vector.load %arg2[%c0_8, %c0_9] : memref<16x512xbf16, #tpu.memory_space<vmem>>, vector<16x512xbf16>
    %c0_10 = arith.constant 0 : index
    %c0_11 = arith.constant 0 : index
    %11 = vector.load %arg5[%c0_10, %c0_11] : memref<512x512xbf16, #tpu.memory_space<vmem>>, vector<512x512xbf16>
    %cst_12 = arith.constant dense<0.000000e+00> : vector<16x512xf32>
    %12 = tpu.matmul %10, %11, %cst_12 {dimension_numbers = #tpu.dot_dimension_numbers<[1], [0], [0], [1], [0, 0, 1, 1], [], []>} : vector<16x512xbf16>, vector<512x512xbf16>, vector<16x512xf32> -> vector<16x512xf32>
    %13 = arith.extf %9 : vector<1x512xbf16> to vector<1x512xf32>
    %14 = vector.broadcast %13 : vector<1x512xf32> to vector<16x512xf32>
    %15 = arith.addf %12, %14 : vector<16x512xf32>
    %16 = arith.truncf %15 : vector<16x512xf32> to vector<16x512xbf16>
    %c0_13 = arith.constant 0 : index
    %c0_14 = arith.constant 0 : index
    %17 = vector.load %arg9[%c0_13, %c0_14] : memref<16x512xbf16, #tpu.memory_space<vmem>>, vector<16x512xbf16>
    tpu.vector_store %arg9[%c0_13, %c0_14], %16 {strides = array<i32>} : memref<16x512xbf16, #tpu.memory_space<vmem>>, vector<16x512xbf16>,
    %c2 = arith.constant 2 : index
    %c0_15 = arith.constant 0 : index
    %18 = vector.load %arg7[%c2, %c0_15] : memref<3x512xbf16, #tpu.memory_space<vmem>>, vector<1x512xbf16>
    %c0_16 = arith.constant 0 : index
    %c0_17 = arith.constant 0 : index
    %19 = vector.load %arg3[%c0_16, %c0_17] : memref<16x512xbf16, #tpu.memory_space<vmem>>, vector<16x512xbf16>
    %c0_18 = arith.constant 0 : index
    %c0_19 = arith.constant 0 : index
    %20 = vector.load %arg6[%c0_18, %c0_19] : memref<512x512xbf16, #tpu.memory_space<vmem>>, vector<512x512xbf16>
    %cst_20 = arith.constant dense<0.000000e+00> : vector<16x512xf32>
    %21 = tpu.matmul %19, %20, %cst_20 {dimension_numbers = #tpu.dot_dimension_numbers<[1], [0], [0], [1], [0, 0, 1, 1], [], []>} : vector<16x512xbf16>, vector<512x512xbf16>, vector<16x512xf32> -> vector<16x512xf32>
    %22 = arith.extf %18 : vector<1x512xbf16> to vector<1x512xf32>
    %23 = vector.broadcast %22 : vector<1x512xf32> to vector<16x512xf32>
    %24 = arith.addf %21, %23 : vector<16x512xf32>
    %25 = arith.truncf %24 : vector<16x512xf32> to vector<16x512xbf16>
    %c0_21 = arith.constant 0 : index
    %c0_22 = arith.constant 0 : index
    %26 = vector.load %arg10[%c0_21, %c0_22] : memref<16x512xbf16, #tpu.memory_space<vmem>>, vector<16x512xbf16>
    tpu.vector_store %arg10[%c0_21, %c0_22], %25 {strides = array<i32>} : memref<16x512xbf16, #tpu.memory_space<vmem>>, vector<16x512xbf16>,
    return
  }
  func.func @transform_0(%arg0: i32) -> (i32, i32) {
    %c0_i32 = arith.constant 0 : i32
    %c0_i32_0 = arith.constant 0 : i32
    return %arg0, %c0_i32 : i32, i32
  }
  func.func @transform_1(%arg0: i32) -> (i32, i32) {
    %c0_i32 = arith.constant 0 : i32
    %c0_i32_0 = arith.constant 0 : i32
    return %arg0, %c0_i32 : i32, i32
  }
  func.func @transform_2(%arg0: i32) -> (i32, i32) {
    %c0_i32 = arith.constant 0 : i32
    %c0_i32_0 = arith.constant 0 : i32
    return %arg0, %c0_i32 : i32, i32
  }
  func.func @transform_3(%arg0: i32) -> (i32, i32) {
    %c0_i32 = arith.constant 0 : i32
    %c0_i32_0 = arith.constant 0 : i32
    %c0_i32_1 = arith.constant 0 : i32
    return %c0_i32, %c0_i32_0 : i32, i32
  }
  func.func @transform_4(%arg0: i32) -> (i32, i32) {
    %c0_i32 = arith.constant 0 : i32
    %c0_i32_0 = arith.constant 0 : i32
    %c0_i32_1 = arith.constant 0 : i32
    return %c0_i32, %c0_i32_0 : i32, i32
  }
  func.func @transform_5(%arg0: i32) -> (i32, i32) {
    %c0_i32 = arith.constant 0 : i32
    %c0_i32_0 = arith.constant 0 : i32
    %c0_i32_1 = arith.constant 0 : i32
    return %c0_i32, %c0_i32_0 : i32, i32
  }
  func.func @transform_6(%arg0: i32) -> (i32, i32) {
    %c0_i32 = arith.constant 0 : i32
    %c0_i32_0 = arith.constant 0 : i32
    %c0_i32_1 = arith.constant 0 : i32
    return %c0_i32, %c0_i32_0 : i32, i32
  }
  func.func @transform_7(%arg0: i32) -> (i32, i32) {
    %c0_i32 = arith.constant 0 : i32
    %c0_i32_0 = arith.constant 0 : i32
    return %arg0, %c0_i32 : i32, i32
  }
  func.func @transform_8(%arg0: i32) -> (i32, i32) {
    %c0_i32 = arith.constant 0 : i32
    %c0_i32_0 = arith.constant 0 : i32
    return %arg0, %c0_i32 : i32, i32
  }
  func.func @transform_9(%arg0: i32) -> (i32, i32) {
    %c0_i32 = arith.constant 0 : i32
    %c0_i32_0 = arith.constant 0 : i32
    return %arg0, %c0_i32 : i32, i32
  }
}

</mosaic_0001>

<bundles_post_ra>
// kernel: tpu_custom_call.1
= control target key start
LH: loop header
LB: loop body
LE: loop exit
PB: predicated region body
PF: predicated region fallthrough
CT: control target
= control target key end

     0   :  { %15 = vsyncpa [#allocation3], 0  ;;  %s5863_s0 = inlined_call_operand.hbm [shape: bf16[16,512], index: 0, kind: input, shape index: {}]   ;;  %s5864_s1 = inlined_call_operand.hbm [shape: bf16[16,512], index: 1, kind: input, shape index: {}]   ;;  %s5865_s2 = inlined_call_operand.hbm [shape: bf16[16,512], index: 2, kind: input, shape index: {}]   ;;  %s5866_s3 = inlined_call_operand.hbm [shape: bf16[512,512], index: 3, kind: input, shape index: {}]   ;;  %s5867_s4 = inlined_call_operand.hbm [shape: bf16[512,512], index: 4, kind: input, shape index: {}]   ;;  %s5868_s5 = inlined_call_operand.hbm [shape: bf16[512,512], index: 5, kind: input, shape index: {}]   ;;  %s5869_s6 = inlined_call_operand.hbm [shape: bf16[3,512], index: 6, kind: input, shape index: {}]   ;;  %s5870_s7 = inlined_call_operand.hbm [shape: bf16[16,512], index: 7, kind: output, shape index: {0}]   ;;  %s5871_s8 = inlined_call_operand.hbm [shape: bf16[16,512], index: 8, kind: output, shape index: {1}]   ;;  %s5872_s9 = inlined_call_operand.hbm [shape: bf16[16,512], index: 9, kind: output, shape index: {2}]  }
   0x1   :  { %16 = vsyncpa [#allocation6], 0 }
   0x2   :  { %17 = vsyncpa [#allocation9], 0 }
   0x3   :  { %18 = vsyncpa [#allocation12], 0 }
   0x4   :  { %19 = vsyncpa [#allocation4], 0 }
   0x5   :  { %20 = vsyncpa [#allocation16], 0  ;;  %s38_s11 = sshll.u32 %s5864_s1, 4  ;;  %s5562_s12 = smov [#allocation5]   ;;  %s39_s11 = int_to_ptr.hbm [resolvable:$true] %s38_s11 }
   0x6   :  { %s40_s13 = sshll.u32 %s5562_s12, 4  ;;  %s64_s16 = sshll.u32 %s5866_s3, 4  ;;  %s41_s13 = int_to_ptr.vmem [resolvable:$true] %s40_s13  ;;  %s65_s16 = int_to_ptr.hbm [resolvable:$true] %s64_s16 }
   0x7   :  { %s5563_s17 = smov 256   ;;  %s5564_s18 = smov 16  }
   0x8   :  { %46 = dma.hbm_to_vmem [thread:$0]  %s39_s11, 512, %s41_s13, [#allocation6], %s5563_s17, %s5563_s17, %s5564_s18  }
   0x9   :  { %s5565_s19 = smov [#allocation8]   ;;  %s90_s1 = sshll.u32 %s5868_s5, 4  ;;  %s91_s1 = int_to_ptr.hbm [resolvable:$true] %s90_s1 }
   0xa   :  { %s66_s20 = sshll.u32 %s5565_s19, 4  ;;  %s25_s24 = sshll.u32 %s5863_s0, 4  ;;  %s67_s20 = int_to_ptr.vmem [resolvable:$true] %s66_s20  ;;  %s26_s24 = int_to_ptr.hbm [resolvable:$true] %s25_s24 }
   0xb   :  { %72 = dma.hbm_to_vmem [thread:$0]  %s65_s16, 16384, %s67_s20, [#allocation9], %s5563_s17, %s5563_s17, %s5564_s18  }
   0xc   :  { %s5566_s25 = smov [#allocation11]   ;;  %s5567_s27 = smov [#allocation2]  }
   0xd   :  { %s92_s26 = sshll.u32 %s5566_s25, 4  ;;  %s27_s5 = sshll.u32 %s5567_s27, 4  ;;  %s93_s26 = int_to_ptr.vmem [resolvable:$true] %s92_s26  ;;  %s28_s5 = int_to_ptr.vmem [resolvable:$true] %s27_s5 }
   0xe   :  { %98 = dma.hbm_to_vmem [thread:$0]  %s91_s1, 16384, %s93_s26, [#allocation12], %s5563_s17, %s5563_s17, %s5564_s18  }
   0xf   :  { %s51_s30 = sshll.u32 %s5865_s2, 4  ;;  %s77_s11 = sshll.u32 %s5867_s4, 4  ;;  %s52_s30 = int_to_ptr.hbm [resolvable:$true] %s51_s30  ;;  %s78_s11 = int_to_ptr.hbm [resolvable:$true] %s77_s11 }
  0x10   :  { %33 = dma.hbm_to_vmem [thread:$0]  %s26_s24, 512, %s28_s5, [#allocation3], %s5563_s17, %s5563_s17, %s5564_s18  }
  0x11   :  { %s5568_s12 = smov [#allocation7]   ;;  %s5569_s14 = smov [#allocation10]  }
  0x12   :  { %s53_s13 = sshll.u32 %s5568_s12, 4  ;;  %s79_s2 = sshll.u32 %s5569_s14, 4  ;;  %s54_s13 = int_to_ptr.vmem [resolvable:$true] %s53_s13  ;;  %s80_s2 = int_to_ptr.vmem [resolvable:$true] %s79_s2 }
  0x13   :  { %59 = dma.hbm_to_vmem [thread:$0]  %s52_s30, 512, %s54_s13, [#allocation6], %s5563_s17, %s5563_s17, %s5564_s18  }
  0x14   :  { %s104_s19 = sshll.u32 %s5869_s6, 4  ;;  %s5570_s4 = smov [#allocation13]   ;;  %s105_s19 = int_to_ptr.hbm [resolvable:$true] %s104_s19 }
  0x15   :  { %85 = dma.hbm_to_vmem [thread:$0]  %s78_s11, 16384, %s80_s2, [#allocation9], %s5563_s17, %s5563_s17, %s5564_s18  }
  0x16   :  { %s106_s20 = sshll.u32 %s5570_s4, 4  ;;  %s107_s20 = int_to_ptr.vmem [resolvable:$true] %s106_s20 }
  0x17   :  { %109 = dma.hbm_to_vmem [thread:$0]  %s105_s19, 128, %s107_s20, [#allocation12]  }
  0x18   :  { %5550 = dma.done.wait [#allocation3], 512  }
  0x19   :  { %5551 = vsyncadd [#allocation3], 4294966784 }
  0x1a   :  { %5552 = dma.done.wait [#allocation6], 1024  }
  0x1b   :  { %5553 = vsyncadd [#allocation6], 4294966272 }
  0x1c   :  { %5554 = dma.done.wait [#allocation9], 32768  }
  0x1d   :  { %5555 = vsyncadd [#allocation9], 4294934528 }
  0x1e   :  { %5556 = dma.done.wait [#allocation12], 16512  }
  0x1f   :  { %5557 = vsyncadd [#allocation12], 4294950784  ;;  %v3448_v0 = vld [vmem:[#allocation8 + $0xe0] sm:$0xf]  ;;  %v4936_v1 = vld [vmem:[#allocation8 + $0xec] sm:$0xf0] }
  0x20   :  { %v3576_v2 = vld [vmem:[#allocation8 + $0x1e0] sm:$0xf]  ;;  %v3449_v3 = vor.u32 %v4936_v1, %v3448_v0  ;;  %v4968_v4 = vld [vmem:[#allocation8 + $0x1ec] sm:$0xf0]  ;;  %s5571_s6 = smov [#allocation15]   ;;  %s3267_s3 = sshll.u32 %s5870_s7, 4  ;;  %s3268_s3 = int_to_ptr.hbm [resolvable:$true] %s3267_s3 }
  0x21   :  { %v3704_v5 = vld [vmem:[#allocation8 + $0x2e0] sm:$0xf]  ;;  %v5000_v6 = vld [vmem:[#allocation8 + $0x2ec] sm:$0xf0]  ;;  %v3577_v7 = vor.u32 %v4968_v4, %v3576_v2  ;;  %s3278_s21 = sshll.u32 %s5571_s6, 4  ;;  %s5572_s23 = smov [#allocation14]   ;;  %s3279_s21 = int_to_ptr.vmem [resolvable:$true] %s3278_s21 }
  0x22   :  { %v3705_v8 = vor.u32 %v5000_v6, %v3704_v5  ;;  %v3832_v9 = vld [vmem:[#allocation8 + $0x3e0] sm:$0xf]  ;;  %v5032_v10 = vld [vmem:[#allocation8 + $0x3ec] sm:$0xf0]  ;;  %947 = vmatpush.bf16.msra.mxu0 %v3449_v3  ;;  %s3265_s24 = sshll.u32 %s5572_s23, 4  ;;  %s3280_s27 = sshll.u32 %s5871_s8, 4  ;;  %s3266_s24 = int_to_ptr.vmem [resolvable:$true] %s3265_s24  ;;  %s3281_s27 = int_to_ptr.hbm [resolvable:$true] %s3280_s27 }
  0x23   :  { %v3432_v11 = vld [vmem:[#allocation8 + $0xc0] sm:$0xf]  ;;  %v3833_v12 = vor.u32 %v5032_v10, %v3832_v9  ;;  %v4932_v13 = vld [vmem:[#allocation8 + $0xcc] sm:$0xf0]  ;;  %961 = vmatpush.bf16.msra.mxu1 %v3577_v7  ;;  %s5573_s7 = smov [#allocation17]   ;;  %s3293_s29 = sshll.u32 %s5872_s9, 4  ;;  %s3294_s29 = int_to_ptr.hbm [resolvable:$true] %s3293_s29 }
  0x24   :  { %v3560_v14 = vld [vmem:[#allocation8 + $0x1c0] sm:$0xf]  ;;  %v4964_v15 = vld [vmem:[#allocation8 + $0x1cc] sm:$0xf0]  ;;  %975 = vmatpush.bf16.msra.mxu2 %v3705_v8  ;;  %v3433_v16 = vor.u32 %v4932_v13, %v3432_v11  ;;  %s3291_s8 = sshll.u32 %s5573_s7, 4  ;;  %s3292_s8 = int_to_ptr.vmem [resolvable:$true] %s3291_s8 }
  0x25   :  { %v3561_v17 = vor.u32 %v4964_v15, %v3560_v14  ;;  %v3688_v18 = vld [vmem:[#allocation8 + $0x2c0] sm:$0xf]  ;;  %v4996_v19 = vld [vmem:[#allocation8 + $0x2cc] sm:$0xf0]  ;;  %989 = vmatpush.bf16.msra.mxu3 %v3833_v12 }
  0x26   :  { %v3816_v20 = vld [vmem:[#allocation8 + $0x3c0] sm:$0xf]  ;;  %v3689_v21 = vor.u32 %v4996_v19, %v3688_v18  ;;  %v5028_v22 = vld [vmem:[#allocation8 + $0x3cc] sm:$0xf0]  ;;  %948 = vmatpush.bf16.msra.mxu0 %v3433_v16 }
  0x27   :  { %v3416_v23 = vld [vmem:[#allocation8 + $0xa0] sm:$0xf]  ;;  %v4928_v24 = vld [vmem:[#allocation8 + $0xac] sm:$0xf0]  ;;  %v3817_v25 = vor.u32 %v5028_v22, %v3816_v20  ;;  %962 = vmatpush.bf16.msra.mxu1 %v3561_v17 }
  0x28   :  { %v3544_v26 = vld [vmem:[#allocation8 + $0x1a0] sm:$0xf]  ;;  %v4960_v27 = vld [vmem:[#allocation8 + $0x1ac] sm:$0xf0]  ;;  %v3417_v29 = vor.u32 %v4928_v24, %v3416_v23  ;;  %976 = vmatpush.bf16.msra.mxu2 %v3689_v21 }
  0x29   :  { %v3672_v28 = vld [vmem:[#allocation8 + $0x2a0] sm:$0xf]  ;;  %v4992_v30 = vld [vmem:[#allocation8 + $0x2ac] sm:$0xf0]  ;;  %v3545_v33 = vor.u32 %v4960_v27, %v3544_v26  ;;  %990 = vmatpush.bf16.msra.mxu3 %v3817_v25 }
  0x2a   :  { %v3800_v31 = vld [vmem:[#allocation8 + $0x3a0] sm:$0xf]  ;;  %v5024_v32 = vld [vmem:[#allocation8 + $0x3ac] sm:$0xf0]  ;;  %v3673_v34 = vor.u32 %v4992_v30, %v3672_v28  ;;  %949 = vmatpush.bf16.msra.mxu0 %v3417_v29  ;;  %v4934_v28 = vld [vmem:[#allocation8 + $0xe4] sm:$0xf] }
  0x2b   :  { %v3400_v35 = vld [vmem:[#allocation8 + $0x80] sm:$0xf]  ;;  %v4924_v36 = vld [vmem:[#allocation8 + $0x8c] sm:$0xf0]  ;;  %v3801_v38 = vor.u32 %v5024_v32, %v3800_v31  ;;  %963 = vmatpush.bf16.msra.mxu1 %v3545_v33  ;;  %v3450_v29 = vld [vmem:[#allocation8 + $0xf0] sm:$0xf0] }
  0x2c   :  { %v3528_v37 = vld [vmem:[#allocation8 + $0x180] sm:$0xf]  ;;  %v4956_v39 = vld [vmem:[#allocation8 + $0x18c] sm:$0xf0]  ;;  %v3401_v44 = vor.u32 %v4924_v36, %v3400_v35  ;;  %977 = vmatpush.bf16.msra.mxu2 %v3673_v34  ;;  %v4966_v30 = vld [vmem:[#allocation8 + $0x1e4] sm:$0xf] }
  0x2d   :  { %v3656_v40 = vld [vmem:[#allocation8 + $0x280] sm:$0xf]  ;;  %v4988_v41 = vld [vmem:[#allocation8 + $0x28c] sm:$0xf0]  ;;  %v3529_v45 = vor.u32 %v4956_v39, %v3528_v37  ;;  %991 = vmatpush.bf16.msra.mxu3 %v3801_v38  ;;  %v3578_v32 = vld [vmem:[#allocation8 + $0x1f0] sm:$0xf0] }
  0x2e   :  { %v3784_v42 = vld [vmem:[#allocation8 + $0x380] sm:$0xf]  ;;  %v5020_v43 = vld [vmem:[#allocation8 + $0x38c] sm:$0xf0]  ;;  %v3657_v46 = vor.u32 %v4988_v41, %v3656_v40  ;;  %950 = vmatpush.bf16.msra.mxu0 %v3401_v44  ;;  %v4998_v33 = vld [vmem:[#allocation8 + $0x2e4] sm:$0xf]  ;;  %v3453_v40 = vor.u32 %v4934_v28, %v3450_v29 }
  0x2f   :  { %v3384_v47 = vld [vmem:[#allocation8 + $0x60] sm:$0xf]  ;;  %v4920_v48 = vld [vmem:[#allocation8 + $0x6c] sm:$0xf0]  ;;  %v3785_v50 = vor.u32 %v5020_v43, %v3784_v42  ;;  %964 = vmatpush.bf16.msra.mxu1 %v3529_v45  ;;  %v3706_v34 = vld [vmem:[#allocation8 + $0x2f0] sm:$0xf0]  ;;  %v3581_v43 = vor.u32 %v4966_v30, %v3578_v32 }
  0x30   :  { %v3512_v49 = vld [vmem:[#allocation8 + $0x160] sm:$0xf]  ;;  %v4952_v51 = vld [vmem:[#allocation8 + $0x16c] sm:$0xf0]  ;;  %v3385_v56 = vor.u32 %v4920_v48, %v3384_v47  ;;  %978 = vmatpush.bf16.msra.mxu2 %v3657_v46  ;;  %v5030_v37 = vld [vmem:[#allocation8 + $0x3e4] sm:$0xf]  ;;  %v3709_v44 = vor.u32 %v4998_v33, %v3706_v34 }
  0x31   :  { %v3640_v52 = vld [vmem:[#allocation8 + $0x260] sm:$0xf]  ;;  %v4984_v53 = vld [vmem:[#allocation8 + $0x26c] sm:$0xf0]  ;;  %v3513_v57 = vor.u32 %v4952_v51, %v3512_v49  ;;  %992 = vmatpush.bf16.msra.mxu3 %v3785_v50  ;;  %v3834_v38 = vld [vmem:[#allocation8 + $0x3f0] sm:$0xf0] }
  0x32   :  { %v3768_v54 = vld [vmem:[#allocation8 + $0x360] sm:$0xf]  ;;  %v5016_v55 = vld [vmem:[#allocation8 + $0x36c] sm:$0xf0]  ;;  %v3641_v58 = vor.u32 %v4984_v53, %v3640_v52  ;;  %951 = vmatpush.bf16.msra.mxu0 %v3385_v56  ;;  %v4930_v41 = vld [vmem:[#allocation8 + $0xc4] sm:$0xf]  ;;  %v3837_v48 = vor.u32 %v5030_v37, %v3834_v38 }
  0x33   :  { %v3368_v59 = vld [vmem:[#allocation8 + $0x40] sm:$0xf]  ;;  %v4916_v60 = vld [vmem:[#allocation8 + $0x4c] sm:$0xf0]  ;;  %v3769_v62 = vor.u32 %v5016_v55, %v3768_v54  ;;  %965 = vmatpush.bf16.msra.mxu1 %v3513_v57  ;;  %v3434_v42 = vld [vmem:[#allocation8 + $0xd0] sm:$0xf0] }
  0x34   :  { %v3496_v61 = vld [vmem:[#allocation8 + $0x140] sm:$0xf]  ;;  %v4948_v63 = vld [vmem:[#allocation8 + $0x14c] sm:$0xf0]  ;;  %v3369_v4 = vor.u32 %v4916_v60, %v3368_v59  ;;  %979 = vmatpush.bf16.msra.mxu2 %v3641_v58  ;;  %v4962_v45 = vld [vmem:[#allocation8 + $0x1c4] sm:$0xf]  ;;  %v3437_v55 = vor.u32 %v4930_v41, %v3434_v42 }
  0x35   :  { %v3624_v0 = vld [vmem:[#allocation8 + $0x240] sm:$0xf]  ;;  %v4980_v1 = vld [vmem:[#allocation8 + $0x24c] sm:$0xf0]  ;;  %v3497_v5 = vor.u32 %v4948_v63, %v3496_v61  ;;  %993 = vmatpush.bf16.msra.mxu3 %v3769_v62  ;;  %v3562_v46 = vld [vmem:[#allocation8 + $0x1d0] sm:$0xf0] }
  0x36   :  { %v3752_v2 = vld [vmem:[#allocation8 + $0x340] sm:$0xf]  ;;  %v5012_v3 = vld [vmem:[#allocation8 + $0x34c] sm:$0xf0]  ;;  %v3625_v6 = vor.u32 %v4980_v1, %v3624_v0  ;;  %952 = vmatpush.bf16.msra.mxu0 %v3369_v4  ;;  %v4994_v47 = vld [vmem:[#allocation8 + $0x2c4] sm:$0xf]  ;;  %v3565_v60 = vor.u32 %v4962_v45, %v3562_v46 }
  0x37   :  { %v3352_v7 = vld [vmem:[#allocation8 + $0x20] sm:$0xf]  ;;  %v4912_v8 = vld [vmem:[#allocation8 + $0x2c] sm:$0xf0]  ;;  %v3753_v10 = vor.u32 %v5012_v3, %v3752_v2  ;;  %966 = vmatpush.bf16.msra.mxu1 %v3497_v5  ;;  %v3690_v49 = vld [vmem:[#allocation8 + $0x2d0] sm:$0xf0] }
  0x38   :  { %v3480_v9 = vld [vmem:[#allocation8 + $0x120] sm:$0xf]  ;;  %v4944_v11 = vld [vmem:[#allocation8 + $0x12c] sm:$0xf0]  ;;  %v3353_v16 = vor.u32 %v4912_v8, %v3352_v7  ;;  %980 = vmatpush.bf16.msra.mxu2 %v3625_v6  ;;  %v5026_v50 = vld [vmem:[#allocation8 + $0x3c4] sm:$0xf]  ;;  %v3693_v61 = vor.u32 %v4994_v47, %v3690_v49 }
  0x39   :  { %v3608_v12 = vld [vmem:[#allocation8 + $0x220] sm:$0xf]  ;;  %v4976_v13 = vld [vmem:[#allocation8 + $0x22c] sm:$0xf0]  ;;  %v3481_v19 = vor.u32 %v4944_v11, %v3480_v9  ;;  %994 = vmatpush.bf16.msra.mxu3 %v3753_v10  ;;  %v3818_v51 = vld [vmem:[#allocation8 + $0x3d0] sm:$0xf0] }
  0x3a   :  { %v3736_v14 = vld [vmem:[#allocation8 + $0x320] sm:$0xf]  ;;  %v5008_v15 = vld [vmem:[#allocation8 + $0x32c] sm:$0xf0]  ;;  %v3609_v20 = vor.u32 %v4976_v13, %v3608_v12  ;;  %953 = vmatpush.bf16.msra.mxu0 %v3353_v16  ;;  %v4926_v52 = vld [vmem:[#allocation8 + $0xa4] sm:$0xf]  ;;  %v3821_v1 = vor.u32 %v5026_v50, %v3818_v51 }
  0x3b   :  { %v3336_v17 = vld [vmem:[#allocation8] sm:$0xf]  ;;  %v4908_v18 = vld [vmem:[#allocation8 + $0xc] sm:$0xf0]  ;;  %v3737_v24 = vor.u32 %v5008_v15, %v3736_v14  ;;  %967 = vmatpush.bf16.msra.mxu1 %v3481_v19  ;;  %v3328_v53 = vld [vmem:[#allocation2 + $0x8] sm:$0xf] }
  0x3c   :  { %v3464_v21 = vld [vmem:[#allocation8 + $0x100] sm:$0xf]  ;;  %v4940_v22 = vld [vmem:[#allocation8 + $0x10c] sm:$0xf0]  ;;  %v3337_v31 = vor.u32 %v4908_v18, %v3336_v17  ;;  %981 = vmatpush.bf16.msra.mxu2 %v3609_v20  ;;  %v4905_v54 = vld [vmem:[#allocation2 + $0x14] sm:$0xf0] }
  0x3d   :  { %v3592_v23 = vld [vmem:[#allocation8 + $0x200] sm:$0xf]  ;;  %v4972_v25 = vld [vmem:[#allocation8 + $0x20c] sm:$0xf0]  ;;  %v3465_v35 = vor.u32 %v4940_v22, %v3464_v21  ;;  %995 = vmatpush.bf16.msra.mxu3 %v3737_v24  ;;  %v3418_v56 = vld [vmem:[#allocation8 + $0xb0] sm:$0xf0]  ;;  %v5663_v59 = vor.u32 %v4905_v54, %v3328_v53 }
  0x3e   :  { %v3720_v26 = vld [vmem:[#allocation8 + $0x300] sm:$0xf]  ;;  %v5004_v27 = vld [vmem:[#allocation8 + $0x30c] sm:$0xf0]  ;;  %v3593_v36 = vor.u32 %v4972_v25, %v3592_v23  ;;  %954 = vmatpush.bf16.msra.mxu0 %v3337_v31  ;;  %v4958_v57 = vld [vmem:[#allocation8 + $0x1a4] sm:$0xf]  ;;  %v3421_v9 = vor.u32 %v4926_v52, %v3418_v56 }
  0x3f   :  { %v3721_v39 = vor.u32 %v5004_v27, %v3720_v26  ;;  %968 = vmatpush.bf16.msra.mxu1 %v3465_v35  ;;  %v3546_v58 = vld [vmem:[#allocation8 + $0x1b0] sm:$0xf0]  ;;  %v4990_v62 = vld [vmem:[#allocation8 + $0x2a4] sm:$0xf]  ;;  %v3320_v3 = vld [vmem:[#allocation2] sm:$0xf] }
  0x40   :  { %982 = vmatpush.bf16.msra.mxu2 %v3593_v36  ;;  %v3674_v63 = vld [vmem:[#allocation8 + $0x2b0] sm:$0xf0]  ;;  %v5022_v0 = vld [vmem:[#allocation8 + $0x3a4] sm:$0xf]  ;;  %v4904_v4 = vld [vmem:[#allocation2 + $0xc] sm:$0xf0]  ;;  %v3549_v12 = vor.u32 %v4958_v57, %v3546_v58 }
  0x41   :  { %996 = vmatpush.bf16.msra.mxu3 %v3721_v39  ;;  %v3802_v2 = vld [vmem:[#allocation8 + $0x3b0] sm:$0xf0]  ;;  %v5666_v5 = vor.u32 %v4904_v4, %v3320_v3  ;;  %v4903_v6 = vld [vmem:[#allocation2 + $0xc] sm:$0xf]  ;;  %v3330_v7 = vld [vmem:[#allocation2 + $0x18] sm:$0xf0]  ;;  %v3677_v13 = vor.u32 %v4990_v62, %v3674_v63 }
  0x42   :  { %1003 = vmatpush.bf16.msrb.mxu0 %v3453_v40  ;;  %v4902_v8 = vld [vmem:[#allocation2 + $0x4] sm:$0xf]  ;;  %v5668_v10 = vor.u32 %v4903_v6, %v3330_v7  ;;  %v3322_v11 = vld [vmem:[#allocation2 + $0x10] sm:$0xf0]  ;;  %v3805_v18 = vor.u32 %v5022_v0, %v3802_v2 }
  0x43   :  { %1017 = vmatpush.bf16.msrb.mxu1 %v3581_v43  ;;  %983 = vmatmul.bf16.vlgmr.msra.gmra.mxu2 %v5663_v59  ;;  %v4922_v14 = vld [vmem:[#allocation8 + $0x84] sm:$0xf]  ;;  %v3402_v15 = vld [vmem:[#allocation8 + $0x90] sm:$0xf0]  ;;  %v5670_v17 = vor.u32 %v4902_v8, %v3322_v11  ;;  %v3456_v11 = vld [vmem:[#allocation8 + $0xe8] sm:$0xf] }
  0x44   :  { %1031 = vmatpush.bf16.msrb.mxu2 %v3709_v44  ;;  %v4954_v16 = vld [vmem:[#allocation8 + $0x184] sm:$0xf]  ;;  %v3530_v19 = vld [vmem:[#allocation8 + $0x190] sm:$0xf0]  ;;  %955 = vmatmul.bf16.vlgmr.msra.gmra.mxu0 %v5666_v5  ;;  %v3405_v24 = vor.u32 %v4922_v14, %v3402_v15  ;;  %v4969_v15 = vld [vmem:[#allocation8 + $0x1f4] sm:$0xf0] }
  0x45   :  { %1045 = vmatpush.bf16.msrb.mxu3 %v3837_v48  ;;  %v4986_v20 = vld [vmem:[#allocation8 + $0x284] sm:$0xf]  ;;  %v3658_v21 = vld [vmem:[#allocation8 + $0x290] sm:$0xf0]  ;;  %969 = vmatmul.bf16.vlgmr.msra.gmra.mxu1 %v5670_v17  ;;  %v3533_v25 = vor.u32 %v4954_v16, %v3530_v19  ;;  %v3712_v16 = vld [vmem:[#allocation8 + $0x2e8] sm:$0xf] }
  0x46   :  { %1004 = vmatpush.bf16.msrb.mxu0 %v3437_v55  ;;  %v5018_v22 = vld [vmem:[#allocation8 + $0x384] sm:$0xf]  ;;  %v3786_v23 = vld [vmem:[#allocation8 + $0x390] sm:$0xf0]  ;;  %997 = vmatmul.bf16.vlgmr.msra.gmra.mxu3 %v5668_v10  ;;  %v3661_v26 = vor.u32 %v4986_v20, %v3658_v21  ;;  %v3840_v21 = vld [vmem:[#allocation8 + $0x3e8] sm:$0xf] }
  0x47   :  { %1018 = vmatpush.bf16.msrb.mxu1 %v3565_v60  ;;  %v4918_v27 = vld [vmem:[#allocation8 + $0x64] sm:$0xf]  ;;  %v3386_v28 = vld [vmem:[#allocation8 + $0x70] sm:$0xf0]  ;;  %v3789_v30 = vor.u32 %v5018_v22, %v3786_v23  ;;  %v5033_v22 = vld [vmem:[#allocation8 + $0x3f4] sm:$0xf0] }
  0x48   :  { %1032 = vmatpush.bf16.msrb.mxu2 %v3693_v61  ;;  %v4950_v29 = vld [vmem:[#allocation8 + $0x164] sm:$0xf]  ;;  %v3514_v31 = vld [vmem:[#allocation8 + $0x170] sm:$0xf0]  ;;  %v3389_v36 = vor.u32 %v4918_v27, %v3386_v28  ;;  %v3440_v27 = vld [vmem:[#allocation8 + $0xc8] sm:$0xf] }
  0x49   :  { %1046 = vmatpush.bf16.msrb.mxu3 %v3821_v1  ;;  %v4982_v32 = vld [vmem:[#allocation8 + $0x264] sm:$0xf]  ;;  %v3642_v33 = vld [vmem:[#allocation8 + $0x270] sm:$0xf0]  ;;  %v3517_v37 = vor.u32 %v4950_v29, %v3514_v31  ;;  %v4933_v28 = vld [vmem:[#allocation8 + $0xd4] sm:$0xf0] }
  0x4a   :  { %1005 = vmatpush.bf16.msrb.mxu0 %v3421_v9  ;;  %v5014_v34 = vld [vmem:[#allocation8 + $0x364] sm:$0xf]  ;;  %v3770_v35 = vld [vmem:[#allocation8 + $0x370] sm:$0xf0]  ;;  %v3645_v38 = vor.u32 %v4982_v32, %v3642_v33  ;;  %v3568_v29 = vld [vmem:[#allocation8 + $0x1c8] sm:$0xf] }
  0x4b   :  { %1019 = vmatpush.bf16.msrb.mxu1 %v3549_v12  ;;  %v4914_v39 = vld [vmem:[#allocation8 + $0x44] sm:$0xf]  ;;  %v3370_v40 = vld [vmem:[#allocation8 + $0x50] sm:$0xf0]  ;;  %v3773_v42 = vor.u32 %v5014_v34, %v3770_v35  ;;  %v4937_v12 = vld [vmem:[#allocation8 + $0xf4] sm:$0xf0] }
  0x4c   :  { %1033 = vmatpush.bf16.msrb.mxu2 %v3677_v13  ;;  %v4946_v41 = vld [vmem:[#allocation8 + $0x144] sm:$0xf]  ;;  %v3498_v43 = vld [vmem:[#allocation8 + $0x150] sm:$0xf0]  ;;  %v3373_v48 = vor.u32 %v4914_v39, %v3370_v40  ;;  %v3584_v13 = vld [vmem:[#allocation8 + $0x1e8] sm:$0xf] }
  0x4d   :  { %1047 = vmatpush.bf16.msrb.mxu3 %v3805_v18  ;;  %v4978_v44 = vld [vmem:[#allocation8 + $0x244] sm:$0xf]  ;;  %v3626_v45 = vld [vmem:[#allocation8 + $0x250] sm:$0xf0]  ;;  %v3501_v49 = vor.u32 %v4946_v41, %v3498_v43  ;;  %v5001_v18 = vld [vmem:[#allocation8 + $0x2f4] sm:$0xf0] }
  0x4e   :  { %1006 = vmatpush.bf16.msrb.mxu0 %v3405_v24  ;;  %v5010_v46 = vld [vmem:[#allocation8 + $0x344] sm:$0xf]  ;;  %v3754_v47 = vld [vmem:[#allocation8 + $0x350] sm:$0xf0]  ;;  %v3629_v50 = vor.u32 %v4978_v44, %v3626_v45  ;;  %v3457_v24 = vor.u32 %v4937_v12, %v3456_v11  ;;  %v4965_v31 = vld [vmem:[#allocation8 + $0x1d4] sm:$0xf0] }
  0x4f   :  { %1020 = vmatpush.bf16.msrb.mxu1 %v3533_v25  ;;  %v4910_v51 = vld [vmem:[#allocation8 + $0x24] sm:$0xf]  ;;  %v3354_v52 = vld [vmem:[#allocation8 + $0x30] sm:$0xf0]  ;;  %v3757_v54 = vor.u32 %v5010_v46, %v3754_v47  ;;  %v3585_v25 = vor.u32 %v4969_v15, %v3584_v13  ;;  %v3696_v32 = vld [vmem:[#allocation8 + $0x2c8] sm:$0xf] }
  0x50   :  { %1034 = vmatpush.bf16.msrb.mxu2 %v3661_v26  ;;  %v4942_v53 = vld [vmem:[#allocation8 + $0x124] sm:$0xf]  ;;  %v3482_v55 = vld [vmem:[#allocation8 + $0x130] sm:$0xf0]  ;;  %v3357_v61 = vor.u32 %v4910_v51, %v3354_v52  ;;  %v3713_v26 = vor.u32 %v5001_v18, %v3712_v16  ;;  %v4997_v33 = vld [vmem:[#allocation8 + $0x2d4] sm:$0xf0] }
  0x51   :  { %1048 = vmatpush.bf16.msrb.mxu3 %v3789_v30  ;;  %v4974_v56 = vld [vmem:[#allocation8 + $0x224] sm:$0xf]  ;;  %v3610_v57 = vld [vmem:[#allocation8 + $0x230] sm:$0xf0]  ;;  %v3485_v0 = vor.u32 %v4942_v53, %v3482_v55  ;;  %v3841_v30 = vor.u32 %v5033_v22, %v3840_v21  ;;  %v3824_v34 = vld [vmem:[#allocation8 + $0x3c8] sm:$0xf] }
  0x52   :  { %1007 = vmatpush.bf16.msrb.mxu0 %v3389_v36  ;;  %v5006_v58 = vld [vmem:[#allocation8 + $0x324] sm:$0xf]  ;;  %v3738_v60 = vld [vmem:[#allocation8 + $0x330] sm:$0xf0]  ;;  %v3613_v1 = vor.u32 %v4974_v56, %v3610_v57  ;;  %v5029_v35 = vld [vmem:[#allocation8 + $0x3d4] sm:$0xf0]  ;;  %v3441_v36 = vor.u32 %v4933_v28, %v3440_v27 }
  0x53   :  { %1021 = vmatpush.bf16.msrb.mxu1 %v3517_v37  ;;  %v4906_v62 = vld [vmem:[#allocation8 + $0x4] sm:$0xf]  ;;  %v3338_v63 = vld [vmem:[#allocation8 + $0x10] sm:$0xf0]  ;;  %v3741_v6 = vor.u32 %v5006_v58, %v3738_v60  ;;  %v3569_v37 = vor.u32 %v4965_v31, %v3568_v29  ;;  %v3424_v39 = vld [vmem:[#allocation8 + $0xa8] sm:$0xf] }
  0x54   :  { %1035 = vmatpush.bf16.msrb.mxu2 %v3645_v38  ;;  %v4938_v2 = vld [vmem:[#allocation8 + $0x104] sm:$0xf]  ;;  %v3466_v3 = vld [vmem:[#allocation8 + $0x110] sm:$0xf0]  ;;  %v3341_v14 = vor.u32 %v4906_v62, %v3338_v63  ;;  %v3697_v38 = vor.u32 %v4997_v33, %v3696_v32  ;;  %v4929_v40 = vld [vmem:[#allocation8 + $0xb4] sm:$0xf0] }
  0x55   :  { %1049 = vmatpush.bf16.msrb.mxu3 %v3773_v42  ;;  %v4970_v4 = vld [vmem:[#allocation8 + $0x204] sm:$0xf]  ;;  %v3594_v7 = vld [vmem:[#allocation8 + $0x210] sm:$0xf0]  ;;  %v3469_v19 = vor.u32 %v4938_v2, %v3466_v3  ;;  %v3552_v41 = vld [vmem:[#allocation8 + $0x1a8] sm:$0xf]  ;;  %v3825_v42 = vor.u32 %v5029_v35, %v3824_v34 }
  0x56   :  { %1008 = vmatpush.bf16.msrb.mxu0 %v3373_v48  ;;  %v5002_v8 = vld [vmem:[#allocation8 + $0x304] sm:$0xf]  ;;  %v3722_v9 = vld [vmem:[#allocation8 + $0x310] sm:$0xf0]  ;;  %v3597_v20 = vor.u32 %v4970_v4, %v3594_v7  ;;  %v4961_v43 = vld [vmem:[#allocation8 + $0x1b4] sm:$0xf0]  ;;  %v3425_v48 = vor.u32 %v4929_v40, %v3424_v39 }
  0x57   :  { %1022 = vmatpush.bf16.msrb.mxu1 %v3501_v49  ;;  %v3725_v23 = vor.u32 %v5002_v8, %v3722_v9  ;;  %v3680_v44 = vld [vmem:[#allocation8 + $0x2a8] sm:$0xf]  ;;  %v4993_v45 = vld [vmem:[#allocation8 + $0x2b4] sm:$0xf0]  ;;  %v3553_v49 = vor.u32 %v4961_v43, %v3552_v41 }
  0x58   :  { %1036 = vmatpush.bf16.msrb.mxu2 %v3629_v50  ;;  %v3808_v46 = vld [vmem:[#allocation8 + $0x3a8] sm:$0xf]  ;;  %v5025_v47 = vld [vmem:[#allocation8 + $0x3b4] sm:$0xf0]  ;;  %v3681_v50 = vor.u32 %v4993_v45, %v3680_v44 }
  0x59   :  { %1050 = vmatpush.bf16.msrb.mxu3 %v3757_v54  ;;  %v3408_v51 = vld [vmem:[#allocation8 + $0x88] sm:$0xf]  ;;  %v4925_v52 = vld [vmem:[#allocation8 + $0x94] sm:$0xf0]  ;;  %v3809_v54 = vor.u32 %v5025_v47, %v3808_v46 }
  0x5a   :  { %1009 = vmatpush.bf16.msrb.mxu0 %v3357_v61  ;;  %v3536_v53 = vld [vmem:[#allocation8 + $0x188] sm:$0xf]  ;;  %v4957_v55 = vld [vmem:[#allocation8 + $0x194] sm:$0xf0]  ;;  %v3409_v61 = vor.u32 %v4925_v52, %v3408_v51  ;;  %v3586_v52 = vld [vmem:[#allocation8 + $0x1f8] sm:$0xf0] }
  0x5b   :  { %1023 = vmatpush.bf16.msrb.mxu1 %v3485_v0  ;;  %v3664_v56 = vld [vmem:[#allocation8 + $0x288] sm:$0xf]  ;;  %v4989_v57 = vld [vmem:[#allocation8 + $0x294] sm:$0xf0]  ;;  %v3537_v62 = vor.u32 %v4957_v55, %v3536_v53  ;;  %v4999_v53 = vld [vmem:[#allocation8 + $0x2ec] sm:$0xf] }
  0x5c   :  { %1037 = vmatpush.bf16.msrb.mxu2 %v3613_v1  ;;  %v3792_v58 = vld [vmem:[#allocation8 + $0x388] sm:$0xf]  ;;  %v5021_v60 = vld [vmem:[#allocation8 + $0x394] sm:$0xf0]  ;;  %v3665_v63 = vor.u32 %v4989_v57, %v3664_v56  ;;  %v5031_v57 = vld [vmem:[#allocation8 + $0x3ec] sm:$0xf] }
  0x5d   :  { %1051 = vmatpush.bf16.msrb.mxu3 %v3741_v6  ;;  %v3392_v0 = vld [vmem:[#allocation8 + $0x68] sm:$0xf]  ;;  %v4921_v1 = vld [vmem:[#allocation8 + $0x74] sm:$0xf0]  ;;  %v3793_v3 = vor.u32 %v5021_v60, %v3792_v58  ;;  %v3842_v58 = vld [vmem:[#allocation8 + $0x3f8] sm:$0xf0] }
  0x5e   :  { %1010 = vmatpush.bf16.msrb.mxu0 %v3341_v14  ;;  %v3520_v2 = vld [vmem:[#allocation8 + $0x168] sm:$0xf]  ;;  %v4953_v4 = vld [vmem:[#allocation8 + $0x174] sm:$0xf0]  ;;  %v3393_v11 = vor.u32 %v4921_v1, %v3392_v0  ;;  %v4931_v0 = vld [vmem:[#allocation8 + $0xcc] sm:$0xf] }
  0x5f   :  { %1024 = vmatpush.bf16.msrb.mxu1 %v3469_v19  ;;  %v3648_v6 = vld [vmem:[#allocation8 + $0x268] sm:$0xf]  ;;  %v4985_v7 = vld [vmem:[#allocation8 + $0x274] sm:$0xf0]  ;;  %v3521_v12 = vor.u32 %v4953_v4, %v3520_v2  ;;  %v3442_v1 = vld [vmem:[#allocation8 + $0xd8] sm:$0xf0] }
  0x60   :  { %1038 = vmatpush.bf16.msrb.mxu2 %v3597_v20  ;;  %v3776_v8 = vld [vmem:[#allocation8 + $0x368] sm:$0xf]  ;;  %v5017_v9 = vld [vmem:[#allocation8 + $0x374] sm:$0xf0]  ;;  %v3649_v13 = vor.u32 %v4985_v7, %v3648_v6  ;;  %v4963_v2 = vld [vmem:[#allocation8 + $0x1cc] sm:$0xf] }
  0x61   :  { %1052 = vmatpush.bf16.msrb.mxu3 %v3725_v23  ;;  %1011 = vmatmul.bf16.vlgmr.msrb.gmra.mxu0 %v5666_v5  ;;  %v3376_v14 = vld [vmem:[#allocation8 + $0x48] sm:$0xf]  ;;  %v4917_v15 = vld [vmem:[#allocation8 + $0x54] sm:$0xf0]  ;;  %v3777_v18 = vor.u32 %v5017_v9, %v3776_v8  ;;  %v3570_v4 = vld [vmem:[#allocation8 + $0x1d8] sm:$0xf0] }
  0x62   :  { %1059 = vmatpush.bf16.msra.mxu0 %v3457_v24  ;;  %1025 = vmatmul.bf16.vlgmr.msrb.gmra.mxu1 %v5670_v17  ;;  %v3504_v16 = vld [vmem:[#allocation8 + $0x148] sm:$0xf]  ;;  %v4949_v19 = vld [vmem:[#allocation8 + $0x154] sm:$0xf0]  ;;  %v3377_v24 = vor.u32 %v4917_v15, %v3376_v14  ;;  %v4995_v6 = vld [vmem:[#allocation8 + $0x2cc] sm:$0xf] }
  0x63   :  { %1073 = vmatpush.bf16.msra.mxu1 %v3585_v25  ;;  %1039 = vmatmul.bf16.vlgmr.msrb.gmra.mxu2 %v5663_v59  ;;  %v3632_v20 = vld [vmem:[#allocation8 + $0x248] sm:$0xf]  ;;  %v4981_v21 = vld [vmem:[#allocation8 + $0x254] sm:$0xf0]  ;;  %v3505_v25 = vor.u32 %v4949_v19, %v3504_v16  ;;  %v3698_v7 = vld [vmem:[#allocation8 + $0x2d8] sm:$0xf0] }
  0x64   :  { %1087 = vmatpush.bf16.msra.mxu2 %v3713_v26  ;;  %1053 = vmatmul.bf16.vlgmr.msrb.gmra.mxu3 %v5668_v10  ;;  %v3760_v22 = vld [vmem:[#allocation8 + $0x348] sm:$0xf]  ;;  %v5013_v23 = vld [vmem:[#allocation8 + $0x354] sm:$0xf0]  ;;  %v3633_v26 = vor.u32 %v4981_v21, %v3632_v20  ;;  %v5027_v8 = vld [vmem:[#allocation8 + $0x3cc] sm:$0xf] }
  0x65   :  { %1101 = vmatpush.bf16.msra.mxu3 %v3841_v30  ;;  %v3360_v27 = vld [vmem:[#allocation8 + $0x28] sm:$0xf]  ;;  %v4913_v28 = vld [vmem:[#allocation8 + $0x34] sm:$0xf0]  ;;  %v3761_v30 = vor.u32 %v5013_v23, %v3760_v22  ;;  %v3826_v9 = vld [vmem:[#allocation8 + $0x3d8] sm:$0xf0] }
  0x66   :  { %1060 = vmatpush.bf16.msra.mxu0 %v3441_v36  ;;  %v3488_v29 = vld [vmem:[#allocation8 + $0x128] sm:$0xf]  ;;  %v4945_v31 = vld [vmem:[#allocation8 + $0x134] sm:$0xf0]  ;;  %v3361_v36 = vor.u32 %v4913_v28, %v3360_v27  ;;  %v4927_v14 = vld [vmem:[#allocation8 + $0xac] sm:$0xf] }
  0x67   :  { %1074 = vmatpush.bf16.msra.mxu1 %v3569_v37  ;;  %v3616_v32 = vld [vmem:[#allocation8 + $0x228] sm:$0xf]  ;;  %v4977_v33 = vld [vmem:[#allocation8 + $0x234] sm:$0xf0]  ;;  %v3489_v39 = vor.u32 %v4945_v31, %v3488_v29  ;;  %v3426_v15 = vld [vmem:[#allocation8 + $0xb8] sm:$0xf0] }
  0x68   :  { %1088 = vmatpush.bf16.msra.mxu2 %v3697_v38  ;;  %v3744_v34 = vld [vmem:[#allocation8 + $0x328] sm:$0xf]  ;;  %v5009_v35 = vld [vmem:[#allocation8 + $0x334] sm:$0xf0]  ;;  %v3617_v40 = vor.u32 %v4977_v33, %v3616_v32  ;;  %v4959_v16 = vld [vmem:[#allocation8 + $0x1ac] sm:$0xf] }
  0x69   :  { %1102 = vmatpush.bf16.msra.mxu3 %v3825_v42  ;;  %v3344_v37 = vld [vmem:[#allocation8 + $0x8] sm:$0xf]  ;;  %v4909_v38 = vld [vmem:[#allocation8 + $0x14] sm:$0xf0]  ;;  %v3745_v44 = vor.u32 %v5009_v35, %v3744_v34  ;;  %v3554_v19 = vld [vmem:[#allocation8 + $0x1b8] sm:$0xf0] }
  0x6a   :  { %1061 = vmatpush.bf16.msra.mxu0 %v3425_v48  ;;  %v3472_v41 = vld [vmem:[#allocation8 + $0x108] sm:$0xf]  ;;  %v4941_v42 = vld [vmem:[#allocation8 + $0x114] sm:$0xf0]  ;;  %v4935_v48 = vld [vmem:[#allocation8 + $0xec] sm:$0xf]  ;;  %v3345_v51 = vor.u32 %v4909_v38, %v3344_v37 }
  0x6b   :  { %1075 = vmatpush.bf16.msra.mxu1 %v3553_v49  ;;  %v3600_v43 = vld [vmem:[#allocation8 + $0x208] sm:$0xf]  ;;  %v4973_v45 = vld [vmem:[#allocation8 + $0x214] sm:$0xf0]  ;;  %v3458_v49 = vld [vmem:[#allocation8 + $0xf8] sm:$0xf0]  ;;  %v3473_v55 = vor.u32 %v4941_v42, %v3472_v41 }
  0x6c   :  { %1089 = vmatpush.bf16.msra.mxu2 %v3681_v50  ;;  %v3728_v46 = vld [vmem:[#allocation8 + $0x308] sm:$0xf]  ;;  %v5005_v47 = vld [vmem:[#allocation8 + $0x314] sm:$0xf0]  ;;  %v4967_v50 = vld [vmem:[#allocation8 + $0x1ec] sm:$0xf]  ;;  %v3601_v56 = vor.u32 %v4973_v45, %v3600_v43 }
  0x6d   :  { %1103 = vmatpush.bf16.msra.mxu3 %v3809_v54  ;;  %v3714_v54 = vld [vmem:[#allocation8 + $0x2f8] sm:$0xf0]  ;;  %v3729_v60 = vor.u32 %v5005_v47, %v3728_v46  ;;  %v4991_v20 = vld [vmem:[#allocation8 + $0x2ac] sm:$0xf] }
  0x6e   :  { %1062 = vmatpush.bf16.msra.mxu0 %v3409_v61  ;;  %v3461_v61 = vor.u32 %v4935_v48, %v3458_v49  ;;  %v3682_v21 = vld [vmem:[#allocation8 + $0x2b8] sm:$0xf0]  ;;  %v5023_v22 = vld [vmem:[#allocation8 + $0x3ac] sm:$0xf] }
  0x6f   :  { %1076 = vmatpush.bf16.msra.mxu1 %v3537_v62  ;;  %v3589_v62 = vor.u32 %v4967_v50, %v3586_v52  ;;  %v3810_v23 = vld [vmem:[#allocation8 + $0x3b8] sm:$0xf0]  ;;  %v4923_v27 = vld [vmem:[#allocation8 + $0x8c] sm:$0xf] }
  0x70   :  { %1090 = vmatpush.bf16.msra.mxu2 %v3665_v63  ;;  %v3717_v63 = vor.u32 %v4999_v53, %v3714_v54  ;;  %v3410_v28 = vld [vmem:[#allocation8 + $0x98] sm:$0xf0]  ;;  %v4955_v29 = vld [vmem:[#allocation8 + $0x18c] sm:$0xf] }
  0x71   :  { %1104 = vmatpush.bf16.msra.mxu3 %v3793_v3  ;;  %v3845_v3 = vor.u32 %v5031_v57, %v3842_v58  ;;  %v3538_v31 = vld [vmem:[#allocation8 + $0x198] sm:$0xf0]  ;;  %v4987_v32 = vld [vmem:[#allocation8 + $0x28c] sm:$0xf] }
  0x72   :  { %1063 = vmatpush.bf16.msra.mxu0 %v3393_v11  ;;  %v3445_v11 = vor.u32 %v4931_v0, %v3442_v1  ;;  %v3666_v33 = vld [vmem:[#allocation8 + $0x298] sm:$0xf0]  ;;  %v5019_v34 = vld [vmem:[#allocation8 + $0x38c] sm:$0xf]  ;;  %v3541_v37 = vor.u32 %v4955_v29, %v3538_v31  ;;  %v4232_v29 = vld [vmem:[#allocation10 + $0x2e0] sm:$0xf] }
  0x73   :  { %1077 = vmatpush.bf16.msra.mxu1 %v3521_v12  ;;  %v3573_v12 = vor.u32 %v4963_v2, %v3570_v4  ;;  %v3794_v35 = vld [vmem:[#allocation8 + $0x398] sm:$0xf0]  ;;  %v3669_v38 = vor.u32 %v4987_v32, %v3666_v33  ;;  %v4951_v41 = vld [vmem:[#allocation8 + $0x16c] sm:$0xf]  ;;  %v4360_v33 = vld [vmem:[#allocation10 + $0x3e0] sm:$0xf] }
  0x74   :  { %1091 = vmatpush.bf16.msra.mxu2 %v3649_v13  ;;  %v3701_v13 = vor.u32 %v4995_v6, %v3698_v7  ;;  %v3797_v42 = vor.u32 %v5019_v34, %v3794_v35  ;;  %v3522_v43 = vld [vmem:[#allocation8 + $0x178] sm:$0xf0]  ;;  %v5015_v46 = vld [vmem:[#allocation8 + $0x36c] sm:$0xf]  ;;  %v5164_v34 = vld [vmem:[#allocation10 + $0x3ec] sm:$0xf0] }
  0x75   :  { %1105 = vmatpush.bf16.msra.mxu3 %v3777_v18  ;;  %v3829_v18 = vor.u32 %v5027_v8, %v3826_v9  ;;  %v3650_v45 = vld [vmem:[#allocation8 + $0x278] sm:$0xf0]  ;;  %v3525_v49 = vor.u32 %v4951_v41, %v3522_v43  ;;  %v4947_v53 = vld [vmem:[#allocation8 + $0x14c] sm:$0xf]  ;;  %v4088_v41 = vld [vmem:[#allocation10 + $0x1c0] sm:$0xf] }
  0x76   :  { %1064 = vmatpush.bf16.msra.mxu0 %v3377_v24  ;;  %v3429_v24 = vor.u32 %v4927_v14, %v3426_v15  ;;  %v3778_v47 = vld [vmem:[#allocation8 + $0x378] sm:$0xf0]  ;;  %v5011_v58 = vld [vmem:[#allocation8 + $0x34c] sm:$0xf]  ;;  %v5096_v43 = vld [vmem:[#allocation10 + $0x1cc] sm:$0xf0] }
  0x77   :  { %1078 = vmatpush.bf16.msra.mxu1 %v3505_v25  ;;  %v3557_v25 = vor.u32 %v4959_v16, %v3554_v19  ;;  %v3378_v52 = vld [vmem:[#allocation8 + $0x58] sm:$0xf0]  ;;  %v3781_v54 = vor.u32 %v5015_v46, %v3778_v47  ;;  %v4911_v0 = vld [vmem:[#allocation8 + $0x2c] sm:$0xf]  ;;  %v4344_v46 = vld [vmem:[#allocation10 + $0x3c0] sm:$0xf] }
  0x78   :  { %1092 = vmatpush.bf16.msra.mxu2 %v3633_v26  ;;  %v3685_v26 = vor.u32 %v4991_v20, %v3682_v21  ;;  %v3634_v57 = vld [vmem:[#allocation8 + $0x258] sm:$0xf0]  ;;  %v4943_v2 = vld [vmem:[#allocation8 + $0x12c] sm:$0xf]  ;;  %v5160_v47 = vld [vmem:[#allocation10 + $0x3cc] sm:$0xf0] }
  0x79   :  { %1106 = vmatpush.bf16.msra.mxu3 %v3761_v30  ;;  %v3813_v30 = vor.u32 %v5023_v22, %v3810_v23  ;;  %v3362_v1 = vld [vmem:[#allocation8 + $0x38] sm:$0xf0]  ;;  %v4975_v6 = vld [vmem:[#allocation8 + $0x22c] sm:$0xf] }
  0x7a   :  { %1065 = vmatpush.bf16.msra.mxu0 %v3361_v36  ;;  %v3413_v36 = vor.u32 %v4923_v27, %v3410_v28  ;;  %v3490_v4 = vld [vmem:[#allocation8 + $0x138] sm:$0xf0]  ;;  %v5007_v8 = vld [vmem:[#allocation8 + $0x32c] sm:$0xf]  ;;  %v5100_v28 = vld [vmem:[#allocation10 + $0x1ec] sm:$0xf0] }
  0x7b   :  { %1079 = vmatpush.bf16.msra.mxu1 %v3489_v39  ;;  %v4919_v39 = vld [vmem:[#allocation8 + $0x6c] sm:$0xf]  ;;  %v3618_v7 = vld [vmem:[#allocation8 + $0x238] sm:$0xf0]  ;;  %v3493_v14 = vor.u32 %v4943_v2, %v3490_v4  ;;  %v4184_v4 = vld [vmem:[#allocation10 + $0x280] sm:$0xf] }
  0x7c   :  { %1093 = vmatpush.bf16.msra.mxu2 %v3617_v40  ;;  %v3394_v40 = vld [vmem:[#allocation8 + $0x78] sm:$0xf0]  ;;  %v3621_v15 = vor.u32 %v4975_v6, %v3618_v7  ;;  %v4939_v16 = vld [vmem:[#allocation8 + $0x10c] sm:$0xf]  ;;  %v4312_v6 = vld [vmem:[#allocation10 + $0x380] sm:$0xf] }
  0x7d   :  { %1107 = vmatpush.bf16.msra.mxu3 %v3745_v44  ;;  %v4983_v44 = vld [vmem:[#allocation8 + $0x26c] sm:$0xf]  ;;  %v3397_v48 = vor.u32 %v4919_v39, %v3394_v40  ;;  %v3746_v9 = vld [vmem:[#allocation8 + $0x338] sm:$0xf0]  ;;  %v3960_v39 = vld [vmem:[#allocation10 + $0xc0] sm:$0xf] }
  0x7e   :  { %1066 = vmatpush.bf16.msra.mxu0 %v3345_v51  ;;  %v3653_v50 = vor.u32 %v4983_v44, %v3650_v45  ;;  %v4915_v51 = vld [vmem:[#allocation8 + $0x4c] sm:$0xf]  ;;  %v3749_v20 = vor.u32 %v5007_v8, %v3746_v9  ;;  %v3602_v21 = vld [vmem:[#allocation8 + $0x218] sm:$0xf0]  ;;  %v5064_v40 = vld [vmem:[#allocation10 + $0xcc] sm:$0xf0] }
  0x7f   :  { %1080 = vmatpush.bf16.msra.mxu1 %v3473_v55  ;;  %v3506_v55 = vld [vmem:[#allocation8 + $0x158] sm:$0xf0]  ;;  %v4971_v19 = vld [vmem:[#allocation8 + $0x20c] sm:$0xf]  ;;  %v4216_v44 = vld [vmem:[#allocation10 + $0x2c0] sm:$0xf] }
  0x80   :  { %1094 = vmatpush.bf16.msra.mxu2 %v3601_v56  ;;  %v4979_v56 = vld [vmem:[#allocation8 + $0x24c] sm:$0xf]  ;;  %v3730_v23 = vld [vmem:[#allocation8 + $0x318] sm:$0xf0]  ;;  %v3605_v32 = vor.u32 %v4971_v19, %v3602_v21  ;;  %v5128_v45 = vld [vmem:[#allocation10 + $0x2cc] sm:$0xf0] }
  0x81   :  { %1108 = vmatpush.bf16.msra.mxu3 %v3729_v60  ;;  %1067 = vmatmul.bf16.vlgmr.msra.gmra.mxu0 %v5666_v5  ;;  %v3762_v60 = vld [vmem:[#allocation8 + $0x358] sm:$0xf0]  ;;  %v5003_v22 = vld [vmem:[#allocation8 + $0x30c] sm:$0xf]  ;;  %v3912_v9 = vld [vmem:[#allocation10 + $0x60] sm:$0xf] }
  0x82   :  { %1115 = vmatpush.bf16.msrb.mxu0 %v3461_v61  ;;  %1081 = vmatmul.bf16.vlgmr.msra.gmra.mxu1 %v5670_v17  ;;  %v3381_v61 = vor.u32 %v4915_v51, %v3378_v52  ;;  %v3733_v35 = vor.u32 %v5003_v22, %v3730_v23  ;;  %v3944_v51 = vld [vmem:[#allocation10 + $0xa0] sm:$0xf]  ;;  %v5060_v52 = vld [vmem:[#allocation10 + $0xac] sm:$0xf0] }
  0x83   :  { %1129 = vmatpush.bf16.msrb.mxu1 %v3589_v62  ;;  %1095 = vmatmul.bf16.vlgmr.msra.gmra.mxu2 %v5663_v59  ;;  %v3509_v62 = vor.u32 %v4947_v53, %v3506_v55  ;;  %v4072_v53 = vld [vmem:[#allocation10 + $0x1a0] sm:$0xf]  ;;  %v5092_v55 = vld [vmem:[#allocation10 + $0x1ac] sm:$0xf0] }
  0x84   :  { %1143 = vmatpush.bf16.msrb.mxu2 %v3717_v63  ;;  %1109 = vmatmul.bf16.vlgmr.msra.gmra.mxu3 %v5668_v10  ;;  %v3637_v63 = vor.u32 %v4979_v56, %v3634_v57  ;;  %v4200_v56 = vld [vmem:[#allocation10 + $0x2a0] sm:$0xf]  ;;  %v5124_v57 = vld [vmem:[#allocation10 + $0x2ac] sm:$0xf0] }
  0x85   :  { %1157 = vmatpush.bf16.msrb.mxu3 %v3845_v3  ;;  %v3765_v3 = vor.u32 %v5011_v58, %v3762_v60  ;;  %v4328_v58 = vld [vmem:[#allocation10 + $0x3a0] sm:$0xf]  ;;  %v5156_v60 = vld [vmem:[#allocation10 + $0x3ac] sm:$0xf0] }
  0x86   :  { %1116 = vmatpush.bf16.msrb.mxu0 %v3445_v11  ;;  %v3365_v11 = vor.u32 %v4911_v0, %v3362_v1  ;;  %v3928_v0 = vld [vmem:[#allocation10 + $0x80] sm:$0xf]  ;;  %v4329_v2 = vor.u32 %v5156_v60, %v4328_v58  ;;  %v5148_v19 = vld [vmem:[#allocation10 + $0x36c] sm:$0xf0]  ;;  %v5098_v58 = vld [vmem:[#allocation10 + $0x1e4] sm:$0xf] }
  0x87   :  { %1130 = vmatpush.bf16.msrb.mxu1 %v3573_v12  ;;  %v4907_v12 = vld [vmem:[#allocation8 + $0xc] sm:$0xf]  ;;  %v4056_v1 = vld [vmem:[#allocation10 + $0x180] sm:$0xf]  ;;  %v4106_v60 = vld [vmem:[#allocation10 + $0x1f0] sm:$0xf0] }
  0x88   :  { %1144 = vmatpush.bf16.msrb.mxu2 %v3701_v13  ;;  %v3346_v13 = vld [vmem:[#allocation8 + $0x18] sm:$0xf0]  ;;  %v3896_v23 = vld [vmem:[#allocation10 + $0x40] sm:$0xf] }
  0x89   :  { %1158 = vmatpush.bf16.msrb.mxu3 %v3829_v18  ;;  %v3474_v18 = vld [vmem:[#allocation8 + $0x118] sm:$0xf0]  ;;  %v3349_v27 = vor.u32 %v4907_v12, %v3346_v13  ;;  %v4040_v12 = vld [vmem:[#allocation10 + $0x160] sm:$0xf] }
  0x8a   :  { %1117 = vmatpush.bf16.msrb.mxu0 %v3429_v24  ;;  %v3976_v24 = vld [vmem:[#allocation10 + $0xe0] sm:$0xf]  ;;  %v3477_v31 = vor.u32 %v4939_v16, %v3474_v18  ;;  %v5116_v16 = vld [vmem:[#allocation10 + $0x26c] sm:$0xf0] }
  0x8b   :  { %1131 = vmatpush.bf16.msrb.mxu1 %v3557_v25  ;;  %v5068_v25 = vld [vmem:[#allocation10 + $0xec] sm:$0xf0]  ;;  %v4296_v18 = vld [vmem:[#allocation10 + $0x360] sm:$0xf] }
  0x8c   :  { %1145 = vmatpush.bf16.msrb.mxu2 %v3685_v26  ;;  %v4104_v26 = vld [vmem:[#allocation10 + $0x1e0] sm:$0xf] }
  0x8d   :  { %1159 = vmatpush.bf16.msrb.mxu3 %v3813_v30  ;;  %v5132_v30 = vld [vmem:[#allocation10 + $0x2ec] sm:$0xf0] }
  0x8e   :  { %1118 = vmatpush.bf16.msrb.mxu0 %v3413_v36  ;;  %v3977_v36 = vor.u32 %v5068_v25, %v3976_v24  ;;  %v5048_v24 = vld [vmem:[#allocation10 + $0x4c] sm:$0xf0]  ;;  %v4024_v25 = vld [vmem:[#allocation10 + $0x140] sm:$0xf] }
  0x8f   :  { %1132 = vmatpush.bf16.msrb.mxu1 %v3541_v37  ;;  %v4105_v37 = vor.u32 %v5100_v28, %v4104_v26  ;;  %v4297_v26 = vor.u32 %v5148_v19, %v4296_v18  ;;  %v4152_v28 = vld [vmem:[#allocation10 + $0x240] sm:$0xf]  ;;  %v4090_v19 = vld [vmem:[#allocation10 + $0x1d0] sm:$0xf0] }
  0x90   :  { %1146 = vmatpush.bf16.msrb.mxu2 %v3669_v38  ;;  %v4233_v38 = vor.u32 %v5132_v30, %v4232_v29  ;;  %v5112_v29 = vld [vmem:[#allocation10 + $0x24c] sm:$0xf0]  ;;  %v4280_v30 = vld [vmem:[#allocation10 + $0x340] sm:$0xf] }
  0x91   :  { %1160 = vmatpush.bf16.msrb.mxu3 %v3797_v42  ;;  %v4361_v42 = vor.u32 %v5164_v34, %v4360_v33  ;;  %v4153_v34 = vor.u32 %v5112_v29, %v4152_v28 }
  0x92   :  { %1119 = vmatpush.bf16.msrb.mxu0 %v3397_v48  ;;  %v3961_v48 = vor.u32 %v5064_v40, %v3960_v39  ;;  %v5076_v39 = vld [vmem:[#allocation10 + $0x12c] sm:$0xf0]  ;;  %v4136_v40 = vld [vmem:[#allocation10 + $0x220] sm:$0xf] }
  0x93   :  { %1133 = vmatpush.bf16.msrb.mxu1 %v3525_v49  ;;  %v4089_v49 = vor.u32 %v5096_v43, %v4088_v41  ;;  %v5108_v41 = vld [vmem:[#allocation10 + $0x22c] sm:$0xf0] }
  0x94   :  { %1147 = vmatpush.bf16.msrb.mxu2 %v3653_v50  ;;  %v4217_v50 = vor.u32 %v5128_v45, %v4216_v44  ;;  %v5140_v43 = vld [vmem:[#allocation10 + $0x32c] sm:$0xf0]  ;;  %v3864_v44 = vld [vmem:[#allocation10] sm:$0xf] }
  0x95   :  { %1161 = vmatpush.bf16.msrb.mxu3 %v3781_v54  ;;  %v4345_v54 = vor.u32 %v5160_v47, %v4344_v46  ;;  %v5040_v46 = vld [vmem:[#allocation10 + $0xc] sm:$0xf0]  ;;  %v3992_v47 = vld [vmem:[#allocation10 + $0x100] sm:$0xf] }
  0x96   :  { %1120 = vmatpush.bf16.msrb.mxu0 %v3381_v61  ;;  %v3945_v61 = vor.u32 %v5060_v52, %v3944_v51  ;;  %v4120_v51 = vld [vmem:[#allocation10 + $0x200] sm:$0xf]  ;;  %v5104_v52 = vld [vmem:[#allocation10 + $0x20c] sm:$0xf0] }
  0x97   :  { %1134 = vmatpush.bf16.msrb.mxu1 %v3509_v62  ;;  %v4073_v62 = vor.u32 %v5092_v55, %v4072_v53  ;;  %v4248_v53 = vld [vmem:[#allocation10 + $0x300] sm:$0xf]  ;;  %v5136_v55 = vld [vmem:[#allocation10 + $0x30c] sm:$0xf0] }
  0x98   :  { %1148 = vmatpush.bf16.msrb.mxu2 %v3637_v63  ;;  %v4201_v63 = vor.u32 %v5124_v57, %v4200_v56  ;;  %v5066_v56 = vld [vmem:[#allocation10 + $0xe4] sm:$0xf]  ;;  %v3978_v57 = vld [vmem:[#allocation10 + $0xf0] sm:$0xf0] }
  0x99   :  { %1162 = vmatpush.bf16.msrb.mxu3 %v3765_v3  ;;  %v5088_v3 = vld [vmem:[#allocation10 + $0x18c] sm:$0xf0] }
  0x9a   :  { %1121 = vmatpush.bf16.msrb.mxu0 %v3365_v11  ;;  %v5052_v11 = vld [vmem:[#allocation10 + $0x6c] sm:$0xf0] }
  0x9b   :  { %1135 = vmatpush.bf16.msrb.mxu1 %v3493_v14  ;;  %v5084_v14 = vld [vmem:[#allocation10 + $0x16c] sm:$0xf0] }
  0x9c   :  { %1149 = vmatpush.bf16.msrb.mxu2 %v3621_v15  ;;  %v4168_v15 = vld [vmem:[#allocation10 + $0x260] sm:$0xf]  ;;  %v4041_v21 = vor.u32 %v5084_v14, %v4040_v12  ;;  %v4109_v12 = vor.u32 %v5098_v58, %v4106_v60  ;;  %v5094_v14 = vld [vmem:[#allocation10 + $0x1c4] sm:$0xf]  ;;  %v4042_v60 = vld [vmem:[#allocation10 + $0x170] sm:$0xf0] }
  0x9d   :  { %1163 = vmatpush.bf16.msrb.mxu3 %v3749_v20  ;;  %v3913_v20 = vor.u32 %v5052_v11, %v3912_v9  ;;  %v4169_v22 = vor.u32 %v5116_v16, %v4168_v15  ;;  %v5035_v9 = vld [vmem:[#allocation5 + $0xc] sm:$0xf]  ;;  %v3858_v11 = vld [vmem:[#allocation5 + $0x18] sm:$0xf0]  ;;  %v5034_v15 = vld [vmem:[#allocation5 + $0x4] sm:$0xf]  ;;  %v4093_v29 = vor.u32 %v5094_v14, %v4090_v19 }
  0x9e   :  { %1122 = vmatpush.bf16.msrb.mxu0 %v3349_v27  ;;  %v5080_v27 = vld [vmem:[#allocation10 + $0x14c] sm:$0xf0]  ;;  %v3850_v16 = vld [vmem:[#allocation5 + $0x10] sm:$0xf0]  ;;  %v5042_v14 = vld [vmem:[#allocation10 + $0x24] sm:$0xf] }
  0x9f   :  { %1136 = vmatpush.bf16.msrb.mxu1 %v3477_v31  ;;  %v5144_v31 = vld [vmem:[#allocation10 + $0x34c] sm:$0xf0]  ;;  %v4025_v33 = vor.u32 %v5080_v27, %v4024_v25  ;;  %v5693_v28 = vor.u32 %v5034_v15, %v3850_v16  ;;  %v3882_v15 = vld [vmem:[#allocation10 + $0x30] sm:$0xf0]  ;;  %v5074_v16 = vld [vmem:[#allocation10 + $0x124] sm:$0xf] }
  0xa0   :  { %1150 = vmatpush.bf16.msrb.mxu2 %v3605_v32  ;;  %v3897_v32 = vor.u32 %v5048_v24, %v3896_v23  ;;  %v5158_v23 = vld [vmem:[#allocation10 + $0x3c4] sm:$0xf]  ;;  %v4346_v24 = vld [vmem:[#allocation10 + $0x3d0] sm:$0xf0] }
  0xa1   :  { %1164 = vmatpush.bf16.msrb.mxu3 %v3733_v35  ;;  %1123 = vmatmul.bf16.vlgmr.msrb.gmra.mxu0 %v5666_v5  ;;  %v5120_v5 = vld [vmem:[#allocation10 + $0x28c] sm:$0xf0]  ;;  %v3880_v35 = vld [vmem:[#allocation10 + $0x20] sm:$0xf]  ;;  %v4010_v19 = vld [vmem:[#allocation10 + $0x130] sm:$0xf0] }
  0xa2   :  { %1988 = vmatpush.bf16.msra.mxu0 %v3977_v36  ;;  %1137 = vmatmul.bf16.vlgmr.msrb.gmra.mxu1 %v5670_v17  ;;  %v4057_v17 = vor.u32 %v5088_v3, %v4056_v1  ;;  %v4185_v8 = vor.u32 %v5120_v5, %v4184_v4  ;;  %v5044_v36 = vld [vmem:[#allocation10 + $0x2c] sm:$0xf0]  ;;  %v5062_v3 = vld [vmem:[#allocation10 + $0xc4] sm:$0xf]  ;;  %v3962_v4 = vld [vmem:[#allocation10 + $0xd0] sm:$0xf0] }
  0xa3   :  { %2002 = vmatpush.bf16.msra.mxu1 %v4105_v37  ;;  %1151 = vmatmul.bf16.vlgmr.msrb.gmra.mxu2 %v5663_v59  ;;  %v5056_v59 = vld [vmem:[#allocation10 + $0x8c] sm:$0xf0]  ;;  %v4008_v37 = vld [vmem:[#allocation10 + $0x120] sm:$0xf]  ;;  %v3881_v45 = vor.u32 %v5044_v36, %v3880_v35  ;;  %v3856_v5 = vld [vmem:[#allocation5 + $0x8] sm:$0xf]  ;;  %v3965_v27 = vor.u32 %v5062_v3, %v3962_v4 }
  0xa4   :  { %2016 = vmatpush.bf16.msra.mxu2 %v4233_v38  ;;  %1165 = vmatmul.bf16.vlgmr.msrb.gmra.mxu3 %v5668_v10  ;;  %v5152_v10 = vld [vmem:[#allocation10 + $0x38c] sm:$0xf0]  ;;  %v3929_v7 = vor.u32 %v5056_v59, %v3928_v0  ;;  %v4281_v38 = vor.u32 %v5144_v31, %v4280_v30  ;;  %v5162_v0 = vld [vmem:[#allocation10 + $0x3e4] sm:$0xf]  ;;  %v4362_v59 = vld [vmem:[#allocation10 + $0x3f0] sm:$0xf0] }
  0xa5   :  { %2030 = vmatpush.bf16.msra.mxu3 %v4361_v42  ;;  %v4313_v13 = vor.u32 %v5152_v10, %v4312_v6  ;;  %v4264_v42 = vld [vmem:[#allocation10 + $0x320] sm:$0xf]  ;;  %v5037_v6 = vld [vmem:[#allocation5 + $0x14] sm:$0xf0]  ;;  %v4365_v18 = vor.u32 %v5162_v0, %v4362_v59  ;;  %v5058_v31 = vld [vmem:[#allocation10 + $0xa4] sm:$0xf] }
  0xa6   :  { %1989 = vmatpush.bf16.msra.mxu0 %v3961_v48  ;;  %v5072_v48 = vld [vmem:[#allocation10 + $0x10c] sm:$0xf0]  ;;  %v3848_v10 = vld [vmem:[#allocation5] sm:$0xf]  ;;  %v4074_v35 = vld [vmem:[#allocation10 + $0x1b0] sm:$0xf0] }
  0xa7   :  { %2003 = vmatpush.bf16.msra.mxu1 %v4089_v49  ;;  %v4009_v49 = vor.u32 %v5076_v39, %v4008_v37  ;;  %v3993_v1 = vor.u32 %v5072_v48, %v3992_v47  ;;  %v5122_v36 = vld [vmem:[#allocation10 + $0x2a4] sm:$0xf]  ;;  %v4202_v37 = vld [vmem:[#allocation10 + $0x2b0] sm:$0xf0] }
  0xa8   :  { %2017 = vmatpush.bf16.msra.mxu2 %v4217_v50  ;;  %v4137_v50 = vor.u32 %v5108_v41, %v4136_v40  ;;  %v4330_v39 = vld [vmem:[#allocation10 + $0x3b0] sm:$0xf0]  ;;  %v5118_v48 = vld [vmem:[#allocation10 + $0x284] sm:$0xf] }
  0xa9   :  { %2031 = vmatpush.bf16.msra.mxu3 %v4345_v54  ;;  %v4265_v54 = vor.u32 %v5140_v43, %v4264_v42  ;;  %v4205_v42 = vor.u32 %v5122_v36, %v4202_v37  ;;  %v5054_v43 = vld [vmem:[#allocation10 + $0x84] sm:$0xf]  ;;  %v4058_v47 = vld [vmem:[#allocation10 + $0x190] sm:$0xf0] }
  0xaa   :  { %1990 = vmatpush.bf16.msra.mxu0 %v3945_v61  ;;  %v5130_v61 = vld [vmem:[#allocation10 + $0x2e4] sm:$0xf]  ;;  %v4298_v0 = vld [vmem:[#allocation10 + $0x370] sm:$0xf0] }
  0xab   :  { %2004 = vmatpush.bf16.msra.mxu1 %v4073_v62  ;;  %v3865_v62 = vor.u32 %v5040_v46, %v3864_v44  ;;  %v3930_v44 = vld [vmem:[#allocation10 + $0x90] sm:$0xf0]  ;;  %v5046_v3 = vld [vmem:[#allocation10 + $0x44] sm:$0xf] }
  0xac   :  { %2018 = vmatpush.bf16.msra.mxu2 %v4201_v63  ;;  %v4234_v63 = vld [vmem:[#allocation10 + $0x2f0] sm:$0xf0]  ;;  %v5070_v36 = vld [vmem:[#allocation10 + $0x104] sm:$0xf] }
  0xad   :  { %2032 = vmatpush.bf16.msra.mxu3 %v4329_v2  ;;  %v4121_v2 = vor.u32 %v5104_v52, %v4120_v51  ;;  %v4314_v51 = vld [vmem:[#allocation10 + $0x390] sm:$0xf0]  ;;  %v3933_v52 = vor.u32 %v5054_v43, %v3930_v44  ;;  %v3984_v44 = vld [vmem:[#allocation10 + $0xe8] sm:$0xf] }
  0xae   :  { %1991 = vmatpush.bf16.msra.mxu0 %v3929_v7  ;;  %v4249_v7 = vor.u32 %v5136_v55, %v4248_v53  ;;  %v5050_v55 = vld [vmem:[#allocation10 + $0x64] sm:$0xf]  ;;  %v3898_v4 = vld [vmem:[#allocation10 + $0x50] sm:$0xf0] }
  0xaf   :  { %2005 = vmatpush.bf16.msra.mxu1 %v4057_v17  ;;  %v3981_v17 = vor.u32 %v5066_v56, %v3978_v57  ;;  %v3914_v56 = vld [vmem:[#allocation10 + $0x70] sm:$0xf0]  ;;  %v5082_v57 = vld [vmem:[#allocation10 + $0x164] sm:$0xf] }
  0xb0   :  { %2019 = vmatpush.bf16.msra.mxu2 %v4185_v8  ;;  %v5036_v8 = vld [vmem:[#allocation5 + $0xc] sm:$0xf0]  ;;  %v3917_v59 = vor.u32 %v5050_v55, %v3914_v56  ;;  %v3994_v37 = vld [vmem:[#allocation10 + $0x110] sm:$0xf0]  ;;  %v4368_v55 = vld [vmem:[#allocation10 + $0x3e8] sm:$0xf] }
  0xb1   :  { %2033 = vmatpush.bf16.msra.mxu3 %v4313_v13  ;;  %v4237_v13 = vor.u32 %v5130_v61, %v4234_v63  ;;  %v5689_v25 = vor.u32 %v5036_v8, %v3848_v10  ;;  %v5114_v61 = vld [vmem:[#allocation10 + $0x264] sm:$0xf]  ;;  %v4026_v10 = vld [vmem:[#allocation10 + $0x150] sm:$0xf0]  ;;  %v5165_v56 = vld [vmem:[#allocation10 + $0x3f4] sm:$0xf0] }
  0xb2   :  { %1992 = vmatpush.bf16.msra.mxu0 %v3913_v20  ;;  %v5126_v20 = vld [vmem:[#allocation10 + $0x2c4] sm:$0xf]  ;;  %v4250_v43 = vld [vmem:[#allocation10 + $0x310] sm:$0xf0] }
  0xb3   :  { %2006 = vmatpush.bf16.msra.mxu1 %v4041_v21  ;;  %v4218_v21 = vld [vmem:[#allocation10 + $0x2d0] sm:$0xf0]  ;;  %v5146_v63 = vld [vmem:[#allocation10 + $0x364] sm:$0xf] }
  0xb4   :  { %2020 = vmatpush.bf16.msra.mxu2 %v4169_v22  ;;  %v5687_v22 = vor.u32 %v5037_v6, %v3856_v5  ;;  %v4221_v30 = vor.u32 %v5126_v20, %v4218_v21  ;;  %v5078_v5 = vld [vmem:[#allocation10 + $0x144] sm:$0xf]  ;;  %v4301_v6 = vor.u32 %v5146_v63, %v4298_v0  ;;  %v4138_v21 = vld [vmem:[#allocation10 + $0x230] sm:$0xf0]  ;;  %v3968_v63 = vld [vmem:[#allocation10 + $0xc8] sm:$0xf] }
  0xb5   :  { %2034 = vmatpush.bf16.msra.mxu3 %v4297_v26  ;;  %v5691_v26 = vor.u32 %v5035_v9, %v3858_v11  ;;  %v5142_v8 = vld [vmem:[#allocation10 + $0x344] sm:$0xf]  ;;  %v4282_v9 = vld [vmem:[#allocation10 + $0x350] sm:$0xf0]  ;;  %v3901_v11 = vor.u32 %v5046_v3, %v3898_v4  ;;  %v5065_v0 = vld [vmem:[#allocation10 + $0xd4] sm:$0xf0] }
  0xb6   :  { %1993 = vmatpush.bf16.msra.mxu0 %v3897_v32  ;;  %v3946_v32 = vld [vmem:[#allocation10 + $0xb0] sm:$0xf0]  ;;  %v5106_v20 = vld [vmem:[#allocation10 + $0x224] sm:$0xf]  ;;  %v4224_v3 = vld [vmem:[#allocation10 + $0x2c8] sm:$0xf] }
  0xb7   :  { %2007 = vmatpush.bf16.msra.mxu1 %v4025_v33  ;;  %v5090_v33 = vld [vmem:[#allocation10 + $0x1a4] sm:$0xf]  ;;  %v3949_v40 = vor.u32 %v5058_v31, %v3946_v32  ;;  %v3885_v31 = vor.u32 %v5042_v14, %v3882_v15  ;;  %v5129_v4 = vld [vmem:[#allocation10 + $0x2d4] sm:$0xf0]  ;;  %v4080_v14 = vld [vmem:[#allocation10 + $0x1a8] sm:$0xf] }
  0xb8   :  { %2021 = vmatpush.bf16.msra.mxu2 %v4153_v34  ;;  %v4349_v34 = vor.u32 %v5158_v23, %v4346_v24  ;;  %v4077_v41 = vor.u32 %v5090_v33, %v4074_v35  ;;  %v5138_v24 = vld [vmem:[#allocation10 + $0x324] sm:$0xf]  ;;  %v3866_v33 = vld [vmem:[#allocation10 + $0x10] sm:$0xf0]  ;;  %v4141_v35 = vor.u32 %v5106_v20, %v4138_v21  ;;  %v5125_v20 = vld [vmem:[#allocation10 + $0x2b4] sm:$0xf0] }
  0xb9   :  { %2035 = vmatpush.bf16.msra.mxu3 %v4281_v38  ;;  %v5154_v38 = vld [vmem:[#allocation10 + $0x3a4] sm:$0xf]  ;;  %v4336_v21 = vld [vmem:[#allocation10 + $0x3a8] sm:$0xf] }
  0xba   :  { %1994 = vmatpush.bf16.msra.mxu0 %v3881_v45  ;;  %v5086_v45 = vld [vmem:[#allocation10 + $0x184] sm:$0xf]  ;;  %v4333_v46 = vor.u32 %v5154_v38, %v4330_v39 }
  0xbb   :  { %2008 = vmatpush.bf16.msra.mxu1 %v4009_v49  ;;  %v4186_v49 = vld [vmem:[#allocation10 + $0x290] sm:$0xf0]  ;;  %v4061_v53 = vor.u32 %v5086_v45, %v4058_v47  ;;  %v5038_v32 = vld [vmem:[#allocation10 + $0x4] sm:$0xf]  ;;  %v5069_v45 = vld [vmem:[#allocation10 + $0xf4] sm:$0xf0] }
  0xbc   :  { %2022 = vmatpush.bf16.msra.mxu2 %v4137_v50  ;;  %v5150_v50 = vld [vmem:[#allocation10 + $0x384] sm:$0xf] }
  0xbd   :  { %2036 = vmatpush.bf16.msra.mxu3 %v4265_v54  ;;  %v4189_v54 = vor.u32 %v5118_v48, %v4186_v49  ;;  %v4317_v58 = vor.u32 %v5150_v50, %v4314_v51  ;;  %v5102_v38 = vld [vmem:[#allocation10 + $0x204] sm:$0xf]  ;;  %v3869_v48 = vor.u32 %v5038_v32, %v3866_v33  ;;  %v5101_v49 = vld [vmem:[#allocation10 + $0x1f4] sm:$0xf0]  ;;  %v4240_v50 = vld [vmem:[#allocation10 + $0x2e8] sm:$0xf] }
  0xbe   :  { %1995 = vmatpush.bf16.msra.mxu0 %v3865_v62  ;;  %v4170_v62 = vld [vmem:[#allocation10 + $0x270] sm:$0xf0]  ;;  %v5133_v51 = vld [vmem:[#allocation10 + $0x2f4] sm:$0xf0] }
  0xbf   :  { %2009 = vmatpush.bf16.msra.mxu1 %v3993_v1  ;;  %v4045_v1 = vor.u32 %v5082_v57, %v4042_v60  ;;  %v3985_v60 = vor.u32 %v5069_v45, %v3984_v44  ;;  %v5153_v44 = vld [vmem:[#allocation10 + $0x394] sm:$0xf0] }
  0xc0   :  { %2023 = vmatpush.bf16.msra.mxu2 %v4121_v2  ;;  %v4173_v2 = vor.u32 %v5114_v61, %v4170_v62  ;;  %v4241_v62 = vor.u32 %v5133_v51, %v4240_v50 }
  0xc1   :  { %2037 = vmatpush.bf16.msra.mxu3 %v4249_v7  ;;  %1996 = vmatmul.bf16.vlgmr.msra.gmra.mxu0 %v5689_v25  ;;  %v5110_v7 = vld [vmem:[#allocation10 + $0x244] sm:$0xf]  ;;  %v5699_v23 = vpop.f32.mrf.mxu0 }
  0xc2   :  { %2044 = vmatpush.bf16.msrb.mxu0 %v3981_v17  ;;  %2010 = vmatmul.bf16.vlgmr.msra.gmra.mxu1 %v5693_v28  ;;  %v4154_v17 = vld [vmem:[#allocation10 + $0x250] sm:$0xf0] }
  0xc3   :  { %2058 = vmatpush.bf16.msrb.mxu1 %v4109_v12  ;;  %2024 = vmatmul.bf16.vlgmr.msra.gmra.mxu2 %v5687_v22  ;;  %v4029_v12 = vor.u32 %v5078_v5, %v4026_v10  ;;  %v5161_v10 = vld [vmem:[#allocation10 + $0x3d4] sm:$0xf0] }
  0xc4   :  { %2072 = vmatpush.bf16.msrb.mxu2 %v4237_v13  ;;  %2038 = vmatmul.bf16.vlgmr.msra.gmra.mxu3 %v5691_v26  ;;  %v4157_v13 = vor.u32 %v5110_v7, %v4154_v17 }
  0xc5   :  { %2086 = vmatpush.bf16.msrb.mxu3 %v4365_v18  ;;  %v4285_v18 = vor.u32 %v5142_v8, %v4282_v9  ;;  %v3969_v8 = vor.u32 %v5065_v0, %v3968_v63  ;;  %v3952_v9 = vld [vmem:[#allocation10 + $0xa8] sm:$0xf] }
  0xc6   :  { %2045 = vmatpush.bf16.msrb.mxu0 %v3965_v27  ;;  %v4266_v27 = vld [vmem:[#allocation10 + $0x330] sm:$0xf0]  ;;  %v5706_v47 = vpop.f32.mrf.mxu2  ;;  %v4304_v0 = vld [vmem:[#allocation10 + $0x368] sm:$0xf] }
  0xc7   :  { %2059 = vmatpush.bf16.msrb.mxu1 %v4093_v29  ;;  %v5701_v29 = vld [vmem:[#allocation13] sm:$0x55]  ;;  %v4269_v39 = vor.u32 %v5138_v24, %v4266_v27  ;;  %v5157_v24 = vld [vmem:[#allocation10 + $0x3b4] sm:$0xf0] }
  0xc8   :  { %2073 = vmatpush.bf16.msrb.mxu2 %v4221_v30  ;;  %v5703_v30 = vpop.f32.mrf.mxu1 }
  0xc9   :  { %2087 = vmatpush.bf16.msrb.mxu3 %v4349_v34  ;;  %v4013_v34 = vor.u32 %v5074_v16, %v4010_v19  ;;  %v5712_v5 = vpop.f32.mrf.mxu0  ;;  %v4208_v19 = vld [vmem:[#allocation10 + $0x2a8] sm:$0xf] }
  0xca   :  { %2046 = vmatpush.bf16.msrb.mxu0 %v3949_v40  ;;  %v271_v40 = vunpack.c.l.bf16 %v5701_v29 }
  0xcb   :  { %2060 = vmatpush.bf16.msrb.mxu1 %v4077_v41  ;;  %v4122_v41 = vld [vmem:[#allocation10 + $0x210] sm:$0xf0] }
  0xcc   :  { %2074 = vmatpush.bf16.msrb.mxu2 %v4205_v42  ;;  %v5134_v42 = vld [vmem:[#allocation10 + $0x304] sm:$0xf]  ;;  %v5710_v57 = vperm.slane %v271_v40, 0  ;;  %v5717_v15 = vperm.slane %v271_v40, 4  ;;  %v4337_v40 = vor.u32 %v5157_v24, %v4336_v21 }
  0xcd   :  { %2088 = vmatpush.bf16.msrb.mxu3 %v4333_v46  ;;  %v4112_v46 = vld [vmem:[#allocation10 + $0x1e8] sm:$0xf] }
  0xce   :  { %2047 = vmatpush.bf16.msrb.mxu0 %v3933_v52  ;;  %v5708_v52 = vpop.f32.mrf.mxu3  ;;  %v4113_v61 = vor.u32 %v5101_v49, %v4112_v46  ;;  %v283_v17 = vperm.slane %v5710_v57, 0  ;;  %v5722_v27 = vpop.f32.mrf.mxu2  ;;  %v4288_v57 = vld [vmem:[#allocation10 + $0x348] sm:$0xf] }
  0xcf   :  { %2061 = vmatpush.bf16.msrb.mxu1 %v4061_v53  ;;  %v3997_v53 = vor.u32 %v5070_v36, %v3994_v37  ;;  %v4209_v36 = vor.u32 %v5125_v20, %v4208_v19  ;;  %v5057_v37 = vld [vmem:[#allocation10 + $0x94] sm:$0xf0] }
  0xd0   :  { %2075 = vmatpush.bf16.msrb.mxu2 %v4189_v54  ;;  %v4125_v54 = vor.u32 %v5102_v38, %v4122_v41  ;;  %v5714_v7 = vpop.f32.mrf.mxu1  ;;  %v4064_v38 = vld [vmem:[#allocation10 + $0x188] sm:$0xf]  ;;  %v5089_v41 = vld [vmem:[#allocation10 + $0x194] sm:$0xf0] }
  0xd1   :  { %2089 = vmatpush.bf16.msrb.mxu3 %v4317_v58  ;;  %v4253_v58 = vor.u32 %v5134_v42, %v4250_v43  ;;  %v4192_v42 = vld [vmem:[#allocation10 + $0x288] sm:$0xf]  ;;  %v4065_v49 = vor.u32 %v5089_v41, %v4064_v38  ;;  %v5109_v41 = vld [vmem:[#allocation10 + $0x234] sm:$0xf0] }
  0xd2   :  { %2048 = vmatpush.bf16.msrb.mxu0 %v3917_v59  ;;  %v4096_v59 = vld [vmem:[#allocation10 + $0x1c8] sm:$0xf] }
  0xd3   :  { %2062 = vmatpush.bf16.msrb.mxu1 %v4045_v1  ;;  %v4369_v1 = vor.u32 %v5165_v56, %v4368_v55  ;;  %v4320_v43 = vld [vmem:[#allocation10 + $0x388] sm:$0xf]  ;;  %v5053_v55 = vld [vmem:[#allocation10 + $0x74] sm:$0xf0] }
  0xd4   :  { %2076 = vmatpush.bf16.msrb.mxu2 %v4173_v2  ;;  %v5097_v2 = vld [vmem:[#allocation10 + $0x1d4] sm:$0xf0]  ;;  %v4048_v56 = vld [vmem:[#allocation10 + $0x168] sm:$0xf] }
  0xd5   :  { %2090 = vmatpush.bf16.msrb.mxu3 %v4301_v6  ;;  %v4352_v6 = vld [vmem:[#allocation10 + $0x3c8] sm:$0xf] }
  0xd6   :  { %2049 = vmatpush.bf16.msrb.mxu0 %v3901_v11  ;;  %v4097_v11 = vor.u32 %v5097_v2, %v4096_v59  ;;  %v4353_v16 = vor.u32 %v5161_v10, %v4352_v6  ;;  %v5728_v33 = vpop.f32.mrf.mxu3  ;;  %v3904_v10 = vld [vmem:[#allocation10 + $0x48] sm:$0xf] }
  0xd7   :  { %2063 = vmatpush.bf16.msrb.mxu1 %v4029_v12  ;;  %v4225_v12 = vor.u32 %v5129_v4, %v4224_v3 }
  0xd8   :  { %2077 = vmatpush.bf16.msrb.mxu2 %v4157_v13  ;;  %v5061_v13 = vld [vmem:[#allocation10 + $0xb4] sm:$0xf0] }
  0xd9   :  { %2091 = vmatpush.bf16.msrb.mxu3 %v4285_v18  ;;  %v5093_v18 = vld [vmem:[#allocation10 + $0x1b4] sm:$0xf0]  ;;  %v3953_v32 = vor.u32 %v5061_v13, %v3952_v9  ;;  %v4032_v9 = vld [vmem:[#allocation10 + $0x148] sm:$0xf] }
  0xda   :  { %2050 = vmatpush.bf16.msrb.mxu0 %v3885_v31  ;;  %v957_v31 = vadd.f32 %v5699_v23, %v283_v17  ;;  %v5121_v23 = vld [vmem:[#allocation10 + $0x294] sm:$0xf0] }
  0xdb   :  { %2064 = vmatpush.bf16.msrb.mxu1 %v4013_v34  ;;  %v3936_v34 = vld [vmem:[#allocation10 + $0x88] sm:$0xf]  ;;  %v4193_v50 = vor.u32 %v5121_v23, %v4192_v42  ;;  %v5141_v23 = vld [vmem:[#allocation10 + $0x334] sm:$0xf0] }
  0xdc   :  { %2078 = vmatpush.bf16.msrb.mxu2 %v4141_v35  ;;  %v4081_v35 = vor.u32 %v5093_v18, %v4080_v14  ;;  %v971_v45 = vadd.f32 %v5703_v30, %v957_v31  ;;  %v3937_v46 = vor.u32 %v5057_v37, %v3936_v34  ;;  %v5149_v30 = vld [vmem:[#allocation10 + $0x374] sm:$0xf0]  ;;  %v3888_v34 = vld [vmem:[#allocation10 + $0x28] sm:$0xf] }
  0xdd   :  { %2092 = vmatpush.bf16.msrb.mxu3 %v4269_v39  ;;  %v284_v39 = vperm.slane %v5717_v15, 0  ;;  %v5081_v14 = vld [vmem:[#allocation10 + $0x154] sm:$0xf0]  ;;  %v4272_v42 = vld [vmem:[#allocation10 + $0x328] sm:$0xf] }
  0xde   :  { %2051 = vmatpush.bf16.msrb.mxu0 %v3869_v48  ;;  %v1012_v48 = vpop.f32.mrf.mxu0  ;;  %v985_v59 = vadd.f32 %v5706_v47, %v971_v45  ;;  %v4160_v47 = vld [vmem:[#allocation10 + $0x248] sm:$0xf]  ;;  %v5113_v15 = vld [vmem:[#allocation10 + $0x254] sm:$0xf0]  ;;  %v4033_v21 = vor.u32 %v5081_v14, %v4032_v9 }
  0xdf   :  { %2065 = vmatpush.bf16.msrb.mxu1 %v3997_v53  ;;  %v1013_v51 = vadd.f32 %v1012_v48, %v284_v39  ;;  %v1026_v53 = vpop.f32.mrf.mxu1  ;;  %v4161_v24 = vor.u32 %v5113_v15, %v4160_v47  ;;  %v3872_v45 = vld [vmem:[#allocation10 + $0x8] sm:$0xf]  ;;  %v5095_v15 = vld [vmem:[#allocation10 + $0x1cc] sm:$0xf] }
  0xe0   :  { %2079 = vmatpush.bf16.msrb.mxu2 %v4125_v54  ;;  %v3920_v54 = vld [vmem:[#allocation10 + $0x68] sm:$0xf] }
  0xe1   :  { %2093 = vmatpush.bf16.msrb.mxu3 %v4253_v58  ;;  %2052 = vmatmul.bf16.vlgmr.msrb.gmra.mxu0 %v5689_v25  ;;  %v4321_v58 = vor.u32 %v5153_v44, %v4320_v43  ;;  %v1027_v63 = vadd.f32 %v1026_v53, %v1013_v51  ;;  %v3921_v2 = vor.u32 %v5053_v55, %v3920_v54  ;;  %v5073_v51 = vld [vmem:[#allocation10 + $0x114] sm:$0xf0]  ;;  %v4128_v53 = vld [vmem:[#allocation10 + $0x208] sm:$0xf] }
  0xe2   :  { %2100 = vmatpush.bf16.msra.mxu0 %v3985_v60  ;;  %2066 = vmatmul.bf16.vlgmr.msrb.gmra.mxu1 %v5693_v28  ;;  %v5085_v60 = vld [vmem:[#allocation10 + $0x174] sm:$0xf0]  ;;  %v4273_v54 = vor.u32 %v5141_v23, %v4272_v42  ;;  %v5055_v23 = vld [vmem:[#allocation10 + $0x8c] sm:$0xf] }
  0xe3   :  { %2114 = vmatpush.bf16.msra.mxu1 %v4113_v61  ;;  %2080 = vmatmul.bf16.vlgmr.msrb.gmra.mxu2 %v5687_v22  ;;  %v4176_v61 = vld [vmem:[#allocation10 + $0x268] sm:$0xf]  ;;  %v4049_v3 = vor.u32 %v5085_v60, %v4048_v56 }
  0xe4   :  { %2128 = vmatpush.bf16.msra.mxu2 %v4241_v62  ;;  %2094 = vmatmul.bf16.vlgmr.msrb.gmra.mxu3 %v5691_v26  ;;  %v5117_v62 = vld [vmem:[#allocation10 + $0x274] sm:$0xf0]  ;;  %v4256_v60 = vld [vmem:[#allocation10 + $0x308] sm:$0xf] }
  0xe5   :  { %2142 = vmatpush.bf16.msra.mxu3 %v4369_v1  ;;  %v959_v1 = vadd.f32 %v5712_v5, %v283_v17  ;;  %v4177_v4 = vor.u32 %v5117_v62, %v4176_v61  ;;  %v999_v5 = vadd.f32 %v5708_v52, %v985_v59  ;;  %v4144_v52 = vld [vmem:[#allocation10 + $0x228] sm:$0xf]  ;;  %v5067_v61 = vld [vmem:[#allocation10 + $0xec] sm:$0xf]  ;;  %v3986_v62 = vld [vmem:[#allocation10 + $0xf8] sm:$0xf0] }
  0xe6   :  { %2101 = vmatpush.bf16.msra.mxu0 %v3969_v8  ;;  %v1040_v6 = vpop.f32.mrf.mxu2  ;;  %v5049_v8 = vld [vmem:[#allocation10 + $0x54] sm:$0xf0]  ;;  %v1014_v20 = vpop.f32.mrf.mxu0  ;;  %v4145_v48 = vor.u32 %v5109_v41, %v4144_v52  ;;  %v4338_v52 = vld [vmem:[#allocation10 + $0x3b8] sm:$0xf0] }
  0xe7   :  { %2115 = vmatpush.bf16.msra.mxu1 %v4097_v11  ;;  %v4305_v11 = vor.u32 %v5149_v30, %v4304_v0  ;;  %v1054_v13 = vpop.f32.mrf.mxu3  ;;  %v973_v17 = vadd.f32 %v5714_v7, %v959_v1  ;;  %v3905_v19 = vor.u32 %v5049_v8, %v3904_v10  ;;  %v1015_v31 = vadd.f32 %v1014_v20, %v284_v39  ;;  %v5041_v39 = vld [vmem:[#allocation10 + $0x14] sm:$0xf0]  ;;  %v4114_v1 = vld [vmem:[#allocation10 + $0x1f8] sm:$0xf0]  ;;  %v5163_v10 = vld [vmem:[#allocation10 + $0x3ec] sm:$0xf] }
  0xe8   :  { %2129 = vmatpush.bf16.msra.mxu2 %v4225_v12  ;;  %v1041_v12 = vadd.f32 %v1040_v6, %v1027_v63  ;;  %v5099_v63 = vld [vmem:[#allocation10 + $0x1ec] sm:$0xf]  ;;  %v3873_v59 = vor.u32 %v5041_v39, %v3872_v45  ;;  %v4370_v8 = vld [vmem:[#allocation10 + $0x3f8] sm:$0xf0] }
  0xe9   :  { %2143 = vmatpush.bf16.msra.mxu3 %v4353_v16  ;;  %v5145_v16 = vld [vmem:[#allocation10 + $0x354] sm:$0xf0]  ;;  %v987_v43 = vadd.f32 %v5722_v27, %v973_v17  ;;  %v4117_v14 = vor.u32 %v5099_v63, %v4114_v1  ;;  %v4226_v17 = vld [vmem:[#allocation10 + $0x2d8] sm:$0xf0]  ;;  %v5147_v63 = vld [vmem:[#allocation10 + $0x36c] sm:$0xf] }
  0xea   :  { %2102 = vmatpush.bf16.msra.mxu0 %v3953_v32  ;;  %v1055_v18 = vadd.f32 %v1054_v13, %v1041_v12  ;;  %v1028_v32 = vpop.f32.mrf.mxu1  ;;  %v4289_v38 = vor.u32 %v5145_v16, %v4288_v57  ;;  %v5137_v27 = vld [vmem:[#allocation10 + $0x314] sm:$0xf0]  ;;  %v3989_v12 = vor.u32 %v5067_v61, %v3986_v62  ;;  %v5063_v13 = vld [vmem:[#allocation10 + $0xcc] sm:$0xf]  ;;  %v4098_v57 = vld [vmem:[#allocation10 + $0x1d8] sm:$0xf0]  ;;  %v4373_v16 = vor.u32 %v5163_v10, %v4370_v8 }
  0xeb   :  { %2116 = vmatpush.bf16.msra.mxu1 %v4081_v35  ;;  %v5045_v35 = vld [vmem:[#allocation10 + $0x34] sm:$0xf0]  ;;  %v1029_v7 = vadd.f32 %v1028_v32, %v1015_v31  ;;  %v1001_v0 = vadd.f32 %v5728_v33, %v987_v43  ;;  %v3970_v33 = vld [vmem:[#allocation10 + $0xd8] sm:$0xf0]  ;;  %v5059_v31 = vld [vmem:[#allocation10 + $0xac] sm:$0xf] }
  0xec   :  { %2130 = vmatpush.bf16.msra.mxu2 %v4209_v36  ;;  %v4016_v36 = vld [vmem:[#allocation10 + $0x128] sm:$0xf]  ;;  %v1171_v37 = vpack.c.bf16 %v1055_v18, %v999_v5  ;;  %v3889_v44 = vor.u32 %v5045_v35, %v3888_v34  ;;  %v5127_v5 = vld [vmem:[#allocation10 + $0x2cc] sm:$0xf]  ;;  %v3973_v20 = vor.u32 %v5063_v13, %v3970_v33  ;;  %v3954_v32 = vld [vmem:[#allocation10 + $0xb8] sm:$0xf0] }
  0xed   :  { %2144 = vmatpush.bf16.msra.mxu3 %v4337_v40  ;;  %v5077_v40 = vld [vmem:[#allocation10 + $0x134] sm:$0xf0]  ;;  %v5159_v18 = vld [vmem:[#allocation10 + $0x3cc] sm:$0xf]  ;;  %v3957_v41 = vor.u32 %v5059_v31, %v3954_v32  ;;  %v3938_v43 = vld [vmem:[#allocation10 + $0x98] sm:$0xf0] }
  0xee   :  { %2103 = vmatpush.bf16.msra.mxu0 %v3937_v46  ;;  %1175 = vst [vmem:[#allocation14] sm:$0xff] %v1171_v37  ;;  %v4017_v46 = vor.u32 %v5077_v40, %v4016_v36  ;;  %v5091_v34 = vld [vmem:[#allocation10 + $0x1ac] sm:$0xf]  ;;  %v4082_v36 = vld [vmem:[#allocation10 + $0x1b8] sm:$0xf0] }
  0xef   :  { %2117 = vmatpush.bf16.msra.mxu1 %v4065_v49  ;;  %v1042_v49 = vpop.f32.mrf.mxu2  ;;  %v1056_v56 = vpop.f32.mrf.mxu3  ;;  %v5123_v37 = vld [vmem:[#allocation10 + $0x2ac] sm:$0xf]  ;;  %v4066_v39 = vld [vmem:[#allocation10 + $0x198] sm:$0xf0] }
  0xf0   :  { %2131 = vmatpush.bf16.msra.mxu2 %v4193_v50  ;;  %v4000_v50 = vld [vmem:[#allocation10 + $0x108] sm:$0xf]  ;;  %v1043_v55 = vadd.f32 %v1042_v49, %v1029_v7  ;;  %v5155_v40 = vld [vmem:[#allocation10 + $0x3ac] sm:$0xf]  ;;  %v4085_v7 = vor.u32 %v5091_v34, %v4082_v36  ;;  %v4178_v62 = vld [vmem:[#allocation10 + $0x278] sm:$0xf0] }
  0xf1   :  { %2145 = vmatpush.bf16.msra.mxu3 %v4321_v58  ;;  %v5105_v58 = vld [vmem:[#allocation10 + $0x214] sm:$0xf0]  ;;  %v4341_v45 = vor.u32 %v5155_v40, %v4338_v52  ;;  %v5151_v49 = vld [vmem:[#allocation10 + $0x38c] sm:$0xf]  ;;  %v4034_v10 = vld [vmem:[#allocation10 + $0x158] sm:$0xf0] }
  0xf2   :  { %2104 = vmatpush.bf16.msra.mxu0 %v3921_v2  ;;  %v1057_v30 = vadd.f32 %v1056_v56, %v1043_v55  ;;  %v5131_v2 = vld [vmem:[#allocation10 + $0x2ec] sm:$0xf]  ;;  %v4129_v6 = vor.u32 %v5105_v58, %v4128_v53  ;;  %v3922_v56 = vld [vmem:[#allocation10 + $0x78] sm:$0xf0] }
  0xf3   :  { %2118 = vmatpush.bf16.msra.mxu1 %v4049_v3  ;;  %v4242_v3 = vld [vmem:[#allocation10 + $0x2f8] sm:$0xf0]  ;;  %v5051_v55 = vld [vmem:[#allocation10 + $0x6c] sm:$0xf] }
  0xf4   :  { %2132 = vmatpush.bf16.msra.mxu2 %v4177_v4  ;;  %v4001_v4 = vor.u32 %v5073_v51, %v4000_v50  ;;  %v1173_v9 = vpack.c.bf16 %v1057_v30, %v1001_v0  ;;  %v4245_v47 = vor.u32 %v5131_v2, %v4242_v3  ;;  %v4322_v50 = vld [vmem:[#allocation10 + $0x398] sm:$0xf0]  ;;  %v3941_v51 = vor.u32 %v5055_v23, %v3938_v43  ;;  %v5083_v58 = vld [vmem:[#allocation10 + $0x16c] sm:$0xf]  ;;  %v4504_v43 = vld [vmem:[#allocation11 + $0xe0] sm:$0xf] }
  0xf5   :  { %2146 = vmatpush.bf16.msra.mxu3 %v4305_v11  ;;  %v4257_v11 = vor.u32 %v5137_v27, %v4256_v60  ;;  %v4325_v60 = vor.u32 %v5151_v49, %v4322_v50  ;;  %v4050_v27 = vld [vmem:[#allocation10 + $0x178] sm:$0xf0]  ;;  %v5115_v61 = vld [vmem:[#allocation10 + $0x26c] sm:$0xf]  ;;  %v3925_v30 = vor.u32 %v5051_v55, %v3922_v56  ;;  %v4760_v49 = vld [vmem:[#allocation11 + $0x2e0] sm:$0xf] }
  0xf6   :  { %2105 = vmatpush.bf16.msra.mxu0 %v3905_v19  ;;  %1177 = vst [vmem:[#allocation14 + $0x10] sm:$0xff] %v1173_v9  ;;  %v4354_v19 = vld [vmem:[#allocation10 + $0x3d8] sm:$0xf0]  ;;  %v4181_v1 = vor.u32 %v5115_v61, %v4178_v62  ;;  %v5047_v2 = vld [vmem:[#allocation10 + $0x4c] sm:$0xf] }
  0xf7   :  { %2119 = vmatpush.bf16.msra.mxu1 %v4033_v21  ;;  %v4101_v21 = vor.u32 %v5095_v15, %v4098_v57  ;;  %v4357_v35 = vor.u32 %v5159_v18, %v4354_v19  ;;  %v4306_v0 = vld [vmem:[#allocation10 + $0x378] sm:$0xf0]  ;;  %v5111_v8 = vld [vmem:[#allocation10 + $0x24c] sm:$0xf]  ;;  %v5264_v50 = vld [vmem:[#allocation11 + $0x2ec] sm:$0xf0] }
  0xf8   :  { %2133 = vmatpush.bf16.msra.mxu2 %v4161_v24  ;;  %v4229_v24 = vor.u32 %v5127_v5, %v4226_v17  ;;  %v3906_v3 = vld [vmem:[#allocation10 + $0x58] sm:$0xf0]  ;;  %v5043_v33 = vld [vmem:[#allocation10 + $0x2c] sm:$0xf]  ;;  %v5296_v55 = vld [vmem:[#allocation11 + $0x3ec] sm:$0xf0]  ;;  %v4761_v61 = vor.u32 %v5264_v50, %v4760_v49 }
  0xf9   :  { %2147 = vmatpush.bf16.msra.mxu3 %v4289_v38  ;;  %v4210_v38 = vld [vmem:[#allocation10 + $0x2b8] sm:$0xf0]  ;;  %v3909_v13 = vor.u32 %v5047_v2, %v3906_v3  ;;  %v5075_v57 = vld [vmem:[#allocation10 + $0x12c] sm:$0xf]  ;;  %v4488_v62 = vld [vmem:[#allocation11 + $0xc0] sm:$0xf] }
  0xfa   :  { %2106 = vmatpush.bf16.msra.mxu0 %v3889_v44  ;;  %v4213_v42 = vor.u32 %v5123_v37, %v4210_v38  ;;  %v5087_v44 = vld [vmem:[#allocation10 + $0x18c] sm:$0xf]  ;;  %v4162_v9 = vld [vmem:[#allocation10 + $0x258] sm:$0xf0]  ;;  %v5260_v2 = vld [vmem:[#allocation11 + $0x2cc] sm:$0xf0] }
  0xfb   :  { %2120 = vmatpush.bf16.msra.mxu1 %v4017_v46  ;;  %v5119_v46 = vld [vmem:[#allocation10 + $0x28c] sm:$0xf]  ;;  %v4069_v53 = vor.u32 %v5087_v44, %v4066_v39  ;;  %v3890_v15 = vld [vmem:[#allocation10 + $0x38] sm:$0xf0]  ;;  %v5200_v44 = vld [vmem:[#allocation11 + $0xec] sm:$0xf0] }
  0xfc   :  { %2134 = vmatpush.bf16.msra.mxu2 %v4145_v48  ;;  %v4194_v48 = vld [vmem:[#allocation10 + $0x298] sm:$0xf0]  ;;  %v5107_v17 = vld [vmem:[#allocation10 + $0x22c] sm:$0xf]  ;;  %v3893_v31 = vor.u32 %v5043_v33, %v3890_v15  ;;  %v4568_v49 = vld [vmem:[#allocation11 + $0x160] sm:$0xf] }
  0xfd   :  { %2148 = vmatpush.bf16.msra.mxu3 %v4273_v54  ;;  %v4197_v54 = vor.u32 %v5119_v46, %v4194_v48  ;;  %v4018_v5 = vld [vmem:[#allocation10 + $0x138] sm:$0xf0]  ;;  %v5039_v32 = vld [vmem:[#allocation10 + $0xc] sm:$0xf]  ;;  %v5232_v48 = vld [vmem:[#allocation11 + $0x1ec] sm:$0xf0] }
  0xfe   :  { %2107 = vmatpush.bf16.msra.mxu0 %v3873_v59  ;;  %v4053_v59 = vor.u32 %v5083_v58, %v4050_v27  ;;  %v4146_v18 = vld [vmem:[#allocation10 + $0x238] sm:$0xf0]  ;;  %v5744_v19 = vpop.f32.mrf.mxu0  ;;  %v5071_v37 = vld [vmem:[#allocation10 + $0x10c] sm:$0xf] }
  0xff   :  { %2121 = vmatpush.bf16.msra.mxu1 %v4001_v4  ;;  %v5079_v4 = vld [vmem:[#allocation10 + $0x14c] sm:$0xf]  ;;  %v3874_v34 = vld [vmem:[#allocation10 + $0x18] sm:$0xf0]  ;;  %v4149_v36 = vor.u32 %v5107_v17, %v4146_v18  ;;  %v4856_v17 = vld [vmem:[#allocation11 + $0x3a0] sm:$0xf] }
 0x100   :  { %2135 = vmatpush.bf16.msra.mxu2 %v4129_v6  ;;  %v4309_v6 = vor.u32 %v5147_v63, %v4306_v0  ;;  %v4002_v38 = vld [vmem:[#allocation10 + $0x118] sm:$0xf0]  ;;  %v5103_v40 = vld [vmem:[#allocation10 + $0x20c] sm:$0xf]  ;;  %v3877_v46 = vor.u32 %v5039_v32, %v3874_v34  ;;  %v5196_v63 = vld [vmem:[#allocation11 + $0xcc] sm:$0xf0] }
 0x101   :  { %2149 = vmatpush.bf16.msra.mxu3 %v4257_v11  ;;  %2108 = vmatmul.bf16.vlgmr.msra.gmra.mxu0 %v5689_v25  ;;  %v5143_v11 = vld [vmem:[#allocation10 + $0x34c] sm:$0xf]  ;;  %v4258_v23 = vld [vmem:[#allocation10 + $0x318] sm:$0xf0]  ;;  %v4616_v0 = vld [vmem:[#allocation11 + $0x1c0] sm:$0xf] }
 0x102   :  { %2156 = vmatpush.bf16.msrb.mxu0 %v3989_v12  ;;  %2122 = vmatmul.bf16.vlgmr.msra.gmra.mxu1 %v5693_v28  ;;  %v4290_v12 = vld [vmem:[#allocation10 + $0x358] sm:$0xf0]  ;;  %v5288_v18 = vld [vmem:[#allocation11 + $0x3ac] sm:$0xf0]  ;;  %v4456_v32 = vld [vmem:[#allocation11 + $0x80] sm:$0xf] }
 0x103   :  { %2170 = vmatpush.bf16.msrb.mxu1 %v4117_v14  ;;  %2136 = vmatmul.bf16.vlgmr.msra.gmra.mxu2 %v5687_v22  ;;  %v4037_v14 = vor.u32 %v5079_v4, %v4034_v10  ;;  %v4872_v4 = vld [vmem:[#allocation11 + $0x3c0] sm:$0xf] }
 0x104   :  { %2184 = vmatpush.bf16.msrb.mxu2 %v4245_v47  ;;  %2150 = vmatmul.bf16.vlgmr.msra.gmra.mxu3 %v5691_v26  ;;  %v4165_v47 = vor.u32 %v5111_v8, %v4162_v9  ;;  %v4489_v9 = vor.u32 %v5196_v63, %v4488_v62 }
 0x105   :  { %2198 = vmatpush.bf16.msrb.mxu3 %v4373_v16  ;;  %v4293_v16 = vor.u32 %v5143_v11, %v4290_v12  ;;  %v4472_v11 = vld [vmem:[#allocation11 + $0xa0] sm:$0xf] }
 0x106   :  { %2157 = vmatpush.bf16.msrb.mxu0 %v3973_v20  ;;  %v5139_v20 = vld [vmem:[#allocation10 + $0x32c] sm:$0xf]  ;;  %v5749_v39 = vpop.f32.mrf.mxu2  ;;  %v5755_v3 = vpop.f32.mrf.mxu0 }
 0x107   :  { %2171 = vmatpush.bf16.msrb.mxu1 %v4101_v21  ;;  %v4274_v21 = vld [vmem:[#allocation10 + $0x338] sm:$0xf0] }
 0x108   :  { %2185 = vmatpush.bf16.msrb.mxu2 %v4229_v24  ;;  %v5746_v24 = vpop.f32.mrf.mxu1  ;;  %v4277_v52 = vor.u32 %v5139_v20, %v4274_v21 }
 0x109   :  { %2199 = vmatpush.bf16.msrb.mxu3 %v4357_v35  ;;  %v4021_v35 = vor.u32 %v5075_v57, %v4018_v5  ;;  %v5224_v57 = vld [vmem:[#allocation11 + $0x1ac] sm:$0xf0] }
 0x10a   :  { %2158 = vmatpush.bf16.msrb.mxu0 %v3957_v41  ;;  %v272_v41 = vunpack.c.h.bf16 %v5701_v29  ;;  %v4888_v29 = vld [vmem:[#allocation11 + $0x3e0] sm:$0xf]  ;;  %v5256_v5 = vld [vmem:[#allocation11 + $0x2ac] sm:$0xf0] }
 0x10b   :  { %2172 = vmatpush.bf16.msrb.mxu1 %v4085_v7  ;;  %v4130_v7 = vld [vmem:[#allocation10 + $0x218] sm:$0xf0] }
 0x10c   :  { %2186 = vmatpush.bf16.msrb.mxu2 %v4213_v42  ;;  %v5135_v42 = vld [vmem:[#allocation10 + $0x30c] sm:$0xf]  ;;  %v5753_v56 = vperm.slane %v272_v41, 0  ;;  %v5760_v33 = vperm.slane %v272_v41, 4  ;;  %v5284_v41 = vld [vmem:[#allocation11 + $0x38c] sm:$0xf0] }
 0x10d   :  { %2200 = vmatpush.bf16.msrb.mxu3 %v4341_v45  ;;  %v4632_v45 = vld [vmem:[#allocation11 + $0x1e0] sm:$0xf]  ;;  %v4261_v58 = vor.u32 %v5135_v42, %v4258_v23 }
 0x10e   :  { %2159 = vmatpush.bf16.msrb.mxu0 %v3941_v51  ;;  %v5751_v51 = vpop.f32.mrf.mxu3  ;;  %v4633_v27 = vor.u32 %v5232_v48, %v4632_v45  ;;  %v285_v8 = vperm.slane %v5753_v56, 0  ;;  %v5765_v20 = vpop.f32.mrf.mxu2  ;;  %v5184_v48 = vld [vmem:[#allocation11 + $0x6c] sm:$0xf0]  ;;  %v4808_v56 = vld [vmem:[#allocation11 + $0x340] sm:$0xf] }
 0x10f   :  { %2173 = vmatpush.bf16.msrb.mxu1 %v4069_v53  ;;  %v4005_v53 = vor.u32 %v5071_v37, %v4002_v38  ;;  %v4857_v37 = vor.u32 %v5288_v18, %v4856_v17  ;;  %v5220_v38 = vld [vmem:[#allocation11 + $0x18c] sm:$0xf0]  ;;  %v4536_v18 = vld [vmem:[#allocation11 + $0x120] sm:$0xf] }
 0x110   :  { %2187 = vmatpush.bf16.msrb.mxu2 %v4197_v54  ;;  %v4133_v54 = vor.u32 %v5103_v40, %v4130_v7  ;;  %v5757_v10 = vpop.f32.mrf.mxu1  ;;  %v1069_v21 = vadd.f32 %v5744_v19, %v285_v8  ;;  %v4712_v40 = vld [vmem:[#allocation11 + $0x280] sm:$0xf]  ;;  %v5252_v19 = vld [vmem:[#allocation11 + $0x28c] sm:$0xf0] }
 0x111   :  { %2201 = vmatpush.bf16.msrb.mxu3 %v4325_v60  ;;  %v4505_v60 = vor.u32 %v5200_v44, %v4504_v43  ;;  %v4713_v43 = vor.u32 %v5252_v19, %v4712_v40  ;;  %v5176_v17 = vld [vmem:[#allocation11 + $0x2c] sm:$0xf0] }
 0x112   :  { %2160 = vmatpush.bf16.msrb.mxu0 %v3925_v30  ;;  %v4889_v30 = vor.u32 %v5296_v55, %v4888_v29  ;;  %v5248_v29 = vld [vmem:[#allocation11 + $0x26c] sm:$0xf0] }
 0x113   :  { %2174 = vmatpush.bf16.msrb.mxu1 %v4053_v59  ;;  %v5228_v59 = vld [vmem:[#allocation11 + $0x1cc] sm:$0xf0] }
 0x114   :  { %2188 = vmatpush.bf16.msrb.mxu2 %v4181_v1  ;;  %v4744_v1 = vld [vmem:[#allocation11 + $0x2c0] sm:$0xf]  ;;  %v4617_v12 = vor.u32 %v5228_v59, %v4616_v0  ;;  %v5180_v59 = vld [vmem:[#allocation11 + $0x4c] sm:$0xf0] }
 0x115   :  { %2202 = vmatpush.bf16.msrb.mxu3 %v4309_v6  ;;  %v5292_v6 = vld [vmem:[#allocation11 + $0x3cc] sm:$0xf0] }
 0x116   :  { %2161 = vmatpush.bf16.msrb.mxu0 %v3909_v13  ;;  %v4745_v13 = vor.u32 %v5260_v2, %v4744_v1  ;;  %v4873_v15 = vor.u32 %v5292_v6, %v4872_v4  ;;  %v4552_v1 = vld [vmem:[#allocation11 + $0x140] sm:$0xf]  ;;  %v5204_v19 = vld [vmem:[#allocation11 + $0x10c] sm:$0xf0] }
 0x117   :  { %2175 = vmatpush.bf16.msrb.mxu1 %v4037_v14  ;;  %v5192_v14 = vld [vmem:[#allocation11 + $0xac] sm:$0xf0] }
 0x118   :  { %2189 = vmatpush.bf16.msrb.mxu2 %v4165_v47  ;;  %v4600_v47 = vld [vmem:[#allocation11 + $0x1a0] sm:$0xf] }
 0x119   :  { %2203 = vmatpush.bf16.msrb.mxu3 %v4293_v16  ;;  %v4728_v16 = vld [vmem:[#allocation11 + $0x2a0] sm:$0xf] }
 0x11a   :  { %2162 = vmatpush.bf16.msrb.mxu0 %v3893_v31  ;;  %v5771_v31 = vpop.f32.mrf.mxu3  ;;  %v4729_v34 = vor.u32 %v5256_v5, %v4728_v16 }
 0x11b   :  { %2176 = vmatpush.bf16.msrb.mxu1 %v4021_v35  ;;  %v4584_v35 = vld [vmem:[#allocation11 + $0x180] sm:$0xf] }
 0x11c   :  { %2190 = vmatpush.bf16.msrb.mxu2 %v4149_v36  ;;  %v286_v36 = vperm.slane %v5760_v33, 0  ;;  %v4585_v23 = vor.u32 %v5220_v38, %v4584_v35  ;;  %v4408_v33 = vld [vmem:[#allocation11 + $0x20] sm:$0xf] }
 0x11d   :  { %2204 = vmatpush.bf16.msrb.mxu3 %v4277_v52  ;;  %v4840_v52 = vld [vmem:[#allocation11 + $0x380] sm:$0xf]  ;;  %v4409_v40 = vor.u32 %v5176_v17, %v4408_v33 }
 0x11e   :  { %2163 = vmatpush.bf16.msrb.mxu0 %v3877_v46  ;;  %v1124_v42 = vpop.f32.mrf.mxu0  ;;  %v4440_v46 = vld [vmem:[#allocation11 + $0x60] sm:$0xf]  ;;  %v4841_v50 = vor.u32 %v5284_v41, %v4840_v52 }
 0x11f   :  { %2177 = vmatpush.bf16.msrb.mxu1 %v4005_v53  ;;  %v1125_v44 = vadd.f32 %v1124_v42, %v286_v36  ;;  %v1138_v45 = vpop.f32.mrf.mxu1  ;;  %v5216_v53 = vld [vmem:[#allocation11 + $0x16c] sm:$0xf0]  ;;  %v4392_v35 = vld [vmem:[#allocation11] sm:$0xf] }
 0x120   :  { %2191 = vmatpush.bf16.msrb.mxu2 %v4133_v54  ;;  %v4696_v54 = vld [vmem:[#allocation11 + $0x260] sm:$0xf]  ;;  %v4569_v62 = vor.u32 %v5216_v53, %v4568_v49  ;;  %v5236_v42 = vld [vmem:[#allocation11 + $0x20c] sm:$0xf0]  ;;  %v5230_v49 = vld [vmem:[#allocation11 + $0x1e4] sm:$0xf] }
 0x121   :  { %2205 = vmatpush.bf16.msrb.mxu3 %v4261_v58  ;;  %2164 = vmatmul.bf16.vlgmr.msrb.gmra.mxu0 %v5689_v25  ;;  %v4601_v25 = vor.u32 %v5224_v57, %v4600_v47  ;;  %v1139_v55 = vadd.f32 %v1138_v45, %v1125_v44  ;;  %v4824_v58 = vld [vmem:[#allocation11 + $0x360] sm:$0xf]  ;;  %v4697_v63 = vor.u32 %v5248_v29, %v4696_v54  ;;  %v5262_v53 = vld [vmem:[#allocation11 + $0x2e4] sm:$0xf] }
 0x122   :  { %3029 = vmatpush.bf16.msra.mxu0 %v4505_v60  ;;  %2178 = vmatmul.bf16.vlgmr.msrb.gmra.mxu1 %v5693_v28  ;;  %v1083_v28 = vadd.f32 %v5746_v24, %v1069_v21  ;;  %v5280_v24 = vld [vmem:[#allocation11 + $0x36c] sm:$0xf0] }
 0x123   :  { %3043 = vmatpush.bf16.msra.mxu1 %v4633_v27  ;;  %2192 = vmatmul.bf16.vlgmr.msrb.gmra.mxu2 %v5687_v22  ;;  %v4473_v22 = vor.u32 %v5192_v14, %v4472_v11  ;;  %v1071_v27 = vadd.f32 %v5755_v3, %v285_v8  ;;  %v4825_v2 = vor.u32 %v5280_v24, %v4824_v58  ;;  %v5244_v11 = vld [vmem:[#allocation11 + $0x24c] sm:$0xf0]  ;;  %v4762_v58 = vld [vmem:[#allocation11 + $0x2f0] sm:$0xf0]  ;;  %v5294_v24 = vld [vmem:[#allocation11 + $0x3e4] sm:$0xf] }
 0x124   :  { %3057 = vmatpush.bf16.msra.mxu2 %v4761_v61  ;;  %2206 = vmatmul.bf16.vlgmr.msrb.gmra.mxu3 %v5691_v26  ;;  %v5188_v26 = vld [vmem:[#allocation11 + $0x8c] sm:$0xf0]  ;;  %v1097_v60 = vadd.f32 %v5749_v39, %v1083_v28  ;;  %v4441_v61 = vor.u32 %v5184_v48, %v4440_v46  ;;  %v4680_v39 = vld [vmem:[#allocation11 + $0x240] sm:$0xf]  ;;  %v5198_v48 = vld [vmem:[#allocation11 + $0xe4] sm:$0xf] }
 0x125   :  { %3071 = vmatpush.bf16.msra.mxu3 %v4889_v30  ;;  %v4457_v7 = vor.u32 %v5188_v26, %v4456_v32  ;;  %v4424_v30 = vld [vmem:[#allocation11 + $0x40] sm:$0xf]  ;;  %v1085_v8 = vadd.f32 %v5757_v10, %v1071_v27  ;;  %v4681_v57 = vor.u32 %v5244_v11, %v4680_v39  ;;  %v5208_v21 = vld [vmem:[#allocation11 + $0x12c] sm:$0xf0]  ;;  %v4386_v39 = vld [vmem:[#allocation7 + $0x18] sm:$0xf0] }
 0x126   :  { %3030 = vmatpush.bf16.msra.mxu0 %v4489_v9  ;;  %v1152_v0 = vpop.f32.mrf.mxu2  ;;  %v5212_v9 = vld [vmem:[#allocation11 + $0x14c] sm:$0xf0]  ;;  %v1111_v3 = vadd.f32 %v5751_v51, %v1097_v60  ;;  %v4425_v14 = vor.u32 %v5180_v59, %v4424_v30  ;;  %v1126_v47 = vpop.f32.mrf.mxu0  ;;  %v4664_v51 = vld [vmem:[#allocation11 + $0x220] sm:$0xf]  ;;  %v4537_v52 = vor.u32 %v5208_v21, %v4536_v18  ;;  %v4890_v60 = vld [vmem:[#allocation11 + $0x3f0] sm:$0xf0] }
 0x127   :  { %3044 = vmatpush.bf16.msra.mxu1 %v4617_v12  ;;  %v1153_v4 = vadd.f32 %v1152_v0, %v1139_v55  ;;  %v1166_v6 = vpop.f32.mrf.mxu3  ;;  %v5276_v12 = vld [vmem:[#allocation11 + $0x34c] sm:$0xf0]  ;;  %v1127_v16 = vadd.f32 %v1126_v47, %v286_v36  ;;  %v1140_v5 = vpop.f32.mrf.mxu1  ;;  %v4792_v10 = vld [vmem:[#allocation11 + $0x320] sm:$0xf]  ;;  %v1099_v38 = vadd.f32 %v5765_v20, %v1085_v8  ;;  %v4506_v20 = vld [vmem:[#allocation11 + $0xf0] sm:$0xf0] }
 0x128   :  { %3058 = vmatpush.bf16.msra.mxu2 %v4745_v13  ;;  %v4809_v32 = vor.u32 %v5276_v12, %v4808_v56  ;;  %v5272_v26 = vld [vmem:[#allocation11 + $0x32c] sm:$0xf0]  ;;  %v4520_v36 = vld [vmem:[#allocation11 + $0x100] sm:$0xf]  ;;  %v4384_v0 = vld [vmem:[#allocation7 + $0x8] sm:$0xf]  ;;  %v4765_v56 = vor.u32 %v5262_v53, %v4762_v58 }
 0x129   :  { %3072 = vmatpush.bf16.msra.mxu3 %v4873_v15  ;;  %v1167_v13 = vadd.f32 %v1166_v6, %v1153_v4  ;;  %v4553_v15 = vor.u32 %v5212_v9, %v4552_v1  ;;  %v5268_v46 = vld [vmem:[#allocation11 + $0x30c] sm:$0xf0]  ;;  %v1113_v54 = vadd.f32 %v5771_v31, %v1099_v38  ;;  %v4521_v27 = vor.u32 %v5204_v19, %v4520_v36  ;;  %v5169_v30 = vld [vmem:[#allocation7 + $0x14] sm:$0xf0]  ;;  %v4376_v59 = vld [vmem:[#allocation7] sm:$0xf] }
 0x12a   :  { %3031 = vmatpush.bf16.msra.mxu0 %v4473_v22  ;;  %v4509_v4 = vor.u32 %v5198_v48, %v4506_v20  ;;  %v5226_v31 = vld [vmem:[#allocation11 + $0x1c4] sm:$0xf]  ;;  %v5168_v6 = vld [vmem:[#allocation7 + $0xc] sm:$0xf0]  ;;  %v5167_v9 = vld [vmem:[#allocation7 + $0xc] sm:$0xf]  ;;  %v5783_v33 = vor.u32 %v5169_v30, %v4384_v0 }
 0x12b   :  { %3045 = vmatpush.bf16.msra.mxu1 %v4601_v25  ;;  %v1172_v22 = vpack.c.bf16 %v1167_v13, %v1111_v3  ;;  %v5240_v25 = vld [vmem:[#allocation11 + $0x22c] sm:$0xf0]  ;;  %v4618_v12 = vld [vmem:[#allocation11 + $0x1d0] sm:$0xf0]  ;;  %v5166_v3 = vld [vmem:[#allocation7 + $0x4] sm:$0xf]  ;;  %v4893_v13 = vor.u32 %v5294_v24, %v4890_v60 }
 0x12c   :  { %3059 = vmatpush.bf16.msra.mxu2 %v4729_v34  ;;  %v1141_v34 = vadd.f32 %v1140_v5, %v1127_v16  ;;  %v4665_v41 = vor.u32 %v5240_v25, %v4664_v51  ;;  %v4378_v8 = vld [vmem:[#allocation7 + $0x10] sm:$0xf0]  ;;  %v5785_v16 = vor.u32 %v5168_v6, %v4376_v59  ;;  %v5787_v5 = vor.u32 %v5167_v9, %v4386_v39  ;;  %v5222_v25 = vld [vmem:[#allocation11 + $0x1a4] sm:$0xf] }
 0x12d   :  { %3073 = vmatpush.bf16.msra.mxu3 %v4857_v37  ;;  %v5172_v37 = vld [vmem:[#allocation11 + $0xc] sm:$0xf0]  ;;  %1176 = vst [vmem:[#allocation14 + $0x8] sm:$0xff] %v1172_v22  ;;  %v4746_v47 = vld [vmem:[#allocation11 + $0x2d0] sm:$0xf0]  ;;  %v5789_v18 = vor.u32 %v5166_v3, %v4378_v8  ;;  %v4621_v21 = vor.u32 %v5226_v31, %v4618_v12 }
 0x12e   :  { %3032 = vmatpush.bf16.msra.mxu0 %v4457_v7  ;;  %v1154_v28 = vpop.f32.mrf.mxu2  ;;  %v4648_v7 = vld [vmem:[#allocation11 + $0x200] sm:$0xf]  ;;  %v4393_v55 = vor.u32 %v5172_v37, %v4392_v35  ;;  %v4474_v51 = vld [vmem:[#allocation11 + $0xb0] sm:$0xf0]  ;;  %v5286_v37 = vld [vmem:[#allocation11 + $0x3a4] sm:$0xf] }
 0x12f   :  { %3046 = vmatpush.bf16.msra.mxu1 %v4585_v23  ;;  %v4776_v23 = vld [vmem:[#allocation11 + $0x300] sm:$0xf]  ;;  %v1155_v44 = vadd.f32 %v1154_v28, %v1141_v34  ;;  %v1168_v45 = vpop.f32.mrf.mxu3  ;;  %v4602_v34 = vld [vmem:[#allocation11 + $0x1b0] sm:$0xf0]  ;;  %v5218_v28 = vld [vmem:[#allocation11 + $0x184] sm:$0xf] }
 0x130   :  { %3060 = vmatpush.bf16.msra.mxu2 %v4713_v43  ;;  %v4793_v43 = vor.u32 %v5272_v26, %v4792_v10  ;;  %v5254_v26 = vld [vmem:[#allocation11 + $0x2a4] sm:$0xf]  ;;  %v4730_v35 = vld [vmem:[#allocation11 + $0x2b0] sm:$0xf0]  ;;  %v4605_v36 = vor.u32 %v5222_v25, %v4602_v34 }
 0x131   :  { %3074 = vmatpush.bf16.msra.mxu3 %v4841_v50  ;;  %v4634_v50 = vld [vmem:[#allocation11 + $0x1f0] sm:$0xf0]  ;;  %v1169_v29 = vadd.f32 %v1168_v45, %v1155_v44  ;;  %v4733_v19 = vor.u32 %v5254_v26, %v4730_v35  ;;  %v5282_v44 = vld [vmem:[#allocation11 + $0x384] sm:$0xf] }
 0x132   :  { %3033 = vmatpush.bf16.msra.mxu0 %v4441_v61  ;;  %v4649_v61 = vor.u32 %v5236_v42, %v4648_v7  ;;  %v4637_v11 = vor.u32 %v5230_v49, %v4634_v50  ;;  %v4858_v38 = vld [vmem:[#allocation11 + $0x3b0] sm:$0xf0]  ;;  %v5182_v49 = vld [vmem:[#allocation11 + $0x64] sm:$0xf] }
 0x133   :  { %3047 = vmatpush.bf16.msra.mxu1 %v4569_v62  ;;  %v5194_v62 = vld [vmem:[#allocation11 + $0xc4] sm:$0xf]  ;;  %v1174_v1 = vpack.c.bf16 %v1169_v29, %v1113_v54  ;;  %v4861_v7 = vor.u32 %v5286_v37, %v4858_v38  ;;  %v4586_v42 = vld [vmem:[#allocation11 + $0x190] sm:$0xf0] }
 0x134   :  { %3061 = vmatpush.bf16.msra.mxu2 %v4697_v63  ;;  %v4490_v63 = vld [vmem:[#allocation11 + $0xd0] sm:$0xf0]  ;;  %v4589_v48 = vor.u32 %v5218_v28, %v4586_v42  ;;  %v5214_v53 = vld [vmem:[#allocation11 + $0x164] sm:$0xf]  ;;  %v5201_v28 = vld [vmem:[#allocation11 + $0xf4] sm:$0xf0] }
 0x135   :  { %3075 = vmatpush.bf16.msra.mxu3 %v4825_v2  ;;  %v4777_v2 = vor.u32 %v5268_v46, %v4776_v23  ;;  %1178 = vst [vmem:[#allocation14 + $0x18] sm:$0xff] %v1174_v1  ;;  %v4493_v17 = vor.u32 %v5194_v62, %v4490_v63  ;;  %v5250_v23 = vld [vmem:[#allocation11 + $0x284] sm:$0xf]  ;;  %v4842_v45 = vld [vmem:[#allocation11 + $0x390] sm:$0xf0] }
 0x136   :  { %3034 = vmatpush.bf16.msra.mxu0 %v4425_v14  ;;  %v5258_v14 = vld [vmem:[#allocation11 + $0x2c4] sm:$0xf]  ;;  %v4442_v50 = vld [vmem:[#allocation11 + $0x70] sm:$0xf0]  ;;  %v4845_v54 = vor.u32 %v5282_v44, %v4842_v45  ;;  %v4768_v44 = vld [vmem:[#allocation11 + $0x2e8] sm:$0xf] }
 0x137   :  { %3048 = vmatpush.bf16.msra.mxu1 %v4553_v15  ;;  %v5290_v15 = vld [vmem:[#allocation11 + $0x3c4] sm:$0xf]  ;;  %v4749_v22 = vor.u32 %v5258_v14, %v4746_v47  ;;  %v4570_v29 = vld [vmem:[#allocation11 + $0x170] sm:$0xf0]  ;;  %v5265_v45 = vld [vmem:[#allocation11 + $0x2f4] sm:$0xf0] }
 0x138   :  { %3062 = vmatpush.bf16.msra.mxu2 %v4681_v57  ;;  %v4874_v57 = vld [vmem:[#allocation11 + $0x3d0] sm:$0xf0]  ;;  %v5278_v24 = vld [vmem:[#allocation11 + $0x364] sm:$0xf]  ;;  %3273 = dma.vmem_to_hbm [thread:$0]  %s3266_s24, 512, %s3268_s3, [#allocation4], %s5563_s17, %s5563_s17, %s5564_s18  }
 0x139   :  { %3076 = vmatpush.bf16.msra.mxu3 %v4809_v32  ;;  %v5190_v32 = vld [vmem:[#allocation11 + $0xa4] sm:$0xf]  ;;  %v4877_v10 = vor.u32 %v5290_v15, %v4874_v57  ;;  %v4698_v58 = vld [vmem:[#allocation11 + $0x270] sm:$0xf0] }
 0x13a   :  { %3035 = vmatpush.bf16.msra.mxu0 %v4409_v40  ;;  %v4477_v40 = vor.u32 %v5190_v32, %v4474_v51  ;;  %v4826_v60 = vld [vmem:[#allocation11 + $0x370] sm:$0xf0]  ;;  %v5178_v63 = vld [vmem:[#allocation11 + $0x44] sm:$0xf] }
 0x13b   :  { %3049 = vmatpush.bf16.msra.mxu1 %v4537_v52  ;;  %v5186_v52 = vld [vmem:[#allocation11 + $0x84] sm:$0xf]  ;;  %v4426_v0 = vld [vmem:[#allocation11 + $0x50] sm:$0xf0]  ;;  %v4829_v59 = vor.u32 %v5278_v24, %v4826_v60  ;;  %v4496_v24 = vld [vmem:[#allocation11 + $0xc8] sm:$0xf] }
 0x13c   :  { %3063 = vmatpush.bf16.msra.mxu2 %v4665_v41  ;;  %v4458_v41 = vld [vmem:[#allocation11 + $0x90] sm:$0xf0]  ;;  %v5210_v30 = vld [vmem:[#allocation11 + $0x144] sm:$0xf]  ;;  %v4429_v9 = vor.u32 %v5178_v63, %v4426_v0  ;;  %v5197_v60 = vld [vmem:[#allocation11 + $0xd4] sm:$0xf0] }
 0x13d   :  { %3077 = vmatpush.bf16.msra.mxu3 %v4793_v43  ;;  %v4714_v43 = vld [vmem:[#allocation11 + $0x290] sm:$0xf0]  ;;  %v4461_v46 = vor.u32 %v5186_v52, %v4458_v41  ;;  %v5274_v31 = vld [vmem:[#allocation11 + $0x344] sm:$0xf]  ;;  %v4512_v41 = vld [vmem:[#allocation11 + $0xe8] sm:$0xf] }
 0x13e   :  { %3036 = vmatpush.bf16.msra.mxu0 %v4393_v55  ;;  %v4717_v20 = vor.u32 %v5250_v23, %v4714_v43  ;;  %v5246_v55 = vld [vmem:[#allocation11 + $0x264] sm:$0xf]  ;;  %v4554_v1 = vld [vmem:[#allocation11 + $0x150] sm:$0xf0]  ;;  %v5795_v15 = vpop.f32.mrf.mxu0  ;;  %v5233_v43 = vld [vmem:[#allocation11 + $0x1f4] sm:$0xf0] }
 0x13f   :  { %3050 = vmatpush.bf16.msra.mxu1 %v4521_v27  ;;  %v4445_v27 = vor.u32 %v5182_v49, %v4442_v50  ;;  %v4701_v62 = vor.u32 %v5246_v55, %v4698_v58  ;;  %v4810_v6 = vld [vmem:[#allocation11 + $0x350] sm:$0xf0]  ;;  %v4557_v39 = vor.u32 %v5210_v30, %v4554_v1  ;;  %v5206_v3 = vld [vmem:[#allocation11 + $0x124] sm:$0xf]  ;;  %v4896_v49 = vld [vmem:[#allocation11 + $0x3e8] sm:$0xf]  ;;  %v4769_v58 = vor.u32 %v5265_v45, %v4768_v44 }
 0x140   :  { %3064 = vmatpush.bf16.msra.mxu2 %v4649_v61  ;;  %v4573_v61 = vor.u32 %v5214_v53, %v4570_v29  ;;  %v4410_v12 = vld [vmem:[#allocation11 + $0x30] sm:$0xf0]  ;;  %v4813_v8 = vor.u32 %v5274_v31, %v4810_v6  ;;  %v5238_v14 = vld [vmem:[#allocation11 + $0x224] sm:$0xf]  ;;  %v5297_v50 = vld [vmem:[#allocation11 + $0x3f4] sm:$0xf0]  ;;  %v4513_v29 = vor.u32 %v5201_v28, %v4512_v41  ;;  %v4497_v31 = vor.u32 %v5197_v60, %v4496_v24 }
 0x141   :  { %3078 = vmatpush.bf16.msra.mxu3 %v4777_v2  ;;  %3037 = vmatmul.bf16.vlgmr.msra.gmra.mxu0 %v5785_v16  ;;  %v5242_v2 = vld [vmem:[#allocation11 + $0x244] sm:$0xf]  ;;  %v4666_v47 = vld [vmem:[#allocation11 + $0x230] sm:$0xf0]  ;;  %v4752_v63 = vld [vmem:[#allocation11 + $0x2c8] sm:$0xf] }
 0x142   :  { %3085 = vmatpush.bf16.msrb.mxu0 %v4509_v4  ;;  %3051 = vmatmul.bf16.vlgmr.msra.gmra.mxu1 %v5789_v18  ;;  %v4682_v4 = vld [vmem:[#allocation11 + $0x250] sm:$0xf0]  ;;  %v5270_v57 = vld [vmem:[#allocation11 + $0x324] sm:$0xf]  ;;  %v4669_v34 = vor.u32 %v5238_v14, %v4666_v47  ;;  %v5261_v0 = vld [vmem:[#allocation11 + $0x2d4] sm:$0xf0] }
 0x143   :  { %3099 = vmatpush.bf16.msrb.mxu1 %v4637_v11  ;;  %3065 = vmatmul.bf16.vlgmr.msra.gmra.mxu2 %v5783_v33  ;;  %v4685_v11 = vor.u32 %v5242_v2, %v4682_v4  ;;  %v5170_v51 = vld [vmem:[#allocation11 + $0x4] sm:$0xf]  ;;  %v4394_v25 = vld [vmem:[#allocation11 + $0x10] sm:$0xf0]  ;;  %v5293_v1 = vld [vmem:[#allocation11 + $0x3d4] sm:$0xf0] }
 0x144   :  { %3113 = vmatpush.bf16.msrb.mxu2 %v4765_v56  ;;  %3079 = vmatmul.bf16.vlgmr.msra.gmra.mxu3 %v5787_v5  ;;  %v5174_v56 = vld [vmem:[#allocation11 + $0x24] sm:$0xf]  ;;  %v4522_v35 = vld [vmem:[#allocation11 + $0x110] sm:$0xf0]  ;;  %v4397_v23 = vor.u32 %v5170_v51, %v4394_v25  ;;  %v4480_v6 = vld [vmem:[#allocation11 + $0xa8] sm:$0xf] }
 0x145   :  { %3127 = vmatpush.bf16.msrb.mxu3 %v4893_v13  ;;  %v4538_v13 = vld [vmem:[#allocation11 + $0x130] sm:$0xf0]  ;;  %v4413_v32 = vor.u32 %v5174_v56, %v4410_v12  ;;  %v5202_v26 = vld [vmem:[#allocation11 + $0x104] sm:$0xf]  ;;  %v4608_v56 = vld [vmem:[#allocation11 + $0x1a8] sm:$0xf] }
 0x146   :  { %3086 = vmatpush.bf16.msrb.mxu0 %v4493_v17  ;;  %v4794_v17 = vld [vmem:[#allocation11 + $0x330] sm:$0xf0]  ;;  %v5234_v37 = vld [vmem:[#allocation11 + $0x204] sm:$0xf]  ;;  %v5802_v42 = vpop.f32.mrf.mxu2  ;;  %v5808_v30 = vpop.f32.mrf.mxu0  ;;  %v5257_v14 = vld [vmem:[#allocation11 + $0x2b4] sm:$0xf0] }
 0x147   :  { %3100 = vmatpush.bf16.msrb.mxu1 %v4621_v21  ;;  %v5797_v21 = vld [vmem:[#allocation13] sm:$0x55]  ;;  %v4797_v38 = vor.u32 %v5270_v57, %v4794_v17  ;;  %v4778_v52 = vld [vmem:[#allocation11 + $0x310] sm:$0xf0]  ;;  %v4864_v47 = vld [vmem:[#allocation11 + $0x3a8] sm:$0xf] }
 0x148   :  { %3114 = vmatpush.bf16.msrb.mxu2 %v4749_v22  ;;  %v5799_v22 = vpop.f32.mrf.mxu1  ;;  %v5289_v57 = vld [vmem:[#allocation11 + $0x3b4] sm:$0xf0]  ;;  %v4832_v60 = vld [vmem:[#allocation11 + $0x368] sm:$0xf] }
 0x149   :  { %3128 = vmatpush.bf16.msrb.mxu3 %v4877_v10  ;;  %v4541_v10 = vor.u32 %v5206_v3, %v4538_v13  ;;  %v4736_v13 = vld [vmem:[#allocation11 + $0x2a8] sm:$0xf]  ;;  %v5285_v41 = vld [vmem:[#allocation11 + $0x394] sm:$0xf0] }
 0x14a   :  { %3087 = vmatpush.bf16.msrb.mxu0 %v4477_v40  ;;  %v1312_v40 = vunpack.c.l.bf16 %v5797_v21 }
 0x14b   :  { %3101 = vmatpush.bf16.msrb.mxu1 %v4605_v36  ;;  %v4650_v36 = vld [vmem:[#allocation11 + $0x210] sm:$0xf0] }
 0x14c   :  { %3115 = vmatpush.bf16.msrb.mxu2 %v4733_v19  ;;  %v5266_v19 = vld [vmem:[#allocation11 + $0x304] sm:$0xf]  ;;  %v5806_v53 = vperm.slane %v1312_v40, 1  ;;  %v5813_v12 = vperm.slane %v1312_v40, 5  ;;  %v4865_v40 = vor.u32 %v5289_v57, %v4864_v47 }
 0x14d   :  { %3129 = vmatpush.bf16.msrb.mxu3 %v4861_v7  ;;  %v4640_v7 = vld [vmem:[#allocation11 + $0x1e8] sm:$0xf] }
 0x14e   :  { %3088 = vmatpush.bf16.msrb.mxu0 %v4461_v46  ;;  %v5804_v46 = vpop.f32.mrf.mxu3  ;;  %v4641_v55 = vor.u32 %v5233_v43, %v4640_v7  ;;  %v1324_v4 = vperm.slane %v5806_v53, 1  ;;  %v5818_v17 = vpop.f32.mrf.mxu2  ;;  %v4816_v53 = vld [vmem:[#allocation11 + $0x348] sm:$0xf] }
 0x14f   :  { %3102 = vmatpush.bf16.msrb.mxu1 %v4589_v48  ;;  %v4525_v48 = vor.u32 %v5202_v26, %v4522_v35  ;;  %v4737_v26 = vor.u32 %v5257_v14, %v4736_v13  ;;  %v5189_v35 = vld [vmem:[#allocation11 + $0x94] sm:$0xf0] }
 0x150   :  { %3116 = vmatpush.bf16.msrb.mxu2 %v4717_v20  ;;  %v4653_v20 = vor.u32 %v5234_v37, %v4650_v36  ;;  %v5810_v2 = vpop.f32.mrf.mxu1  ;;  %v4592_v37 = vld [vmem:[#allocation11 + $0x188] sm:$0xf]  ;;  %v5221_v36 = vld [vmem:[#allocation11 + $0x194] sm:$0xf0] }
 0x151   :  { %3130 = vmatpush.bf16.msrb.mxu3 %v4845_v54  ;;  %v4781_v54 = vor.u32 %v5266_v19, %v4778_v52  ;;  %v4720_v19 = vld [vmem:[#allocation11 + $0x288] sm:$0xf]  ;;  %v4593_v43 = vor.u32 %v5221_v36, %v4592_v37  ;;  %v5241_v36 = vld [vmem:[#allocation11 + $0x234] sm:$0xf0] }
 0x152   :  { %3089 = vmatpush.bf16.msrb.mxu0 %v4445_v27  ;;  %v4624_v27 = vld [vmem:[#allocation11 + $0x1c8] sm:$0xf] }
 0x153   :  { %3103 = vmatpush.bf16.msrb.mxu1 %v4573_v61  ;;  %v4897_v61 = vor.u32 %v5297_v50, %v4896_v49  ;;  %v4848_v52 = vld [vmem:[#allocation11 + $0x388] sm:$0xf]  ;;  %v5185_v49 = vld [vmem:[#allocation11 + $0x74] sm:$0xf0] }
 0x154   :  { %3117 = vmatpush.bf16.msrb.mxu2 %v4701_v62  ;;  %v5229_v62 = vld [vmem:[#allocation11 + $0x1d4] sm:$0xf0]  ;;  %v4576_v50 = vld [vmem:[#allocation11 + $0x168] sm:$0xf] }
 0x155   :  { %3131 = vmatpush.bf16.msrb.mxu3 %v4829_v59  ;;  %v4880_v59 = vld [vmem:[#allocation11 + $0x3c8] sm:$0xf] }
 0x156   :  { %3090 = vmatpush.bf16.msrb.mxu0 %v4429_v9  ;;  %v4625_v9 = vor.u32 %v5229_v62, %v4624_v27  ;;  %v4881_v3 = vor.u32 %v5293_v1, %v4880_v59  ;;  %v5824_v25 = vpop.f32.mrf.mxu3  ;;  %v4432_v1 = vld [vmem:[#allocation11 + $0x48] sm:$0xf] }
 0x157   :  { %3104 = vmatpush.bf16.msrb.mxu1 %v4557_v39  ;;  %v4753_v39 = vor.u32 %v5261_v0, %v4752_v63 }
 0x158   :  { %3118 = vmatpush.bf16.msrb.mxu2 %v4685_v11  ;;  %v5193_v11 = vld [vmem:[#allocation11 + $0xb4] sm:$0xf0] }
 0x159   :  { %3132 = vmatpush.bf16.msrb.mxu3 %v4813_v8  ;;  %v5225_v8 = vld [vmem:[#allocation11 + $0x1b4] sm:$0xf0]  ;;  %v4481_v51 = vor.u32 %v5193_v11, %v4480_v6  ;;  %v4560_v6 = vld [vmem:[#allocation11 + $0x148] sm:$0xf] }
 0x15a   :  { %3091 = vmatpush.bf16.msrb.mxu0 %v4413_v32  ;;  %v1998_v32 = vadd.f32 %v5795_v15, %v1324_v4  ;;  %v5253_v15 = vld [vmem:[#allocation11 + $0x294] sm:$0xf0] }
 0x15b   :  { %3105 = vmatpush.bf16.msrb.mxu1 %v4541_v10  ;;  %v4464_v10 = vld [vmem:[#allocation11 + $0x88] sm:$0xf]  ;;  %v4721_v44 = vor.u32 %v5253_v15, %v4720_v19  ;;  %v5273_v15 = vld [vmem:[#allocation11 + $0x334] sm:$0xf0] }
 0x15c   :  { %3119 = vmatpush.bf16.msrb.mxu2 %v4669_v34  ;;  %v4609_v34 = vor.u32 %v5225_v8, %v4608_v56  ;;  %v2012_v28 = vadd.f32 %v5799_v22, %v1998_v32  ;;  %v4465_v7 = vor.u32 %v5189_v35, %v4464_v10  ;;  %v5281_v22 = vld [vmem:[#allocation11 + $0x374] sm:$0xf0]  ;;  %v4416_v10 = vld [vmem:[#allocation11 + $0x28] sm:$0xf] }
 0x15d   :  { %3133 = vmatpush.bf16.msrb.mxu3 %v4797_v38  ;;  %v1325_v38 = vperm.slane %v5813_v12, 1  ;;  %v5213_v56 = vld [vmem:[#allocation11 + $0x154] sm:$0xf0]  ;;  %v4800_v19 = vld [vmem:[#allocation11 + $0x328] sm:$0xf] }
 0x15e   :  { %3092 = vmatpush.bf16.msrb.mxu0 %v4397_v23  ;;  %v2053_v23 = vpop.f32.mrf.mxu0  ;;  %v2026_v27 = vadd.f32 %v5802_v42, %v2012_v28  ;;  %v4688_v42 = vld [vmem:[#allocation11 + $0x248] sm:$0xf]  ;;  %v5245_v12 = vld [vmem:[#allocation11 + $0x254] sm:$0xf0]  ;;  %v4561_v47 = vor.u32 %v5213_v56, %v4560_v6 }
 0x15f   :  { %3106 = vmatpush.bf16.msrb.mxu1 %v4525_v48  ;;  %v2054_v45 = vadd.f32 %v2053_v23, %v1325_v38  ;;  %v2067_v48 = vpop.f32.mrf.mxu1  ;;  %v4689_v57 = vor.u32 %v5245_v12, %v4688_v42  ;;  %v4400_v28 = vld [vmem:[#allocation11 + $0x8] sm:$0xf]  ;;  %v5227_v12 = vld [vmem:[#allocation11 + $0x1cc] sm:$0xf] }
 0x160   :  { %3120 = vmatpush.bf16.msrb.mxu2 %v4653_v20  ;;  %v4448_v20 = vld [vmem:[#allocation11 + $0x68] sm:$0xf] }
 0x161   :  { %3134 = vmatpush.bf16.msrb.mxu3 %v4781_v54  ;;  %3093 = vmatmul.bf16.vlgmr.msrb.gmra.mxu0 %v5785_v16  ;;  %v4849_v54 = vor.u32 %v5285_v41, %v4848_v52  ;;  %v2068_v24 = vadd.f32 %v2067_v48, %v2054_v45  ;;  %v4449_v62 = vor.u32 %v5185_v49, %v4448_v20  ;;  %v5205_v45 = vld [vmem:[#allocation11 + $0x114] sm:$0xf0]  ;;  %v4656_v48 = vld [vmem:[#allocation11 + $0x208] sm:$0xf] }
 0x162   :  { %3141 = vmatpush.bf16.msra.mxu0 %v4513_v29  ;;  %3107 = vmatmul.bf16.vlgmr.msrb.gmra.mxu1 %v5789_v18  ;;  %v5217_v29 = vld [vmem:[#allocation11 + $0x174] sm:$0xf0]  ;;  %v4801_v20 = vor.u32 %v5273_v15, %v4800_v19  ;;  %v5187_v15 = vld [vmem:[#allocation11 + $0x8c] sm:$0xf] }
 0x163   :  { %3155 = vmatpush.bf16.msra.mxu1 %v4641_v55  ;;  %3121 = vmatmul.bf16.vlgmr.msrb.gmra.mxu2 %v5783_v33  ;;  %v4704_v55 = vld [vmem:[#allocation11 + $0x268] sm:$0xf]  ;;  %v4577_v63 = vor.u32 %v5217_v29, %v4576_v50 }
 0x164   :  { %3169 = vmatpush.bf16.msra.mxu2 %v4769_v58  ;;  %3135 = vmatmul.bf16.vlgmr.msrb.gmra.mxu3 %v5787_v5  ;;  %v5249_v58 = vld [vmem:[#allocation11 + $0x274] sm:$0xf0]  ;;  %v4784_v29 = vld [vmem:[#allocation11 + $0x308] sm:$0xf] }
 0x165   :  { %3183 = vmatpush.bf16.msra.mxu3 %v4897_v61  ;;  %v2000_v61 = vadd.f32 %v5808_v30, %v1324_v4  ;;  %v4705_v0 = vor.u32 %v5249_v58, %v4704_v55  ;;  %v2040_v30 = vadd.f32 %v5804_v46, %v2026_v27  ;;  %v4672_v46 = vld [vmem:[#allocation11 + $0x228] sm:$0xf]  ;;  %v5199_v55 = vld [vmem:[#allocation11 + $0xec] sm:$0xf]  ;;  %v4514_v58 = vld [vmem:[#allocation11 + $0xf8] sm:$0xf0] }
 0x166   :  { %3142 = vmatpush.bf16.msra.mxu0 %v4497_v31  ;;  %v2081_v59 = vpop.f32.mrf.mxu2  ;;  %v5181_v31 = vld [vmem:[#allocation11 + $0x54] sm:$0xf0]  ;;  %v2055_v14 = vpop.f32.mrf.mxu0  ;;  %v4673_v23 = vor.u32 %v5241_v36, %v4672_v46  ;;  %v4866_v46 = vld [vmem:[#allocation11 + $0x3b8] sm:$0xf0] }
 0x167   :  { %3156 = vmatpush.bf16.msra.mxu1 %v4625_v9  ;;  %v4833_v9 = vor.u32 %v5281_v22, %v4832_v60  ;;  %v2095_v11 = vpop.f32.mrf.mxu3  ;;  %v2014_v4 = vadd.f32 %v5810_v2, %v2000_v61  ;;  %v4433_v13 = vor.u32 %v5181_v31, %v4432_v1  ;;  %v2056_v32 = vadd.f32 %v2055_v14, %v1325_v38  ;;  %v5173_v38 = vld [vmem:[#allocation11 + $0x14] sm:$0xf0]  ;;  %v4642_v61 = vld [vmem:[#allocation11 + $0x1f8] sm:$0xf0]  ;;  %v5295_v1 = vld [vmem:[#allocation11 + $0x3ec] sm:$0xf] }
 0x168   :  { %3170 = vmatpush.bf16.msra.mxu2 %v4753_v39  ;;  %v2082_v39 = vadd.f32 %v2081_v59, %v2068_v24  ;;  %v5231_v24 = vld [vmem:[#allocation11 + $0x1ec] sm:$0xf]  ;;  %v4401_v27 = vor.u32 %v5173_v38, %v4400_v28  ;;  %v4898_v31 = vld [vmem:[#allocation11 + $0x3f8] sm:$0xf0] }
 0x169   :  { %3184 = vmatpush.bf16.msra.mxu3 %v4881_v3  ;;  %v5277_v3 = vld [vmem:[#allocation11 + $0x354] sm:$0xf0]  ;;  %v2028_v52 = vadd.f32 %v5818_v17, %v2014_v4  ;;  %v4645_v56 = vor.u32 %v5231_v24, %v4642_v61  ;;  %v4754_v4 = vld [vmem:[#allocation11 + $0x2d8] sm:$0xf0]  ;;  %v5279_v24 = vld [vmem:[#allocation11 + $0x36c] sm:$0xf] }
 0x16a   :  { %3143 = vmatpush.bf16.msra.mxu0 %v4481_v51  ;;  %v2096_v8 = vadd.f32 %v2095_v11, %v2082_v39  ;;  %v2069_v51 = vpop.f32.mrf.mxu1  ;;  %v4817_v37 = vor.u32 %v5277_v3, %v4816_v53  ;;  %v5269_v17 = vld [vmem:[#allocation11 + $0x314] sm:$0xf0]  ;;  %v4517_v39 = vor.u32 %v5199_v55, %v4514_v58  ;;  %v5195_v11 = vld [vmem:[#allocation11 + $0xcc] sm:$0xf]  ;;  %v4626_v53 = vld [vmem:[#allocation11 + $0x1d8] sm:$0xf0]  ;;  %v4901_v3 = vor.u32 %v5295_v1, %v4898_v31 }
 0x16b   :  { %3157 = vmatpush.bf16.msra.mxu1 %v4609_v34  ;;  %v5177_v34 = vld [vmem:[#allocation11 + $0x34] sm:$0xf0]  ;;  %v2070_v2 = vadd.f32 %v2069_v51, %v2056_v32  ;;  %v2042_v60 = vadd.f32 %v5824_v25, %v2028_v52  ;;  %v4498_v25 = vld [vmem:[#allocation11 + $0xd8] sm:$0xf0]  ;;  %v5191_v32 = vld [vmem:[#allocation11 + $0xac] sm:$0xf] }
 0x16c   :  { %3171 = vmatpush.bf16.msra.mxu2 %v4737_v26  ;;  %v4544_v26 = vld [vmem:[#allocation11 + $0x128] sm:$0xf]  ;;  %v2212_v35 = vpack.c.bf16 %v2096_v8, %v2040_v30  ;;  %v4417_v41 = vor.u32 %v5177_v34, %v4416_v10  ;;  %v5259_v30 = vld [vmem:[#allocation11 + $0x2cc] sm:$0xf]  ;;  %v4501_v14 = vor.u32 %v5195_v11, %v4498_v25  ;;  %v4482_v51 = vld [vmem:[#allocation11 + $0xb8] sm:$0xf0] }
 0x16d   :  { %3185 = vmatpush.bf16.msra.mxu3 %v4865_v40  ;;  %v5209_v40 = vld [vmem:[#allocation11 + $0x134] sm:$0xf0]  ;;  %v5291_v8 = vld [vmem:[#allocation11 + $0x3cc] sm:$0xf]  ;;  %v4485_v36 = vor.u32 %v5191_v32, %v4482_v51  ;;  %v4466_v52 = vld [vmem:[#allocation11 + $0x98] sm:$0xf0] }
 0x16e   :  { %3144 = vmatpush.bf16.msra.mxu0 %v4465_v7  ;;  %2216 = vst [vmem:[#allocation15] sm:$0xff] %v2212_v35  ;;  %v4545_v7 = vor.u32 %v5209_v40, %v4544_v26  ;;  %v5223_v10 = vld [vmem:[#allocation11 + $0x1ac] sm:$0xf]  ;;  %v4610_v26 = vld [vmem:[#allocation11 + $0x1b8] sm:$0xf0] }
 0x16f   :  { %3158 = vmatpush.bf16.msra.mxu1 %v4593_v43  ;;  %v2083_v43 = vpop.f32.mrf.mxu2  ;;  %v2097_v50 = vpop.f32.mrf.mxu3  ;;  %v5255_v35 = vld [vmem:[#allocation11 + $0x2ac] sm:$0xf]  ;;  %v4594_v38 = vld [vmem:[#allocation11 + $0x198] sm:$0xf0] }
 0x170   :  { %3172 = vmatpush.bf16.msra.mxu2 %v4721_v44  ;;  %v4528_v44 = vld [vmem:[#allocation11 + $0x108] sm:$0xf]  ;;  %v2084_v49 = vadd.f32 %v2083_v43, %v2070_v2  ;;  %v5287_v40 = vld [vmem:[#allocation11 + $0x3ac] sm:$0xf]  ;;  %v4613_v2 = vor.u32 %v5223_v10, %v4610_v26  ;;  %v4706_v58 = vld [vmem:[#allocation11 + $0x278] sm:$0xf0] }
 0x171   :  { %3186 = vmatpush.bf16.msra.mxu3 %v4849_v54  ;;  %v5237_v54 = vld [vmem:[#allocation11 + $0x214] sm:$0xf0]  ;;  %v4869_v28 = vor.u32 %v5287_v40, %v4866_v46  ;;  %v5283_v43 = vld [vmem:[#allocation11 + $0x38c] sm:$0xf]  ;;  %v4562_v1 = vld [vmem:[#allocation11 + $0x158] sm:$0xf0]  ;;  %v1313_v40 = vunpack.c.h.bf16 %v5797_v21 }
 0x172   :  { %3145 = vmatpush.bf16.msra.mxu0 %v4449_v62  ;;  %v2098_v22 = vadd.f32 %v2097_v50, %v2084_v49  ;;  %v5263_v62 = vld [vmem:[#allocation11 + $0x2ec] sm:$0xf]  ;;  %v4657_v59 = vor.u32 %v5237_v54, %v4656_v48  ;;  %v4450_v50 = vld [vmem:[#allocation11 + $0x78] sm:$0xf0] }
 0x173   :  { %3159 = vmatpush.bf16.msra.mxu1 %v4577_v63  ;;  %v4770_v63 = vld [vmem:[#allocation11 + $0x2f8] sm:$0xf0]  ;;  %v5183_v49 = vld [vmem:[#allocation11 + $0x6c] sm:$0xf] }
 0x174   :  { %3173 = vmatpush.bf16.msra.mxu2 %v4705_v0  ;;  %v4529_v0 = vor.u32 %v5205_v45, %v4528_v44  ;;  %v2214_v6 = vpack.c.bf16 %v2098_v22, %v2042_v60  ;;  %v4773_v42 = vor.u32 %v5263_v62, %v4770_v63  ;;  %v4850_v44 = vld [vmem:[#allocation11 + $0x398] sm:$0xf0]  ;;  %v4469_v45 = vor.u32 %v5187_v15, %v4466_v52  ;;  %v5215_v54 = vld [vmem:[#allocation11 + $0x16c] sm:$0xf] }
 0x175   :  { %3187 = vmatpush.bf16.msra.mxu3 %v4833_v9  ;;  %v4785_v9 = vor.u32 %v5269_v17, %v4784_v29  ;;  %v4853_v29 = vor.u32 %v5283_v43, %v4850_v44  ;;  %v4578_v17 = vld [vmem:[#allocation11 + $0x178] sm:$0xf0]  ;;  %v5247_v55 = vld [vmem:[#allocation11 + $0x26c] sm:$0xf]  ;;  %v4453_v22 = vor.u32 %v5183_v49, %v4450_v50 }
 0x176   :  { %3146 = vmatpush.bf16.msra.mxu0 %v4433_v13  ;;  %2218 = vst [vmem:[#allocation15 + $0x10] sm:$0xff] %v2214_v6  ;;  %v4882_v13 = vld [vmem:[#allocation11 + $0x3d8] sm:$0xf0]  ;;  %v4709_v61 = vor.u32 %v5247_v55, %v4706_v58  ;;  %v5179_v62 = vld [vmem:[#allocation11 + $0x4c] sm:$0xf] }
 0x177   :  { %3160 = vmatpush.bf16.msra.mxu1 %v4561_v47  ;;  %v4629_v47 = vor.u32 %v5227_v12, %v4626_v53  ;;  %v4885_v34 = vor.u32 %v5291_v8, %v4882_v13  ;;  %v4834_v60 = vld [vmem:[#allocation11 + $0x378] sm:$0xf0]  ;;  %v5243_v31 = vld [vmem:[#allocation11 + $0x24c] sm:$0xf] }
 0x178   :  { %3174 = vmatpush.bf16.msra.mxu2 %v4689_v57  ;;  %v4757_v57 = vor.u32 %v5259_v30, %v4754_v4  ;;  %v4434_v63 = vld [vmem:[#allocation11 + $0x58] sm:$0xf0]  ;;  %v5175_v25 = vld [vmem:[#allocation11 + $0x2c] sm:$0xf] }
 0x179   :  { %3188 = vmatpush.bf16.msra.mxu3 %v4817_v37  ;;  %v4738_v37 = vld [vmem:[#allocation11 + $0x2b8] sm:$0xf0]  ;;  %v4437_v11 = vor.u32 %v5179_v62, %v4434_v63  ;;  %v5207_v53 = vld [vmem:[#allocation11 + $0x12c] sm:$0xf] }
 0x17a   :  { %3147 = vmatpush.bf16.msra.mxu0 %v4417_v41  ;;  %v4741_v19 = vor.u32 %v5255_v35, %v4738_v37  ;;  %v5219_v41 = vld [vmem:[#allocation11 + $0x18c] sm:$0xf]  ;;  %v4690_v6 = vld [vmem:[#allocation11 + $0x258] sm:$0xf0] }
 0x17b   :  { %3161 = vmatpush.bf16.msra.mxu1 %v4545_v7  ;;  %v5251_v7 = vld [vmem:[#allocation11 + $0x28c] sm:$0xf]  ;;  %v4597_v48 = vor.u32 %v5219_v41, %v4594_v38  ;;  %v4418_v12 = vld [vmem:[#allocation11 + $0x38] sm:$0xf0] }
 0x17c   :  { %3175 = vmatpush.bf16.msra.mxu2 %v4673_v23  ;;  %v4722_v23 = vld [vmem:[#allocation11 + $0x298] sm:$0xf0]  ;;  %v5239_v4 = vld [vmem:[#allocation11 + $0x22c] sm:$0xf]  ;;  %v4421_v32 = vor.u32 %v5175_v25, %v4418_v12  ;;  %v2220_v12 = vld [vmem:[#allocation13] sm:$0xaa] }
 0x17d   :  { %3189 = vmatpush.bf16.msra.mxu3 %v4801_v20  ;;  %v4725_v20 = vor.u32 %v5251_v7, %v4722_v23  ;;  %v4546_v30 = vld [vmem:[#allocation11 + $0x138] sm:$0xf0]  ;;  %v5203_v35 = vld [vmem:[#allocation11 + $0x10c] sm:$0xf]  ;;  %v1318_v23 = vperm.slane %v1313_v40, 1 }
 0x17e   :  { %3148 = vmatpush.bf16.msra.mxu0 %v4401_v27  ;;  %v4581_v27 = vor.u32 %v5215_v54, %v4578_v17  ;;  %v4674_v8 = vld [vmem:[#allocation11 + $0x238] sm:$0xf0]  ;;  %v2109_v13 = vpop.f32.mrf.mxu0  ;;  %v4549_v51 = vor.u32 %v5207_v53, %v4546_v30 }
 0x17f   :  { %3162 = vmatpush.bf16.msra.mxu1 %v4529_v0  ;;  %v5211_v0 = vld [vmem:[#allocation11 + $0x14c] sm:$0xf]  ;;  %v4677_v10 = vor.u32 %v5239_v4, %v4674_v8  ;;  %v4402_v26 = vld [vmem:[#allocation11 + $0x18] sm:$0xf0] }
 0x180   :  { %3176 = vmatpush.bf16.msra.mxu2 %v4657_v59  ;;  %v4837_v59 = vor.u32 %v5279_v24, %v4834_v60  ;;  %v4530_v46 = vld [vmem:[#allocation11 + $0x118] sm:$0xf0] }
 0x181   :  { %3190 = vmatpush.bf16.msra.mxu3 %v4785_v9  ;;  %3149 = vmatmul.bf16.vlgmr.msra.gmra.mxu0 %v5785_v16  ;;  %v5275_v9 = vld [vmem:[#allocation11 + $0x34c] sm:$0xf]  ;;  %v4786_v15 = vld [vmem:[#allocation11 + $0x318] sm:$0xf0]  ;;  %v4533_v38 = vor.u32 %v5203_v35, %v4530_v46 }
 0x182   :  { %3197 = vmatpush.bf16.msrb.mxu0 %v4517_v39  ;;  %3163 = vmatmul.bf16.vlgmr.msra.gmra.mxu1 %v5789_v18  ;;  %v4818_v39 = vld [vmem:[#allocation11 + $0x358] sm:$0xf0] }
 0x183   :  { %3211 = vmatpush.bf16.msrb.mxu1 %v4645_v56  ;;  %3177 = vmatmul.bf16.vlgmr.msra.gmra.mxu2 %v5783_v33  ;;  %v4565_v56 = vor.u32 %v5211_v0, %v4562_v1 }
 0x184   :  { %3225 = vmatpush.bf16.msrb.mxu2 %v4773_v42  ;;  %3191 = vmatmul.bf16.vlgmr.msra.gmra.mxu3 %v5787_v5  ;;  %v4693_v42 = vor.u32 %v5243_v31, %v4690_v6 }
 0x185   :  { %3239 = vmatpush.bf16.msrb.mxu3 %v4901_v3  ;;  %v4821_v3 = vor.u32 %v5275_v9, %v4818_v39 }
 0x186   :  { %3198 = vmatpush.bf16.msrb.mxu0 %v4501_v14  ;;  %v5271_v14 = vld [vmem:[#allocation11 + $0x32c] sm:$0xf]  ;;  %v2137_v52 = vpop.f32.mrf.mxu2  ;;  %v2111_v44 = vpop.f32.mrf.mxu0 }
 0x187   :  { %3212 = vmatpush.bf16.msrb.mxu1 %v4629_v47  ;;  %v4802_v47 = vld [vmem:[#allocation11 + $0x338] sm:$0xf0] }
 0x188   :  { %3226 = vmatpush.bf16.msrb.mxu2 %v4757_v57  ;;  %v2123_v57 = vpop.f32.mrf.mxu1  ;;  %v4805_v37 = vor.u32 %v5271_v14, %v4802_v47 }
 0x189   :  { %3240 = vmatpush.bf16.msrb.mxu3 %v4885_v34  ;;  %v5171_v34 = vld [vmem:[#allocation11 + $0xc] sm:$0xf] }
 0x18a   :  { %3199 = vmatpush.bf16.msrb.mxu0 %v4485_v36  ;;  %v5235_v36 = vld [vmem:[#allocation11 + $0x20c] sm:$0xf]  ;;  %v4405_v41 = vor.u32 %v5171_v34, %v4402_v26 }
 0x18b   :  { %3213 = vmatpush.bf16.msrb.mxu1 %v4613_v2  ;;  %v4658_v2 = vld [vmem:[#allocation11 + $0x218] sm:$0xf0] }
 0x18c   :  { %3227 = vmatpush.bf16.msrb.mxu2 %v4741_v19  ;;  %v5267_v19 = vld [vmem:[#allocation11 + $0x30c] sm:$0xf]  ;;  %v4661_v7 = vor.u32 %v5235_v36, %v4658_v2 }
 0x18d   :  { %3241 = vmatpush.bf16.msrb.mxu3 %v4869_v28  ;;  %v2151_v28 = vpop.f32.mrf.mxu3  ;;  %v4789_v43 = vor.u32 %v5267_v19, %v4786_v15 }
 0x18e   :  { %3200 = vmatpush.bf16.msrb.mxu0 %v4469_v45  ;;  %v1326_v45 = vperm.slane %v1318_v23, 1 }
 0x18f   :  { %3214 = vmatpush.bf16.msrb.mxu1 %v4597_v48  ;;  %v1319_v48 = vperm.slane %v1313_v40, 5 }
 0x190   :  { %3228 = vmatpush.bf16.msrb.mxu2 %v4725_v20  ;;  %v2125_v21 = vpop.f32.mrf.mxu1  ;;  %v2139_v20 = vpop.f32.mrf.mxu2  ;;  %v2110_v49 = vadd.f32 %v2109_v13, %v1326_v45 }
 0x191   :  { %3242 = vmatpush.bf16.msrb.mxu3 %v4853_v29  ;;  %v1327_v54 = vperm.slane %v1319_v48, 1 }
 0x192   :  { %3201 = vmatpush.bf16.msrb.mxu0 %v4453_v22  ;;  %v2124_v29 = vadd.f32 %v2123_v57, %v2110_v49  ;;  %v2112_v22 = vadd.f32 %v2111_v44, %v1326_v45 }
 0x193   :  { %3215 = vmatpush.bf16.msrb.mxu1 %v4581_v27 }
 0x194   :  { %3229 = vmatpush.bf16.msrb.mxu2 %v4709_v61  ;;  %v2138_v60 = vadd.f32 %v2137_v52, %v2124_v29 }
 0x195   :  { %3243 = vmatpush.bf16.msrb.mxu3 %v4837_v59  ;;  %v2153_v50 = vpop.f32.mrf.mxu3 }
 0x196   :  { %3202 = vmatpush.bf16.msrb.mxu0 %v4437_v11  ;;  %v2152_v62 = vadd.f32 %v2151_v28, %v2138_v60 }
 0x197   :  { %3216 = vmatpush.bf16.msrb.mxu1 %v4565_v56 }
 0x198   :  { %3230 = vmatpush.bf16.msrb.mxu2 %v4693_v42 }
 0x199   :  { %3244 = vmatpush.bf16.msrb.mxu3 %v4821_v3  ;;  %v2353_v3 = vunpack.c.l.bf16 %v2220_v12 }
 0x19a   :  { %3203 = vmatpush.bf16.msrb.mxu0 %v4421_v32 }
 0x19b   :  { %3217 = vmatpush.bf16.msrb.mxu1 %v4549_v51  ;;  %v2357_v8 = vperm.slane %v2353_v3, 2  ;;  %v2358_v57 = vperm.slane %v2353_v3, 6 }
 0x19c   :  { %3231 = vmatpush.bf16.msrb.mxu2 %v4677_v10 }
 0x19d   :  { %3245 = vmatpush.bf16.msrb.mxu3 %v4805_v37  ;;  %v2365_v47 = vperm.slane %v2357_v8, 2  ;;  %v2366_v34 = vperm.slane %v2358_v57, 2 }
 0x19e   :  { %3204 = vmatpush.bf16.msrb.mxu0 %v4405_v41  ;;  %v2165_v17 = vpop.f32.mrf.mxu0 }
 0x19f   :  { %3218 = vmatpush.bf16.msrb.mxu1 %v4533_v38  ;;  %v2166_v55 = vadd.f32 %v2165_v17, %v1327_v54  ;;  %v2179_v58 = vpop.f32.mrf.mxu1 }
 0x1a0   :  { %3232 = vmatpush.bf16.msrb.mxu2 %v4661_v7 }
 0x1a1   :  { %3246 = vmatpush.bf16.msrb.mxu3 %v4789_v43  ;;  %3205 = vmatmul.bf16.vlgmr.msrb.gmra.mxu0 %v5785_v16  ;;  %v2180_v24 = vadd.f32 %v2179_v58, %v2166_v55  ;;  %v2354_v58 = vunpack.c.h.bf16 %v2220_v12 }
 0x1a2   :  { %3219 = vmatmul.bf16.vlgmr.msrb.gmra.mxu1 %v5789_v18  ;;  %v2126_v18 = vadd.f32 %v2125_v21, %v2112_v22 }
 0x1a3   :  { %3233 = vmatmul.bf16.vlgmr.msrb.gmra.mxu2 %v5783_v33  ;;  %v2359_v60 = vperm.slane %v2354_v58, 2 }
 0x1a4   :  { %3247 = vmatmul.bf16.vlgmr.msrb.gmra.mxu3 %v5787_v5  ;;  %v2140_v31 = vadd.f32 %v2139_v20, %v2126_v18 }
 0x1a6   :  { %v2193_v27 = vpop.f32.mrf.mxu2  ;;  %v2167_v33 = vpop.f32.mrf.mxu0  ;;  %v2154_v11 = vadd.f32 %v2153_v50, %v2140_v31 }
 0x1a7   :  { %v2194_v16 = vadd.f32 %v2193_v27, %v2180_v24  ;;  %v2207_v61 = vpop.f32.mrf.mxu3  ;;  %v2168_v0 = vadd.f32 %v2167_v33, %v1327_v54  ;;  %v2181_v5 = vpop.f32.mrf.mxu1 }
 0x1a9   :  { %v2208_v63 = vadd.f32 %v2207_v61, %v2194_v16  ;;  %v2182_v1 = vadd.f32 %v2181_v5, %v2168_v0  ;;  %v2360_v16 = vperm.slane %v2354_v58, 6  ;;  %v2367_v61 = vperm.slane %v2359_v60, 2 }
 0x1ab   :  { %v2213_v59 = vpack.c.bf16 %v2208_v63, %v2152_v62  ;;  %v2368_v18 = vperm.slane %v2360_v16, 2 }
 0x1ad   :  { %2217 = vst [vmem:[#allocation15 + $0x8] sm:$0xff] %v2213_v59 }
 0x1ae   :  { %v2195_v6 = vpop.f32.mrf.mxu2 }
 0x1af   :  { %v2196_v9 = vadd.f32 %v2195_v6, %v2182_v1  ;;  %v2209_v39 = vpop.f32.mrf.mxu3 }
 0x1b1   :  { %v2210_v56 = vadd.f32 %v2209_v39, %v2196_v9 }
 0x1b3   :  { %v2215_v42 = vpack.c.bf16 %v2210_v56, %v2154_v11 }
 0x1b5   :  { %2219 = vst [vmem:[#allocation15 + $0x18] sm:$0xff] %v2215_v42 }
 0x1b6   :  { %3286 = dma.vmem_to_hbm [thread:$0]  %s3279_s21, 512, %s3281_s27, [#allocation16], %s5563_s17, %s5563_s17, %s5564_s18  }
 0x1be   :  { %v3038_v25 = vpop.f32.mrf.mxu0 }
 0x1bf   :  { %v3052_v53 = vpop.f32.mrf.mxu1  ;;  %v3039_v51 = vadd.f32 %v3038_v25, %v2365_v47 }
 0x1c1   :  { %v3053_v26 = vadd.f32 %v3052_v53, %v3039_v51 }
 0x1c6   :  { %v3066_v30 = vpop.f32.mrf.mxu2  ;;  %v3040_v13 = vpop.f32.mrf.mxu0 }
 0x1c7   :  { %v3080_v4 = vpop.f32.mrf.mxu3  ;;  %v3054_v14 = vpop.f32.mrf.mxu1  ;;  %v3067_v36 = vadd.f32 %v3066_v30, %v3053_v26  ;;  %v3041_v2 = vadd.f32 %v3040_v13, %v2365_v47 }
 0x1c9   :  { %v3081_v41 = vadd.f32 %v3080_v4, %v3067_v36  ;;  %v3055_v28 = vadd.f32 %v3054_v14, %v3041_v2 }
 0x1ce   :  { %v3068_v32 = vpop.f32.mrf.mxu2 }
 0x1cf   :  { %v3082_v10 = vpop.f32.mrf.mxu3  ;;  %v3069_v45 = vadd.f32 %v3068_v32, %v3055_v28 }
 0x1d1   :  { %v3083_v50 = vadd.f32 %v3082_v10, %v3069_v45 }
 0x1de   :  { %v3094_v35 = vpop.f32.mrf.mxu0 }
 0x1df   :  { %v3095_v37 = vadd.f32 %v3094_v35, %v2366_v34  ;;  %v3108_v40 = vpop.f32.mrf.mxu1 }
 0x1e1   :  { %v3109_v46 = vadd.f32 %v3108_v40, %v3095_v37 }
 0x1e6   :  { %v3122_v19 = vpop.f32.mrf.mxu2  ;;  %v3096_v7 = vpop.f32.mrf.mxu0 }
 0x1e7   :  { %v3123_v15 = vadd.f32 %v3122_v19, %v3109_v46  ;;  %v3136_v52 = vpop.f32.mrf.mxu3  ;;  %v3097_v23 = vadd.f32 %v3096_v7, %v2366_v34  ;;  %v3110_v43 = vpop.f32.mrf.mxu1 }
 0x1e9   :  { %v3137_v38 = vadd.f32 %v3136_v52, %v3123_v15  ;;  %v3111_v21 = vadd.f32 %v3110_v43, %v3097_v23 }
 0x1eb   :  { %v3253_v44 = vpack.c.bf16 %v3137_v38, %v3081_v41 }
 0x1ed   :  { %3257 = vst [vmem:[#allocation17] sm:$0xff] %v3253_v44 }
 0x1ee   :  { %v3124_v48 = vpop.f32.mrf.mxu2 }
 0x1ef   :  { %v3125_v20 = vadd.f32 %v3124_v48, %v3111_v21  ;;  %v3138_v49 = vpop.f32.mrf.mxu3 }
 0x1f1   :  { %v3139_v54 = vadd.f32 %v3138_v49, %v3125_v20 }
 0x1f3   :  { %v3255_v29 = vpack.c.bf16 %v3139_v54, %v3083_v50 }
 0x1f5   :  { %3259 = vst [vmem:[#allocation17 + $0x10] sm:$0xff] %v3255_v29 }
 0x1fe   :  { %v3150_v17 = vpop.f32.mrf.mxu0 }
 0x1ff   :  { %v3164_v55 = vpop.f32.mrf.mxu1  ;;  %v3151_v63 = vadd.f32 %v3150_v17, %v2367_v61 }
 0x201   :  { %v3165_v1 = vadd.f32 %v3164_v55, %v3151_v63 }
 0x206   :  { %v3178_v24 = vpop.f32.mrf.mxu2  ;;  %v3152_v27 = vpop.f32.mrf.mxu0 }
 0x207   :  { %v3192_v22 = vpop.f32.mrf.mxu3  ;;  %v3166_v62 = vpop.f32.mrf.mxu1  ;;  %v3179_v9 = vadd.f32 %v3178_v24, %v3165_v1  ;;  %v3153_v39 = vadd.f32 %v3152_v27, %v2367_v61 }
 0x209   :  { %v3193_v12 = vadd.f32 %v3192_v22, %v3179_v9  ;;  %v3167_v53 = vadd.f32 %v3166_v62, %v3153_v39 }
 0x20e   :  { %v3180_v33 = vpop.f32.mrf.mxu2 }
 0x20f   :  { %v3194_v0 = vpop.f32.mrf.mxu3  ;;  %v3181_v13 = vadd.f32 %v3180_v33, %v3167_v53 }
 0x211   :  { %v3195_v51 = vadd.f32 %v3194_v0, %v3181_v13 }
 0x21e   :  { %v3206_v5 = vpop.f32.mrf.mxu0 }
 0x21f   :  { %v3207_v59 = vadd.f32 %v3206_v5, %v2368_v18  ;;  %v3220_v31 = vpop.f32.mrf.mxu1 }
 0x221   :  { %v3221_v6 = vadd.f32 %v3220_v31, %v3207_v59 }
 0x226   :  { %v3234_v11 = vpop.f32.mrf.mxu2  ;;  %v3208_v25 = vpop.f32.mrf.mxu0 }
 0x227   :  { %v3235_v56 = vadd.f32 %v3234_v11, %v3221_v6  ;;  %v3248_v42 = vpop.f32.mrf.mxu3  ;;  %v3209_v30 = vadd.f32 %v3208_v25, %v2368_v18  ;;  %v3222_v8 = vpop.f32.mrf.mxu1 }
 0x229   :  { %v3249_v3 = vadd.f32 %v3248_v42, %v3235_v56  ;;  %v3223_v14 = vadd.f32 %v3222_v8, %v3209_v30 }
 0x22b   :  { %v3254_v4 = vpack.c.bf16 %v3249_v3, %v3193_v12 }
 0x22d   :  { %3258 = vst [vmem:[#allocation17 + $0x8] sm:$0xff] %v3254_v4 }
 0x22e   :  { %v3236_v47 = vpop.f32.mrf.mxu2 }
 0x22f   :  { %v3237_v57 = vadd.f32 %v3236_v47, %v3223_v14  ;;  %v3250_v32 = vpop.f32.mrf.mxu3 }
 0x231   :  { %v3251_v10 = vadd.f32 %v3250_v32, %v3237_v57 }
 0x233   :  { %v3256_v34 = vpack.c.bf16 %v3251_v10, %v3195_v51 }
 0x235   :  { %3260 = vst [vmem:[#allocation17 + $0x18] sm:$0xff] %v3256_v34 }
 0x236   :  { %3299 = dma.vmem_to_hbm [thread:$0]  %s3292_s8, 512, %s3294_s29, [#allocation16], %s5563_s17, %s5563_s17, %s5564_s18  }
 0x237   :  { %5558 = dma.done.wait [#allocation4], 512  }
 0x238   :  { %5559 = vsyncadd [#allocation4], 4294966784 }
 0x239   :  { %5560 = dma.done.wait [#allocation16], 1024  }
 0x23a   :  { %5561 = vsyncadd [#allocation16], 4294966272 }
 0x23b   :  { %3312 = vsyncpa [#allocation3], 1 }
 0x23c   :  { %3313 = vsyncpa [#allocation6], 1 }
 0x23d   :  { %3314 = vsyncpa [#allocation9], 1 }
 0x23e   :  { %3315 = vsyncpa [#allocation12], 1 }
 0x23f   :  { %3316 = vsyncpa [#allocation4], 1 }
 0x240   :  { %3317 = vsyncpa [#allocation16], 1 }

</bundles_post_ra>
